<compile_context>
chip_gen: v5e
topology: v5e:2x2
jax: 0.10.0
libtpu: 0.0.40
codegen_flags: <defaults>
</compile_context>

<pallas_src>
import math

import jax
import jax.numpy as jnp
from jax.experimental import pallas as pl
from jax.experimental.pallas import tpu as pltpu

X_ENC = 128
Z_SIZE = 128            # residual connection `out + z` forces z_size == x_enc_size
BETA_SCALE = 100.0
LRELU_SLOPE = 0.01      # F.leaky_relu default negative_slope
_LOG2PI = 1.8378770664093453
_HALF_LOG_2PI = 0.9189385332046727
LGAMMA_AB = math.lgamma(BETA_SCALE)   # lgamma(alpha*s + (1-alpha)*s) == lgamma(s)

# Set to jnp.float32 for exact f32 parity; bf16 operands / f32 accumulation is the
# native MXU mode on every TPU generation.
MATMUL_DTYPE = jnp.bfloat16

# Lanczos (g=7, n=9) partial-fraction coefficients.
_LANCZOS_G = 7.0
_LANCZOS_COEF = (0.99999999999980993, 676.5203681218851, -1259.1392167224028,
                 771.32342877765313, -176.61502916214059, 12.507343278686905,
                 -0.13857109526572012, 9.9843695780195716e-6, 1.5056327351493116e-7)

# ---- packed-parameter row indices -------------------------------------------
(W_QZX_FC1, W_QZX_FC2, W_QZX_FC3_MU, W_QZX_FC3_LV,
 W_Z2E_FC1, W_Z2E_FC2, W_Z2E_FC3, W_Z2E_FC4, W_Z2E_FC5) = range(9)
N_WSTACK = 9

(B_ENC,
 B_QZX_FC1, G_QZX_BN1, BB_QZX_BN1, B_QZX_FC2, B_QZX_FC3_MU, B_QZX_FC3_LV,
 B_Z2E_FC1, G_Z2E_BN1, BB_Z2E_BN1, B_Z2E_FC2, B_Z2E_FC3,
 G_Z2E_BN2, BB_Z2E_BN2, B_Z2E_FC4, B_Z2E_FC5) = range(16)
N_BSTACK = 16

N_STAT = 5 * Z_SIZE   # [z | logvar | logpx | logpz | logqz], each 128 lanes


# ------------------------- in-kernel helpers ---------------------------------

def _leaky_relu(x):
    return jnp.where(x > 0, x, LRELU_SLOPE * x)


def _lgamma_pos(x):
    """lgamma(x) for x > 0 via Lanczos partial-fraction sum (divides hit the EUP)."""
    xm1 = x - 1.0
    s = jnp.full_like(x, _LANCZOS_COEF[0])
    for i in range(1, len(_LANCZOS_COEF)):
        s = s + _LANCZOS_COEF[i] / (xm1 + float(i))
    t = xm1 + (_LANCZOS_G + 0.5)
    return _HALF_LOG_2PI + (xm1 + 0.5) * jnp.log(t) - t + jnp.log(s)


# ------------------------- fused Pallas kernel -------------------------------

def _vae_fused_kernel(x_ref, u_ref, eps_ref, wstack_ref, enc_w_ref, dec_w_ref,
                      bstack_ref, dec_b_ref, alpha_ref, stats_ref):
    B, D = x_ref.shape

    def w(r):                       # (128, 128) bf16 weight slab, static row slice
        return wstack_ref[r * X_ENC:(r + 1) * X_ENC, :]

    def b(r):                       # (1, 128) f32 bias / BN row
        return bstack_ref[r:r + 1, :]

    def lin(h, wr, br, act=False):
        y = jnp.dot(h.astype(MATMUL_DTYPE), w(wr),
                    preferred_element_type=jnp.float32) + b(br)
        return _leaky_relu(y) if act else y

    def bn_lrelu(h, gr, br):
        # BatchNorm1d in training mode: batch statistics (biased variance), eps=1e-5.
        mean = jnp.mean(h, axis=0, keepdims=True)
        var = jnp.mean((h - mean) ** 2, axis=0, keepdims=True)
        y = (h - mean) * jax.lax.rsqrt(var + 1e-5) * b(gr) + b(br)
        return _leaky_relu(y)

    x_flat = x_ref[...]

    # ---- image encoder (stand-in, see module-level TODO) --------------------
    x_enc = _leaky_relu(
        jnp.dot(x_flat.astype(MATMUL_DTYPE), enc_w_ref[...],
                preferred_element_type=jnp.float32) + b(B_ENC))

    # ---- inference_net -------------------------------------------------------
    h = bn_lrelu(lin(x_enc, W_QZX_FC1, B_QZX_FC1), G_QZX_BN1, BB_QZX_BN1)
    h = lin(h, W_QZX_FC2, B_QZX_FC2) + x_enc
    mu = lin(h, W_QZX_FC3_MU, B_QZX_FC3_MU)
    logvar = jnp.clip(lin(h, W_QZX_FC3_LV, B_QZX_FC3_LV), -15.0, 10.0)

    # ---- reparameterized sample + prior / posterior log-densities -----------
    eps = eps_ref[...]
    z = eps * jnp.exp(0.5 * logvar) + mu
    logpz = -0.5 * jnp.sum(_LOG2PI + z * z, axis=1, keepdims=True)
    # (z - mu)^2 * exp(-logvar) == eps^2 exactly (one fewer exp, less rounding).
    logqz = -0.5 * jnp.sum(_LOG2PI + logvar + eps * eps, axis=1, keepdims=True)

    # ---- z_to_dec ------------------------------------------------------------
    h = bn_lrelu(lin(z, W_Z2E_FC1, B_Z2E_FC1), G_Z2E_BN1, BB_Z2E_BN1)
    zr = lin(h, W_Z2E_FC2, B_Z2E_FC2) + z
    h = bn_lrelu(lin(zr, W_Z2E_FC3, B_Z2E_FC3), G_Z2E_BN2, BB_Z2E_BN2)
    zr = lin(h, W_Z2E_FC4, B_Z2E_FC4) + zr
    z_dec = lin(zr, W_Z2E_FC5, B_Z2E_FC5)

    # ---- image decoder (stand-in) -> Beta log-likelihood ---------------------
    x_hat = (jnp.dot(z_dec.astype(MATMUL_DTYPE), dec_w_ref[...],
                     preferred_element_type=jnp.float32) + dec_b_ref[...])
    alpha = 0.5 * (jnp.tanh(0.5 * x_hat) + 1.0)   # overflow-safe sigmoid
    alpha_ref[...] = alpha

    xn = jnp.clip(x_flat + u_ref[...], 1e-5, 1.0 - 1e-5)
    # Clamp concentrations away from 0/1 so f32 lgamma stays off the pole;
    # affects the likelihood only for extreme logits, x_recon stays unclamped.
    a_cl = jnp.clip(alpha, 1e-5, 1.0 - 1e-5)
    a = a_cl * BETA_SCALE
    b_conc = BETA_SCALE - a
    lp = ((a - 1.0) * jnp.log(xn) + (b_conc - 1.0) * jnp.log(1.0 - xn)
          - _lgamma_pos(a) - _lgamma_pos(b_conc) + LGAMMA_AB)
    logpx = jnp.sum(lp, axis=1, keepdims=True)

    # ---- single lane-dense stats slab: [z | logvar | logpx | logpz | logqz] --
    stats_ref[:, 0:Z_SIZE] = z
    stats_ref[:, Z_SIZE:2 * Z_SIZE] = logvar
    stats_ref[:, 2 * Z_SIZE:3 * Z_SIZE] = jnp.broadcast_to(logpx, (B, Z_SIZE))
    stats_ref[:, 3 * Z_SIZE:4 * Z_SIZE] = jnp.broadcast_to(logpz, (B, Z_SIZE))
    stats_ref[:, 4 * Z_SIZE:5 * Z_SIZE] = jnp.broadcast_to(logqz, (B, Z_SIZE))


# ------------------------- parameters, packing & forward ---------------------

def init_params(key, img_dim):
    keys = jax.random.split(key, 16)

    def lin(k, fan_in, fan_out):
        w = jax.random.normal(k, (fan_in, fan_out), jnp.float32) / jnp.sqrt(float(fan_in))
        return w, jnp.zeros((fan_out,), jnp.float32)

    p = {}
    p['enc_w'], p['enc_b'] = lin(keys[0], img_dim, X_ENC)
    p['qzx_fc1_w'], p['qzx_fc1_b'] = lin(keys[1], X_ENC, X_ENC)
    p['qzx_bn1_g'] = jnp.ones((X_ENC,), jnp.float32)
    p['qzx_bn1_b'] = jnp.zeros((X_ENC,), jnp.float32)
    p['qzx_fc2_w'], p['qzx_fc2_b'] = lin(keys[2], X_ENC, X_ENC)
    p['qzx_fc3_w'], p['qzx_fc3_b'] = lin(keys[3], X_ENC, 2 * Z_SIZE)
    p['z2e_fc1_w'], p['z2e_fc1_b'] = lin(keys[4], Z_SIZE, X_ENC)
    p['z2e_bn1_g'] = jnp.ones((X_ENC,), jnp.float32)
    p['z2e_bn1_b'] = jnp.zeros((X_ENC,), jnp.float32)
    p['z2e_fc2_w'], p['z2e_fc2_b'] = lin(keys[5], X_ENC, X_ENC)
    p['z2e_fc3_w'], p['z2e_fc3_b'] = lin(keys[6], X_ENC, X_ENC)
    p['z2e_fc4_w'], p['z2e_fc4_b'] = lin(keys[7], X_ENC, X_ENC)
    p['z2e_bn2_g'] = jnp.ones((X_ENC,), jnp.float32)
    p['z2e_bn2_b'] = jnp.zeros((X_ENC,), jnp.float32)
    p['z2e_fc5_w'], p['z2e_fc5_b'] = lin(keys[8], X_ENC, X_ENC)
    p['dec_w'], p['dec_b'] = lin(keys[9], X_ENC, img_dim)
    return p


def _pack_params(p):
    """Pack 26 tensors into 4 lane-dense buffers (see perf notes at top)."""
    w_rows = [p['qzx_fc1_w'], p['qzx_fc2_w'],
              p['qzx_fc3_w'][:, :Z_SIZE], p['qzx_fc3_w'][:, Z_SIZE:],
              p['z2e_fc1_w'], p['z2e_fc2_w'], p['z2e_fc3_w'],
              p['z2e_fc4_w'], p['z2e_fc5_w']]
    wstack = jnp.concatenate(w_rows, axis=0).astype(MATMUL_DTYPE)     # (9*128, 128)

    b_rows = [p['enc_b'],
              p['qzx_fc1_b'], p['qzx_bn1_g'], p['qzx_bn1_b'], p['qzx_fc2_b'],
              p['qzx_fc3_b'][:Z_SIZE], p['qzx_fc3_b'][Z_SIZE:],
              p['z2e_fc1_b'], p['z2e_bn1_g'], p['z2e_bn1_b'], p['z2e_fc2_b'],
              p['z2e_fc3_b'], p['z2e_bn2_g'], p['z2e_bn2_b'], p['z2e_fc4_b'],
              p['z2e_fc5_b']]
    bstack = jnp.stack(b_rows, axis=0).astype(jnp.float32)            # (16, 128)

    enc_w = p['enc_w'].astype(MATMUL_DTYPE)                           # (D, 128)
    dec_w = p['dec_w'].astype(MATMUL_DTYPE)                           # (128, D)
    dec_b = p['dec_b'].reshape(1, -1).astype(jnp.float32)             # (1, D)
    return wstack, enc_w, dec_w, bstack, dec_b


def vae_forward(params, x, eps, u_noise, warmup=1.0):
    B, C, H, W = x.shape
    D = C * H * W
    x_flat = x.reshape(B, D)
    u_flat = u_noise.reshape(B, D)

    wstack, enc_w, dec_w, bstack, dec_b = _pack_params(params)
    inputs = [x_flat, u_flat, eps, wstack, enc_w, dec_w, bstack, dec_b]

    vmem = pl.BlockSpec(memory_space=pltpu.MemorySpace.VMEM)
    out_shapes = (
        jax.ShapeDtypeStruct((B, D), jnp.float32),       # alpha (x_recon)
        jax.ShapeDtypeStruct((B, N_STAT), jnp.float32),  # [z|logvar|logpx|logpz|logqz]
    )

    alpha, stats = pl.pallas_call(
        _vae_fused_kernel,
        out_shape=out_shapes,
        in_specs=[vmem] * len(inputs),
        out_specs=(vmem, vmem),
    )(*inputs)

    z = stats[:, 0:Z_SIZE]
    logvar = stats[:, Z_SIZE:2 * Z_SIZE]
    logpx = stats[:, 2 * Z_SIZE]
    logpz = stats[:, 3 * Z_SIZE]
    logqz = stats[:, 4 * Z_SIZE]
    log_ws = logpx + logpz - logqz
    return {
        'logpx': jnp.mean(logpx),
        'x_recon': alpha.reshape(B, C, H, W),
        'welbo': jnp.mean(logpx + warmup * (logpz - logqz)),
        'elbo': jnp.mean(log_ws),
        'logws': log_ws,
        'z': z,
        'logpz': jnp.mean(logpz),
        'logqz': jnp.mean(logqz),
        'logvar': logvar,
    }


if __name__ == "__main__":
    key = jax.random.PRNGKey(0)
    k_param, k_x, k_eps, k_u = jax.random.split(key, 4)

    B, C, H, W = 8, 3, 16, 16
    params = init_params(k_param, C * H * W)
    x = jax.random.uniform(k_x, (B, C, H, W), jnp.float32)                   # image in [0, 1)
    eps = jax.random.normal(k_eps, (B, Z_SIZE), jnp.float32)                 # reparam noise
    u_noise = jax.random.uniform(k_u, (B, C, H, W), jnp.float32,
                                 minval=0.0, maxval=1.0 / 256.0)             # dequant noise

    outputs = jax.jit(vae_forward)(params, x, eps, u_noise)
    jax.block_until_ready(outputs)

    assert outputs['x_recon'].shape == (B, C, H, W)
    assert outputs['z'].shape == (B, Z_SIZE)
    assert outputs['logvar'].shape == (B, Z_SIZE)
    assert outputs['logws'].shape == (B,)
    assert bool(jnp.all(jnp.isfinite(outputs['logws'])))
    assert bool(jnp.all(jnp.isfinite(outputs['x_recon'])))
    print("KERNEL_OK")
</pallas_src>

<mosaic_0001>
module attributes {stable_mosaic.version = 11 : i64} {
  func.func @_vae_fused_kernel(%arg0: memref<8x768xf32, #tpu.memory_space<vmem>>, %arg1: memref<8x768xf32, #tpu.memory_space<vmem>>, %arg2: memref<8x128xf32, #tpu.memory_space<vmem>>, %arg3: memref<1152x128xbf16, #tpu.memory_space<vmem>>, %arg4: memref<768x128xbf16, #tpu.memory_space<vmem>>, %arg5: memref<128x768xbf16, #tpu.memory_space<vmem>>, %arg6: memref<16x128xf32, #tpu.memory_space<vmem>>, %arg7: memref<1x768xf32, #tpu.memory_space<vmem>>, %arg8: memref<8x768xf32, #tpu.memory_space<vmem>>, %arg9: memref<8x640xf32, #tpu.memory_space<vmem>>) attributes {dimension_semantics = [], scalar_prefetch = 0 : i64, scratch_operands = 0 : i64, tpu.core_type = #tpu.core_type<tc>} {
    %c0 = arith.constant 0 : index
    %c0_0 = arith.constant 0 : index
    %0 = vector.load %arg0[%c0, %c0_0] : memref<8x768xf32, #tpu.memory_space<vmem>>, vector<8x768xf32>
    %1 = arith.truncf %0 : vector<8x768xf32> to vector<8x768xbf16>
    %c0_1 = arith.constant 0 : index
    %c0_2 = arith.constant 0 : index
    %2 = vector.load %arg4[%c0_1, %c0_2] : memref<768x128xbf16, #tpu.memory_space<vmem>>, vector<768x128xbf16>
    %cst = arith.constant dense<0.000000e+00> : vector<8x128xf32>
    %3 = tpu.matmul %1, %2, %cst {dimension_numbers = #tpu.dot_dimension_numbers<[1], [0], [0], [1], [0, 0, 1, 1], [], []>} : vector<8x768xbf16>, vector<768x128xbf16>, vector<8x128xf32> -> vector<8x128xf32>
    %c0_3 = arith.constant 0 : index
    %c0_4 = arith.constant 0 : index
    %4 = vector.load %arg6[%c0_3, %c0_4] : memref<16x128xf32, #tpu.memory_space<vmem>>, vector<1x128xf32>
    %5 = vector.broadcast %4 : vector<1x128xf32> to vector<8x128xf32>
    %6 = arith.addf %3, %5 : vector<8x128xf32>
    %cst_5 = arith.constant 0.000000e+00 : f32
    %7 = vector.broadcast %cst_5 : f32 to vector<8x128xf32>
    %8 = arith.cmpf ogt, %6, %7 : vector<8x128xf32>
    %cst_6 = arith.constant 0.00999999977 : f32
    %9 = vector.broadcast %cst_6 : f32 to vector<8x128xf32>
    %10 = arith.mulf %9, %6 : vector<8x128xf32>
    %11 = arith.select %8, %6, %10 : vector<8x128xi1>, vector<8x128xf32>
    %12 = arith.truncf %11 : vector<8x128xf32> to vector<8x128xbf16>
    %c0_7 = arith.constant 0 : index
    %c0_8 = arith.constant 0 : index
    %13 = vector.load %arg3[%c0_7, %c0_8] : memref<1152x128xbf16, #tpu.memory_space<vmem>>, vector<128x128xbf16>
    %cst_9 = arith.constant dense<0.000000e+00> : vector<8x128xf32>
    %14 = tpu.matmul %12, %13, %cst_9 {dimension_numbers = #tpu.dot_dimension_numbers<[1], [0], [0], [1], [0, 0, 1, 1], [], []>} : vector<8x128xbf16>, vector<128x128xbf16>, vector<8x128xf32> -> vector<8x128xf32>
    %c1 = arith.constant 1 : index
    %c0_10 = arith.constant 0 : index
    %15 = vector.load %arg6[%c1, %c0_10] : memref<16x128xf32, #tpu.memory_space<vmem>>, vector<1x128xf32>
    %16 = vector.broadcast %15 : vector<1x128xf32> to vector<8x128xf32>
    %17 = arith.addf %14, %16 : vector<8x128xf32>
    %cst_11 = arith.constant dense<0.000000e+00> : vector<128xf32>
    %18 = vector.multi_reduction <add>, %17, %cst_11 [0] : vector<8x128xf32> to vector<128xf32>
    %19 = vector.shape_cast %18 : vector<128xf32> to vector<1x128xf32>
    %cst_12 = arith.constant 8.000000e+00 : f32
    %20 = vector.broadcast %cst_12 : f32 to vector<1x128xf32>
    %21 = arith.divf %19, %20 : vector<1x128xf32>
    %22 = vector.broadcast %21 : vector<1x128xf32> to vector<8x128xf32>
    %23 = arith.subf %17, %22 : vector<8x128xf32>
    %24 = arith.mulf %23, %23 : vector<8x128xf32>
    %cst_13 = arith.constant dense<0.000000e+00> : vector<128xf32>
    %25 = vector.multi_reduction <add>, %24, %cst_13 [0] : vector<8x128xf32> to vector<128xf32>
    %26 = vector.shape_cast %25 : vector<128xf32> to vector<1x128xf32>
    %cst_14 = arith.constant 8.000000e+00 : f32
    %27 = vector.broadcast %cst_14 : f32 to vector<1x128xf32>
    %28 = arith.divf %26, %27 : vector<1x128xf32>
    %29 = vector.broadcast %21 : vector<1x128xf32> to vector<8x128xf32>
    %30 = arith.subf %17, %29 : vector<8x128xf32>
    %cst_15 = arith.constant 9.99999974E-6 : f32
    %31 = vector.broadcast %cst_15 : f32 to vector<1x128xf32>
    %32 = arith.addf %28, %31 : vector<1x128xf32>
    %33 = math.rsqrt %32 : vector<1x128xf32>
    %34 = vector.broadcast %33 : vector<1x128xf32> to vector<8x128xf32>
    %35 = arith.mulf %30, %34 : vector<8x128xf32>
    %c2 = arith.constant 2 : index
    %c0_16 = arith.constant 0 : index
    %36 = vector.load %arg6[%c2, %c0_16] : memref<16x128xf32, #tpu.memory_space<vmem>>, vector<1x128xf32>
    %37 = vector.broadcast %36 : vector<1x128xf32> to vector<8x128xf32>
    %38 = arith.mulf %35, %37 : vector<8x128xf32>
    %c3 = arith.constant 3 : index
    %c0_17 = arith.constant 0 : index
    %39 = vector.load %arg6[%c3, %c0_17] : memref<16x128xf32, #tpu.memory_space<vmem>>, vector<1x128xf32>
    %40 = vector.broadcast %39 : vector<1x128xf32> to vector<8x128xf32>
    %41 = arith.addf %38, %40 : vector<8x128xf32>
    %cst_18 = arith.constant 0.000000e+00 : f32
    %42 = vector.broadcast %cst_18 : f32 to vector<8x128xf32>
    %43 = arith.cmpf ogt, %41, %42 : vector<8x128xf32>
    %cst_19 = arith.constant 0.00999999977 : f32
    %44 = vector.broadcast %cst_19 : f32 to vector<8x128xf32>
    %45 = arith.mulf %44, %41 : vector<8x128xf32>
    %46 = arith.select %43, %41, %45 : vector<8x128xi1>, vector<8x128xf32>
    %47 = arith.truncf %46 : vector<8x128xf32> to vector<8x128xbf16>
    %c128 = arith.constant 128 : index
    %c0_20 = arith.constant 0 : index
    %48 = vector.load %arg3[%c128, %c0_20] : memref<1152x128xbf16, #tpu.memory_space<vmem>>, vector<128x128xbf16>
    %cst_21 = arith.constant dense<0.000000e+00> : vector<8x128xf32>
    %49 = tpu.matmul %47, %48, %cst_21 {dimension_numbers = #tpu.dot_dimension_numbers<[1], [0], [0], [1], [0, 0, 1, 1], [], []>} : vector<8x128xbf16>, vector<128x128xbf16>, vector<8x128xf32> -> vector<8x128xf32>
    %c4 = arith.constant 4 : index
    %c0_22 = arith.constant 0 : index
    %50 = vector.load %arg6[%c4, %c0_22] : memref<16x128xf32, #tpu.memory_space<vmem>>, vector<1x128xf32>
    %51 = vector.broadcast %50 : vector<1x128xf32> to vector<8x128xf32>
    %52 = arith.addf %49, %51 : vector<8x128xf32>
    %53 = arith.addf %52, %11 : vector<8x128xf32>
    %54 = arith.truncf %53 : vector<8x128xf32> to vector<8x128xbf16>
    %c256 = arith.constant 256 : index
    %c0_23 = arith.constant 0 : index
    %55 = vector.load %arg3[%c256, %c0_23] : memref<1152x128xbf16, #tpu.memory_space<vmem>>, vector<128x128xbf16>
    %cst_24 = arith.constant dense<0.000000e+00> : vector<8x128xf32>
    %56 = tpu.matmul %54, %55, %cst_24 {dimension_numbers = #tpu.dot_dimension_numbers<[1], [0], [0], [1], [0, 0, 1, 1], [], []>} : vector<8x128xbf16>, vector<128x128xbf16>, vector<8x128xf32> -> vector<8x128xf32>
    %c5 = arith.constant 5 : index
    %c0_25 = arith.constant 0 : index
    %57 = vector.load %arg6[%c5, %c0_25] : memref<16x128xf32, #tpu.memory_space<vmem>>, vector<1x128xf32>
    %58 = vector.broadcast %57 : vector<1x128xf32> to vector<8x128xf32>
    %59 = arith.addf %56, %58 : vector<8x128xf32>
    %60 = arith.truncf %53 : vector<8x128xf32> to vector<8x128xbf16>
    %c384 = arith.constant 384 : index
    %c0_26 = arith.constant 0 : index
    %61 = vector.load %arg3[%c384, %c0_26] : memref<1152x128xbf16, #tpu.memory_space<vmem>>, vector<128x128xbf16>
    %cst_27 = arith.constant dense<0.000000e+00> : vector<8x128xf32>
    %62 = tpu.matmul %60, %61, %cst_27 {dimension_numbers = #tpu.dot_dimension_numbers<[1], [0], [0], [1], [0, 0, 1, 1], [], []>} : vector<8x128xbf16>, vector<128x128xbf16>, vector<8x128xf32> -> vector<8x128xf32>
    %c6 = arith.constant 6 : index
    %c0_28 = arith.constant 0 : index
    %63 = vector.load %arg6[%c6, %c0_28] : memref<16x128xf32, #tpu.memory_space<vmem>>, vector<1x128xf32>
    %64 = vector.broadcast %63 : vector<1x128xf32> to vector<8x128xf32>
    %65 = arith.addf %62, %64 : vector<8x128xf32>
    %cst_29 = arith.constant -1.500000e+01 : f32
    %cst_30 = arith.constant 1.000000e+01 : f32
    %66 = vector.broadcast %cst_29 : f32 to vector<8x128xf32>
    %67 = arith.maximumf %66, %65 : vector<8x128xf32>
    %68 = vector.broadcast %cst_30 : f32 to vector<8x128xf32>
    %69 = arith.minimumf %68, %67 : vector<8x128xf32>
    %c0_31 = arith.constant 0 : index
    %c0_32 = arith.constant 0 : index
    %70 = vector.load %arg2[%c0_31, %c0_32] : memref<8x128xf32, #tpu.memory_space<vmem>>, vector<8x128xf32>
    %cst_33 = arith.constant 5.000000e-01 : f32
    %71 = vector.broadcast %cst_33 : f32 to vector<8x128xf32>
    %72 = arith.mulf %71, %69 : vector<8x128xf32>
    %73 = math.exp %72 : vector<8x128xf32>
    %74 = arith.mulf %70, %73 : vector<8x128xf32>
    %75 = arith.addf %74, %59 : vector<8x128xf32>
    %76 = arith.mulf %75, %75 : vector<8x128xf32>
    %cst_34 = arith.constant 1.83787704 : f32
    %77 = vector.broadcast %cst_34 : f32 to vector<8x128xf32>
    %78 = arith.addf %77, %76 : vector<8x128xf32>
    %cst_35 = arith.constant dense<0.000000e+00> : vector<8xf32>
    %79 = vector.multi_reduction <add>, %78, %cst_35 [1] : vector<8x128xf32> to vector<8xf32>
    %80 = vector.shape_cast %79 : vector<8xf32> to vector<8x1xf32>
    %cst_36 = arith.constant -5.000000e-01 : f32
    %81 = vector.broadcast %cst_36 : f32 to vector<8x1xf32>
    %82 = arith.mulf %81, %80 : vector<8x1xf32>
    %cst_37 = arith.constant 1.83787704 : f32
    %83 = vector.broadcast %cst_37 : f32 to vector<8x128xf32>
    %84 = arith.addf %83, %69 : vector<8x128xf32>
    %85 = arith.mulf %70, %70 : vector<8x128xf32>
    %86 = arith.addf %84, %85 : vector<8x128xf32>
    %cst_38 = arith.constant dense<0.000000e+00> : vector<8xf32>
    %87 = vector.multi_reduction <add>, %86, %cst_38 [1] : vector<8x128xf32> to vector<8xf32>
    %88 = vector.shape_cast %87 : vector<8xf32> to vector<8x1xf32>
    %cst_39 = arith.constant -5.000000e-01 : f32
    %89 = vector.broadcast %cst_39 : f32 to vector<8x1xf32>
    %90 = arith.mulf %89, %88 : vector<8x1xf32>
    %91 = arith.truncf %75 : vector<8x128xf32> to vector<8x128xbf16>
    %c512 = arith.constant 512 : index
    %c0_40 = arith.constant 0 : index
    %92 = vector.load %arg3[%c512, %c0_40] : memref<1152x128xbf16, #tpu.memory_space<vmem>>, vector<128x128xbf16>
    %cst_41 = arith.constant dense<0.000000e+00> : vector<8x128xf32>
    %93 = tpu.matmul %91, %92, %cst_41 {dimension_numbers = #tpu.dot_dimension_numbers<[1], [0], [0], [1], [0, 0, 1, 1], [], []>} : vector<8x128xbf16>, vector<128x128xbf16>, vector<8x128xf32> -> vector<8x128xf32>
    %c7 = arith.constant 7 : index
    %c0_42 = arith.constant 0 : index
    %94 = vector.load %arg6[%c7, %c0_42] : memref<16x128xf32, #tpu.memory_space<vmem>>, vector<1x128xf32>
    %95 = vector.broadcast %94 : vector<1x128xf32> to vector<8x128xf32>
    %96 = arith.addf %93, %95 : vector<8x128xf32>
    %cst_43 = arith.constant dense<0.000000e+00> : vector<128xf32>
    %97 = vector.multi_reduction <add>, %96, %cst_43 [0] : vector<8x128xf32> to vector<128xf32>
    %98 = vector.shape_cast %97 : vector<128xf32> to vector<1x128xf32>
    %cst_44 = arith.constant 8.000000e+00 : f32
    %99 = vector.broadcast %cst_44 : f32 to vector<1x128xf32>
    %100 = arith.divf %98, %99 : vector<1x128xf32>
    %101 = vector.broadcast %100 : vector<1x128xf32> to vector<8x128xf32>
    %102 = arith.subf %96, %101 : vector<8x128xf32>
    %103 = arith.mulf %102, %102 : vector<8x128xf32>
    %cst_45 = arith.constant dense<0.000000e+00> : vector<128xf32>
    %104 = vector.multi_reduction <add>, %103, %cst_45 [0] : vector<8x128xf32> to vector<128xf32>
    %105 = vector.shape_cast %104 : vector<128xf32> to vector<1x128xf32>
    %cst_46 = arith.constant 8.000000e+00 : f32
    %106 = vector.broadcast %cst_46 : f32 to vector<1x128xf32>
    %107 = arith.divf %105, %106 : vector<1x128xf32>
    %108 = vector.broadcast %100 : vector<1x128xf32> to vector<8x128xf32>
    %109 = arith.subf %96, %108 : vector<8x128xf32>
    %cst_47 = arith.constant 9.99999974E-6 : f32
    %110 = vector.broadcast %cst_47 : f32 to vector<1x128xf32>
    %111 = arith.addf %107, %110 : vector<1x128xf32>
    %112 = math.rsqrt %111 : vector<1x128xf32>
    %113 = vector.broadcast %112 : vector<1x128xf32> to vector<8x128xf32>
    %114 = arith.mulf %109, %113 : vector<8x128xf32>
    %c8 = arith.constant 8 : index
    %c0_48 = arith.constant 0 : index
    %115 = vector.load %arg6[%c8, %c0_48] : memref<16x128xf32, #tpu.memory_space<vmem>>, vector<1x128xf32>
    %116 = vector.broadcast %115 : vector<1x128xf32> to vector<8x128xf32>
    %117 = arith.mulf %114, %116 : vector<8x128xf32>
    %c9 = arith.constant 9 : index
    %c0_49 = arith.constant 0 : index
    %118 = vector.load %arg6[%c9, %c0_49] : memref<16x128xf32, #tpu.memory_space<vmem>>, vector<1x128xf32>
    %119 = vector.broadcast %118 : vector<1x128xf32> to vector<8x128xf32>
    %120 = arith.addf %117, %119 : vector<8x128xf32>
    %cst_50 = arith.constant 0.000000e+00 : f32
    %121 = vector.broadcast %cst_50 : f32 to vector<8x128xf32>
    %122 = arith.cmpf ogt, %120, %121 : vector<8x128xf32>
    %cst_51 = arith.constant 0.00999999977 : f32
    %123 = vector.broadcast %cst_51 : f32 to vector<8x128xf32>
    %124 = arith.mulf %123, %120 : vector<8x128xf32>
    %125 = arith.select %122, %120, %124 : vector<8x128xi1>, vector<8x128xf32>
    %126 = arith.truncf %125 : vector<8x128xf32> to vector<8x128xbf16>
    %c640 = arith.constant 640 : index
    %c0_52 = arith.constant 0 : index
    %127 = vector.load %arg3[%c640, %c0_52] : memref<1152x128xbf16, #tpu.memory_space<vmem>>, vector<128x128xbf16>
    %cst_53 = arith.constant dense<0.000000e+00> : vector<8x128xf32>
    %128 = tpu.matmul %126, %127, %cst_53 {dimension_numbers = #tpu.dot_dimension_numbers<[1], [0], [0], [1], [0, 0, 1, 1], [], []>} : vector<8x128xbf16>, vector<128x128xbf16>, vector<8x128xf32> -> vector<8x128xf32>
    %c10 = arith.constant 10 : index
    %c0_54 = arith.constant 0 : index
    %129 = vector.load %arg6[%c10, %c0_54] : memref<16x128xf32, #tpu.memory_space<vmem>>, vector<1x128xf32>
    %130 = vector.broadcast %129 : vector<1x128xf32> to vector<8x128xf32>
    %131 = arith.addf %128, %130 : vector<8x128xf32>
    %132 = arith.addf %131, %75 : vector<8x128xf32>
    %133 = arith.truncf %132 : vector<8x128xf32> to vector<8x128xbf16>
    %c768 = arith.constant 768 : index
    %c0_55 = arith.constant 0 : index
    %134 = vector.load %arg3[%c768, %c0_55] : memref<1152x128xbf16, #tpu.memory_space<vmem>>, vector<128x128xbf16>
    %cst_56 = arith.constant dense<0.000000e+00> : vector<8x128xf32>
    %135 = tpu.matmul %133, %134, %cst_56 {dimension_numbers = #tpu.dot_dimension_numbers<[1], [0], [0], [1], [0, 0, 1, 1], [], []>} : vector<8x128xbf16>, vector<128x128xbf16>, vector<8x128xf32> -> vector<8x128xf32>
    %c11 = arith.constant 11 : index
    %c0_57 = arith.constant 0 : index
    %136 = vector.load %arg6[%c11, %c0_57] : memref<16x128xf32, #tpu.memory_space<vmem>>, vector<1x128xf32>
    %137 = vector.broadcast %136 : vector<1x128xf32> to vector<8x128xf32>
    %138 = arith.addf %135, %137 : vector<8x128xf32>
    %cst_58 = arith.constant dense<0.000000e+00> : vector<128xf32>
    %139 = vector.multi_reduction <add>, %138, %cst_58 [0] : vector<8x128xf32> to vector<128xf32>
    %140 = vector.shape_cast %139 : vector<128xf32> to vector<1x128xf32>
    %cst_59 = arith.constant 8.000000e+00 : f32
    %141 = vector.broadcast %cst_59 : f32 to vector<1x128xf32>
    %142 = arith.divf %140, %141 : vector<1x128xf32>
    %143 = vector.broadcast %142 : vector<1x128xf32> to vector<8x128xf32>
    %144 = arith.subf %138, %143 : vector<8x128xf32>
    %145 = arith.mulf %144, %144 : vector<8x128xf32>
    %cst_60 = arith.constant dense<0.000000e+00> : vector<128xf32>
    %146 = vector.multi_reduction <add>, %145, %cst_60 [0] : vector<8x128xf32> to vector<128xf32>
    %147 = vector.shape_cast %146 : vector<128xf32> to vector<1x128xf32>
    %cst_61 = arith.constant 8.000000e+00 : f32
    %148 = vector.broadcast %cst_61 : f32 to vector<1x128xf32>
    %149 = arith.divf %147, %148 : vector<1x128xf32>
    %150 = vector.broadcast %142 : vector<1x128xf32> to vector<8x128xf32>
    %151 = arith.subf %138, %150 : vector<8x128xf32>
    %cst_62 = arith.constant 9.99999974E-6 : f32
    %152 = vector.broadcast %cst_62 : f32 to vector<1x128xf32>
    %153 = arith.addf %149, %152 : vector<1x128xf32>
    %154 = math.rsqrt %153 : vector<1x128xf32>
    %155 = vector.broadcast %154 : vector<1x128xf32> to vector<8x128xf32>
    %156 = arith.mulf %151, %155 : vector<8x128xf32>
    %c12 = arith.constant 12 : index
    %c0_63 = arith.constant 0 : index
    %157 = vector.load %arg6[%c12, %c0_63] : memref<16x128xf32, #tpu.memory_space<vmem>>, vector<1x128xf32>
    %158 = vector.broadcast %157 : vector<1x128xf32> to vector<8x128xf32>
    %159 = arith.mulf %156, %158 : vector<8x128xf32>
    %c13 = arith.constant 13 : index
    %c0_64 = arith.constant 0 : index
    %160 = vector.load %arg6[%c13, %c0_64] : memref<16x128xf32, #tpu.memory_space<vmem>>, vector<1x128xf32>
    %161 = vector.broadcast %160 : vector<1x128xf32> to vector<8x128xf32>
    %162 = arith.addf %159, %161 : vector<8x128xf32>
    %cst_65 = arith.constant 0.000000e+00 : f32
    %163 = vector.broadcast %cst_65 : f32 to vector<8x128xf32>
    %164 = arith.cmpf ogt, %162, %163 : vector<8x128xf32>
    %cst_66 = arith.constant 0.00999999977 : f32
    %165 = vector.broadcast %cst_66 : f32 to vector<8x128xf32>
    %166 = arith.mulf %165, %162 : vector<8x128xf32>
    %167 = arith.select %164, %162, %166 : vector<8x128xi1>, vector<8x128xf32>
    %168 = arith.truncf %167 : vector<8x128xf32> to vector<8x128xbf16>
    %c896 = arith.constant 896 : index
    %c0_67 = arith.constant 0 : index
    %169 = vector.load %arg3[%c896, %c0_67] : memref<1152x128xbf16, #tpu.memory_space<vmem>>, vector<128x128xbf16>
    %cst_68 = arith.constant dense<0.000000e+00> : vector<8x128xf32>
    %170 = tpu.matmul %168, %169, %cst_68 {dimension_numbers = #tpu.dot_dimension_numbers<[1], [0], [0], [1], [0, 0, 1, 1], [], []>} : vector<8x128xbf16>, vector<128x128xbf16>, vector<8x128xf32> -> vector<8x128xf32>
    %c14 = arith.constant 14 : index
    %c0_69 = arith.constant 0 : index
    %171 = vector.load %arg6[%c14, %c0_69] : memref<16x128xf32, #tpu.memory_space<vmem>>, vector<1x128xf32>
    %172 = vector.broadcast %171 : vector<1x128xf32> to vector<8x128xf32>
    %173 = arith.addf %170, %172 : vector<8x128xf32>
    %174 = arith.addf %173, %132 : vector<8x128xf32>
    %175 = arith.truncf %174 : vector<8x128xf32> to vector<8x128xbf16>
    %c1024 = arith.constant 1024 : index
    %c0_70 = arith.constant 0 : index
    %176 = vector.load %arg3[%c1024, %c0_70] : memref<1152x128xbf16, #tpu.memory_space<vmem>>, vector<128x128xbf16>
    %cst_71 = arith.constant dense<0.000000e+00> : vector<8x128xf32>
    %177 = tpu.matmul %175, %176, %cst_71 {dimension_numbers = #tpu.dot_dimension_numbers<[1], [0], [0], [1], [0, 0, 1, 1], [], []>} : vector<8x128xbf16>, vector<128x128xbf16>, vector<8x128xf32> -> vector<8x128xf32>
    %c15 = arith.constant 15 : index
    %c0_72 = arith.constant 0 : index
    %178 = vector.load %arg6[%c15, %c0_72] : memref<16x128xf32, #tpu.memory_space<vmem>>, vector<1x128xf32>
    %179 = vector.broadcast %178 : vector<1x128xf32> to vector<8x128xf32>
    %180 = arith.addf %177, %179 : vector<8x128xf32>
    %181 = arith.truncf %180 : vector<8x128xf32> to vector<8x128xbf16>
    %c0_73 = arith.constant 0 : index
    %c0_74 = arith.constant 0 : index
    %182 = vector.load %arg5[%c0_73, %c0_74] : memref<128x768xbf16, #tpu.memory_space<vmem>>, vector<128x768xbf16>
    %cst_75 = arith.constant dense<0.000000e+00> : vector<8x768xf32>
    %183 = tpu.matmul %181, %182, %cst_75 {dimension_numbers = #tpu.dot_dimension_numbers<[1], [0], [0], [1], [0, 0, 1, 1], [], []>} : vector<8x128xbf16>, vector<128x768xbf16>, vector<8x768xf32> -> vector<8x768xf32>
    %c0_76 = arith.constant 0 : index
    %c0_77 = arith.constant 0 : index
    %184 = vector.load %arg7[%c0_76, %c0_77] : memref<1x768xf32, #tpu.memory_space<vmem>>, vector<1x768xf32>
    %185 = vector.broadcast %184 : vector<1x768xf32> to vector<8x768xf32>
    %186 = arith.addf %183, %185 : vector<8x768xf32>
    %cst_78 = arith.constant 5.000000e-01 : f32
    %187 = vector.broadcast %cst_78 : f32 to vector<8x768xf32>
    %188 = arith.mulf %187, %186 : vector<8x768xf32>
    %189 = math.tanh %188 : vector<8x768xf32>
    %cst_79 = arith.constant 1.000000e+00 : f32
    %190 = vector.broadcast %cst_79 : f32 to vector<8x768xf32>
    %191 = arith.addf %189, %190 : vector<8x768xf32>
    %cst_80 = arith.constant 5.000000e-01 : f32
    %192 = vector.broadcast %cst_80 : f32 to vector<8x768xf32>
    %193 = arith.mulf %192, %191 : vector<8x768xf32>
    %c0_81 = arith.constant 0 : index
    %c0_82 = arith.constant 0 : index
    %194 = vector.load %arg8[%c0_81, %c0_82] : memref<8x768xf32, #tpu.memory_space<vmem>>, vector<8x768xf32>
    tpu.vector_store %arg8[%c0_81, %c0_82], %193 {strides = array<i32>} : memref<8x768xf32, #tpu.memory_space<vmem>>, vector<8x768xf32>,
    %c0_83 = arith.constant 0 : index
    %c0_84 = arith.constant 0 : index
    %195 = vector.load %arg1[%c0_83, %c0_84] : memref<8x768xf32, #tpu.memory_space<vmem>>, vector<8x768xf32>
    %196 = arith.addf %0, %195 : vector<8x768xf32>
    %cst_85 = arith.constant 9.99999974E-6 : f32
    %cst_86 = arith.constant 0.999989986 : f32
    %197 = vector.broadcast %cst_85 : f32 to vector<8x768xf32>
    %198 = arith.maximumf %197, %196 : vector<8x768xf32>
    %199 = vector.broadcast %cst_86 : f32 to vector<8x768xf32>
    %200 = arith.minimumf %199, %198 : vector<8x768xf32>
    %cst_87 = arith.constant 9.99999974E-6 : f32
    %cst_88 = arith.constant 0.999989986 : f32
    %201 = vector.broadcast %cst_87 : f32 to vector<8x768xf32>
    %202 = arith.maximumf %201, %193 : vector<8x768xf32>
    %203 = vector.broadcast %cst_88 : f32 to vector<8x768xf32>
    %204 = arith.minimumf %203, %202 : vector<8x768xf32>
    %cst_89 = arith.constant 1.000000e+02 : f32
    %205 = vector.broadcast %cst_89 : f32 to vector<8x768xf32>
    %206 = arith.mulf %204, %205 : vector<8x768xf32>
    %cst_90 = arith.constant 1.000000e+02 : f32
    %207 = vector.broadcast %cst_90 : f32 to vector<8x768xf32>
    %208 = arith.subf %207, %206 : vector<8x768xf32>
    %cst_91 = arith.constant 1.000000e+00 : f32
    %209 = vector.broadcast %cst_91 : f32 to vector<8x768xf32>
    %210 = arith.subf %206, %209 : vector<8x768xf32>
    %211 = math.log %200 : vector<8x768xf32>
    %212 = arith.mulf %210, %211 : vector<8x768xf32>
    %cst_92 = arith.constant 1.000000e+00 : f32
    %213 = vector.broadcast %cst_92 : f32 to vector<8x768xf32>
    %214 = arith.subf %208, %213 : vector<8x768xf32>
    %cst_93 = arith.constant 1.000000e+00 : f32
    %215 = vector.broadcast %cst_93 : f32 to vector<8x768xf32>
    %216 = arith.subf %215, %200 : vector<8x768xf32>
    %217 = math.log %216 : vector<8x768xf32>
    %218 = arith.mulf %214, %217 : vector<8x768xf32>
    %219 = arith.addf %212, %218 : vector<8x768xf32>
    %cst_94 = arith.constant 1.000000e+00 : f32
    %220 = vector.broadcast %cst_94 : f32 to vector<8x768xf32>
    %221 = arith.subf %206, %220 : vector<8x768xf32>
    %cst_95 = arith.constant 1.000000e+00 : f32
    %222 = vector.broadcast %cst_95 : f32 to vector<8x768xf32>
    %cst_96 = arith.constant 1.000000e+00 : f32
    %223 = vector.broadcast %cst_96 : f32 to vector<8x768xf32>
    %224 = arith.addf %221, %223 : vector<8x768xf32>
    %cst_97 = arith.constant 676.520386 : f32
    %225 = vector.broadcast %cst_97 : f32 to vector<8x768xf32>
    %226 = arith.divf %225, %224 : vector<8x768xf32>
    %227 = arith.addf %222, %226 : vector<8x768xf32>
    %cst_98 = arith.constant 2.000000e+00 : f32
    %228 = vector.broadcast %cst_98 : f32 to vector<8x768xf32>
    %229 = arith.addf %221, %228 : vector<8x768xf32>
    %cst_99 = arith.constant -1259.13916 : f32
    %230 = vector.broadcast %cst_99 : f32 to vector<8x768xf32>
    %231 = arith.divf %230, %229 : vector<8x768xf32>
    %232 = arith.addf %227, %231 : vector<8x768xf32>
    %cst_100 = arith.constant 3.000000e+00 : f32
    %233 = vector.broadcast %cst_100 : f32 to vector<8x768xf32>
    %234 = arith.addf %221, %233 : vector<8x768xf32>
    %cst_101 = arith.constant 771.323425 : f32
    %235 = vector.broadcast %cst_101 : f32 to vector<8x768xf32>
    %236 = arith.divf %235, %234 : vector<8x768xf32>
    %237 = arith.addf %232, %236 : vector<8x768xf32>
    %cst_102 = arith.constant 4.000000e+00 : f32
    %238 = vector.broadcast %cst_102 : f32 to vector<8x768xf32>
    %239 = arith.addf %221, %238 : vector<8x768xf32>
    %cst_103 = arith.constant -176.615036 : f32
    %240 = vector.broadcast %cst_103 : f32 to vector<8x768xf32>
    %241 = arith.divf %240, %239 : vector<8x768xf32>
    %242 = arith.addf %237, %241 : vector<8x768xf32>
    %cst_104 = arith.constant 5.000000e+00 : f32
    %243 = vector.broadcast %cst_104 : f32 to vector<8x768xf32>
    %244 = arith.addf %221, %243 : vector<8x768xf32>
    %cst_105 = arith.constant 12.5073433 : f32
    %245 = vector.broadcast %cst_105 : f32 to vector<8x768xf32>
    %246 = arith.divf %245, %244 : vector<8x768xf32>
    %247 = arith.addf %242, %246 : vector<8x768xf32>
    %cst_106 = arith.constant 6.000000e+00 : f32
    %248 = vector.broadcast %cst_106 : f32 to vector<8x768xf32>
    %249 = arith.addf %221, %248 : vector<8x768xf32>
    %cst_107 = arith.constant -0.138571098 : f32
    %250 = vector.broadcast %cst_107 : f32 to vector<8x768xf32>
    %251 = arith.divf %250, %249 : vector<8x768xf32>
    %252 = arith.addf %247, %251 : vector<8x768xf32>
    %cst_108 = arith.constant 7.000000e+00 : f32
    %253 = vector.broadcast %cst_108 : f32 to vector<8x768xf32>
    %254 = arith.addf %221, %253 : vector<8x768xf32>
    %cst_109 = arith.constant 9.98436917E-6 : f32
    %255 = vector.broadcast %cst_109 : f32 to vector<8x768xf32>
    %256 = arith.divf %255, %254 : vector<8x768xf32>
    %257 = arith.addf %252, %256 : vector<8x768xf32>
    %cst_110 = arith.constant 8.000000e+00 : f32
    %258 = vector.broadcast %cst_110 : f32 to vector<8x768xf32>
    %259 = arith.addf %221, %258 : vector<8x768xf32>
    %cst_111 = arith.constant 1.50563267E-7 : f32
    %260 = vector.broadcast %cst_111 : f32 to vector<8x768xf32>
    %261 = arith.divf %260, %259 : vector<8x768xf32>
    %262 = arith.addf %257, %261 : vector<8x768xf32>
    %cst_112 = arith.constant 7.500000e+00 : f32
    %263 = vector.broadcast %cst_112 : f32 to vector<8x768xf32>
    %264 = arith.addf %221, %263 : vector<8x768xf32>
    %cst_113 = arith.constant 5.000000e-01 : f32
    %265 = vector.broadcast %cst_113 : f32 to vector<8x768xf32>
    %266 = arith.addf %221, %265 : vector<8x768xf32>
    %267 = math.log %264 : vector<8x768xf32>
    %268 = arith.mulf %266, %267 : vector<8x768xf32>
    %cst_114 = arith.constant 0.918938517 : f32
    %269 = vector.broadcast %cst_114 : f32 to vector<8x768xf32>
    %270 = arith.addf %269, %268 : vector<8x768xf32>
    %271 = arith.subf %270, %264 : vector<8x768xf32>
    %272 = math.log %262 : vector<8x768xf32>
    %273 = arith.addf %271, %272 : vector<8x768xf32>
    %274 = arith.subf %219, %273 : vector<8x768xf32>
    %cst_115 = arith.constant 1.000000e+00 : f32
    %275 = vector.broadcast %cst_115 : f32 to vector<8x768xf32>
    %276 = arith.subf %208, %275 : vector<8x768xf32>
    %cst_116 = arith.constant 1.000000e+00 : f32
    %277 = vector.broadcast %cst_116 : f32 to vector<8x768xf32>
    %cst_117 = arith.constant 1.000000e+00 : f32
    %278 = vector.broadcast %cst_117 : f32 to vector<8x768xf32>
    %279 = arith.addf %276, %278 : vector<8x768xf32>
    %cst_118 = arith.constant 676.520386 : f32
    %280 = vector.broadcast %cst_118 : f32 to vector<8x768xf32>
    %281 = arith.divf %280, %279 : vector<8x768xf32>
    %282 = arith.addf %277, %281 : vector<8x768xf32>
    %cst_119 = arith.constant 2.000000e+00 : f32
    %283 = vector.broadcast %cst_119 : f32 to vector<8x768xf32>
    %284 = arith.addf %276, %283 : vector<8x768xf32>
    %cst_120 = arith.constant -1259.13916 : f32
    %285 = vector.broadcast %cst_120 : f32 to vector<8x768xf32>
    %286 = arith.divf %285, %284 : vector<8x768xf32>
    %287 = arith.addf %282, %286 : vector<8x768xf32>
    %cst_121 = arith.constant 3.000000e+00 : f32
    %288 = vector.broadcast %cst_121 : f32 to vector<8x768xf32>
    %289 = arith.addf %276, %288 : vector<8x768xf32>
    %cst_122 = arith.constant 771.323425 : f32
    %290 = vector.broadcast %cst_122 : f32 to vector<8x768xf32>
    %291 = arith.divf %290, %289 : vector<8x768xf32>
    %292 = arith.addf %287, %291 : vector<8x768xf32>
    %cst_123 = arith.constant 4.000000e+00 : f32
    %293 = vector.broadcast %cst_123 : f32 to vector<8x768xf32>
    %294 = arith.addf %276, %293 : vector<8x768xf32>
    %cst_124 = arith.constant -176.615036 : f32
    %295 = vector.broadcast %cst_124 : f32 to vector<8x768xf32>
    %296 = arith.divf %295, %294 : vector<8x768xf32>
    %297 = arith.addf %292, %296 : vector<8x768xf32>
    %cst_125 = arith.constant 5.000000e+00 : f32
    %298 = vector.broadcast %cst_125 : f32 to vector<8x768xf32>
    %299 = arith.addf %276, %298 : vector<8x768xf32>
    %cst_126 = arith.constant 12.5073433 : f32
    %300 = vector.broadcast %cst_126 : f32 to vector<8x768xf32>
    %301 = arith.divf %300, %299 : vector<8x768xf32>
    %302 = arith.addf %297, %301 : vector<8x768xf32>
    %cst_127 = arith.constant 6.000000e+00 : f32
    %303 = vector.broadcast %cst_127 : f32 to vector<8x768xf32>
    %304 = arith.addf %276, %303 : vector<8x768xf32>
    %cst_128 = arith.constant -0.138571098 : f32
    %305 = vector.broadcast %cst_128 : f32 to vector<8x768xf32>
    %306 = arith.divf %305, %304 : vector<8x768xf32>
    %307 = arith.addf %302, %306 : vector<8x768xf32>
    %cst_129 = arith.constant 7.000000e+00 : f32
    %308 = vector.broadcast %cst_129 : f32 to vector<8x768xf32>
    %309 = arith.addf %276, %308 : vector<8x768xf32>
    %cst_130 = arith.constant 9.98436917E-6 : f32
    %310 = vector.broadcast %cst_130 : f32 to vector<8x768xf32>
    %311 = arith.divf %310, %309 : vector<8x768xf32>
    %312 = arith.addf %307, %311 : vector<8x768xf32>
    %cst_131 = arith.constant 8.000000e+00 : f32
    %313 = vector.broadcast %cst_131 : f32 to vector<8x768xf32>
    %314 = arith.addf %276, %313 : vector<8x768xf32>
    %cst_132 = arith.constant 1.50563267E-7 : f32
    %315 = vector.broadcast %cst_132 : f32 to vector<8x768xf32>
    %316 = arith.divf %315, %314 : vector<8x768xf32>
    %317 = arith.addf %312, %316 : vector<8x768xf32>
    %cst_133 = arith.constant 7.500000e+00 : f32
    %318 = vector.broadcast %cst_133 : f32 to vector<8x768xf32>
    %319 = arith.addf %276, %318 : vector<8x768xf32>
    %cst_134 = arith.constant 5.000000e-01 : f32
    %320 = vector.broadcast %cst_134 : f32 to vector<8x768xf32>
    %321 = arith.addf %276, %320 : vector<8x768xf32>
    %322 = math.log %319 : vector<8x768xf32>
    %323 = arith.mulf %321, %322 : vector<8x768xf32>
    %cst_135 = arith.constant 0.918938517 : f32
    %324 = vector.broadcast %cst_135 : f32 to vector<8x768xf32>
    %325 = arith.addf %324, %323 : vector<8x768xf32>
    %326 = arith.subf %325, %319 : vector<8x768xf32>
    %327 = math.log %317 : vector<8x768xf32>
    %328 = arith.addf %326, %327 : vector<8x768xf32>
    %329 = arith.subf %274, %328 : vector<8x768xf32>
    %cst_136 = arith.constant 359.134216 : f32
    %330 = vector.broadcast %cst_136 : f32 to vector<8x768xf32>
    %331 = arith.addf %329, %330 : vector<8x768xf32>
    %cst_137 = arith.constant dense<0.000000e+00> : vector<8xf32>
    %332 = vector.multi_reduction <add>, %331, %cst_137 [1] : vector<8x768xf32> to vector<8xf32>
    %333 = vector.shape_cast %332 : vector<8xf32> to vector<8x1xf32>
    %c0_138 = arith.constant 0 : index
    %c0_139 = arith.constant 0 : index
    %334 = vector.load %arg9[%c0_138, %c0_139] : memref<8x640xf32, #tpu.memory_space<vmem>>, vector<8x128xf32>
    tpu.vector_store %arg9[%c0_138, %c0_139], %75 {strides = array<i32>} : memref<8x640xf32, #tpu.memory_space<vmem>>, vector<8x128xf32>,
    %c0_140 = arith.constant 0 : index
    %c128_141 = arith.constant 128 : index
    %335 = vector.load %arg9[%c0_140, %c128_141] : memref<8x640xf32, #tpu.memory_space<vmem>>, vector<8x128xf32>
    tpu.vector_store %arg9[%c0_140, %c128_141], %69 {strides = array<i32>} : memref<8x640xf32, #tpu.memory_space<vmem>>, vector<8x128xf32>,
    %336 = vector.shape_cast %333 : vector<8x1xf32> to vector<8x1xf32>
    %337 = vector.broadcast %336 : vector<8x1xf32> to vector<8x128xf32>
    %c0_142 = arith.constant 0 : index
    %c256_143 = arith.constant 256 : index
    %338 = vector.load %arg9[%c0_142, %c256_143] : memref<8x640xf32, #tpu.memory_space<vmem>>, vector<8x128xf32>
    tpu.vector_store %arg9[%c0_142, %c256_143], %337 {strides = array<i32>} : memref<8x640xf32, #tpu.memory_space<vmem>>, vector<8x128xf32>,
    %339 = vector.shape_cast %82 : vector<8x1xf32> to vector<8x1xf32>
    %340 = vector.broadcast %339 : vector<8x1xf32> to vector<8x128xf32>
    %c0_144 = arith.constant 0 : index
    %c384_145 = arith.constant 384 : index
    %341 = vector.load %arg9[%c0_144, %c384_145] : memref<8x640xf32, #tpu.memory_space<vmem>>, vector<8x128xf32>
    tpu.vector_store %arg9[%c0_144, %c384_145], %340 {strides = array<i32>} : memref<8x640xf32, #tpu.memory_space<vmem>>, vector<8x128xf32>,
    %342 = vector.shape_cast %90 : vector<8x1xf32> to vector<8x1xf32>
    %343 = vector.broadcast %342 : vector<8x1xf32> to vector<8x128xf32>
    %c0_146 = arith.constant 0 : index
    %c512_147 = arith.constant 512 : index
    %344 = vector.load %arg9[%c0_146, %c512_147] : memref<8x640xf32, #tpu.memory_space<vmem>>, vector<8x128xf32>
    tpu.vector_store %arg9[%c0_146, %c512_147], %343 {strides = array<i32>} : memref<8x640xf32, #tpu.memory_space<vmem>>, vector<8x128xf32>,
    return
  }
}

</mosaic_0001>

<bundles_post_ra>
// kernel: vae_forward.1
= control target key start
LH: loop header
LB: loop body
LE: loop exit
PB: predicated region body
PF: predicated region fallthrough
CT: control target
= control target key end

     0   :  { %s8887_s4 = inlined_call_operand.vmem [shape: bf16[768,128], index: 4, kind: input, shape index: {}]   ;;  %s8888_s6 = inlined_call_operand.vmem [shape: f32[16,128], index: 6, kind: input, shape index: {}]   ;;  %s8889_s0 = inlined_call_operand.vmem [shape: f32[8,768], index: 0, kind: input, shape index: {}]   ;;  %s8890_s3 = inlined_call_operand.vmem [shape: bf16[1152,128], index: 3, kind: input, shape index: {}]   ;;  %s8891_s9 = inlined_call_operand.vmem [shape: f32[8,640], index: 9, kind: output, shape index: {1}]   ;;  %s8892_s2 = inlined_call_operand.vmem [shape: f32[8,128], index: 2, kind: input, shape index: {}]   ;;  %s8893_s5 = inlined_call_operand.vmem [shape: bf16[128,768], index: 5, kind: input, shape index: {}]   ;;  %s8894_s1 = inlined_call_operand.vmem [shape: f32[8,768], index: 1, kind: input, shape index: {}]   ;;  %s8895_s7 = inlined_call_operand.vmem [shape: f32[1,768], index: 7, kind: input, shape index: {}]   ;;  %s8896_s8 = inlined_call_operand.vmem [shape: f32[8,768], index: 8, kind: output, shape index: {0}]  }
   0x1   :  { %v4369_v0 = vld [vmem:[%s8887_s4 + $0x38] sm:$0xff]  ;;  %v4368_v2 = vld [vmem:[%s8887_s4 + $0x30] sm:$0xff]  ;;  %v4367_v8 = vld [vmem:[%s8887_s4 + $0x28] sm:$0xff] }
   0x2   :  { %v4377_v1 = vld [vmem:[%s8887_s4 + $0x78] sm:$0xff]  ;;  %429 = vmatpush.bf16.msra.mxu0 %v4369_v0  ;;  %v4376_v3 = vld [vmem:[%s8887_s4 + $0x70] sm:$0xff]  ;;  %v4375_v9 = vld [vmem:[%s8887_s4 + $0x68] sm:$0xff] }
   0x3   :  { %442 = vmatpush.bf16.msra.mxu1 %v4377_v1  ;;  %v4385_v4 = vld [vmem:[%s8887_s4 + $0xb8] sm:$0xff]  ;;  %v4384_v6 = vld [vmem:[%s8887_s4 + $0xb0] sm:$0xff]  ;;  %v4383_v10 = vld [vmem:[%s8887_s4 + $0xa8] sm:$0xff] }
   0x4   :  { %v4393_v5 = vld [vmem:[%s8887_s4 + $0xf8] sm:$0xff]  ;;  %455 = vmatpush.bf16.msra.mxu2 %v4385_v4  ;;  %v4392_v7 = vld [vmem:[%s8887_s4 + $0xf0] sm:$0xff]  ;;  %v4391_v11 = vld [vmem:[%s8887_s4 + $0xe8] sm:$0xff] }
   0x5   :  { %468 = vmatpush.bf16.msra.mxu3 %v4393_v5  ;;  %v4366_v12 = vld [vmem:[%s8887_s4 + $0x20] sm:$0xff]  ;;  %v4365_v16 = vld [vmem:[%s8887_s4 + $0x18] sm:$0xff]  ;;  %v4364_v20 = vld [vmem:[%s8887_s4 + $0x10] sm:$0xff] }
   0x6   :  { %430 = vmatpush.bf16.msra.mxu0 %v4368_v2  ;;  %v4374_v13 = vld [vmem:[%s8887_s4 + $0x60] sm:$0xff]  ;;  %v4373_v17 = vld [vmem:[%s8887_s4 + $0x58] sm:$0xff]  ;;  %v4372_v21 = vld [vmem:[%s8887_s4 + $0x50] sm:$0xff] }
   0x7   :  { %443 = vmatpush.bf16.msra.mxu1 %v4376_v3  ;;  %v4382_v14 = vld [vmem:[%s8887_s4 + $0xa0] sm:$0xff]  ;;  %v4381_v18 = vld [vmem:[%s8887_s4 + $0x98] sm:$0xff]  ;;  %v4380_v22 = vld [vmem:[%s8887_s4 + $0x90] sm:$0xff] }
   0x8   :  { %456 = vmatpush.bf16.msra.mxu2 %v4384_v6  ;;  %v4390_v15 = vld [vmem:[%s8887_s4 + $0xe0] sm:$0xff]  ;;  %v4389_v19 = vld [vmem:[%s8887_s4 + $0xd8] sm:$0xff]  ;;  %v4363_v23 = vld [vmem:[%s8887_s4 + $0x8] sm:$0xff] }
   0x9   :  { %469 = vmatpush.bf16.msra.mxu3 %v4392_v7  ;;  %v4388_v24 = vld [vmem:[%s8887_s4 + $0xd0] sm:$0xff]  ;;  %v4371_v25 = vld [vmem:[%s8887_s4 + $0x48] sm:$0xff]  ;;  %v4362_v27 = vld [vmem:[%s8887_s4] sm:$0xff] }
   0xa   :  { %431 = vmatpush.bf16.msra.mxu0 %v4367_v8  ;;  %v4379_v26 = vld [vmem:[%s8887_s4 + $0x88] sm:$0xff]  ;;  %v4370_v28 = vld [vmem:[%s8887_s4 + $0x40] sm:$0xff]  ;;  %v4401_v32 = vld [vmem:[%s8887_s4 + $0x138] sm:$0xff] }
   0xb   :  { %444 = vmatpush.bf16.msra.mxu1 %v4375_v9  ;;  %v31_v29 = vld [vmem:[%s8889_s0] sm:$0xff]  ;;  %v4387_v30 = vld [vmem:[%s8887_s4 + $0xc8] sm:$0xff]  ;;  %v4409_v33 = vld [vmem:[%s8887_s4 + $0x178] sm:$0xff] }
   0xc   :  { %457 = vmatpush.bf16.msra.mxu2 %v4383_v10  ;;  %v32_v31 = vld [vmem:[%s8889_s0 + $0x8] sm:$0xff]  ;;  %v4378_v34 = vld [vmem:[%s8887_s4 + $0x80] sm:$0xff]  ;;  %v37_v35 = vpack.c.bf16 %v31_v29, %v31_v29  ;;  %v33_v37 = vld [vmem:[%s8889_s0 + $0x10] sm:$0xff] }
   0xd   :  { %470 = vmatpush.bf16.msra.mxu3 %v4391_v11  ;;  %v38_v36 = vpack.c.bf16 %v32_v31, %v32_v31  ;;  %v4386_v38 = vld [vmem:[%s8887_s4 + $0xc0] sm:$0xff]  ;;  %v34_v39 = vld [vmem:[%s8889_s0 + $0x18] sm:$0xff]  ;;  %v4400_v40 = vld [vmem:[%s8887_s4 + $0x130] sm:$0xff]  ;;  %v39_v42 = vpack.c.bf16 %v33_v37, %v33_v37 }
   0xe   :  { %432 = vmatpush.bf16.msra.mxu0 %v4366_v12  ;;  %v4408_v41 = vld [vmem:[%s8887_s4 + $0x170] sm:$0xff]  ;;  %v40_v43 = vpack.c.bf16 %v34_v39, %v34_v39  ;;  %v4399_v44 = vld [vmem:[%s8887_s4 + $0x128] sm:$0xff]  ;;  %v4398_v46 = vld [vmem:[%s8887_s4 + $0x120] sm:$0xff] }
   0xf   :  { %445 = vmatpush.bf16.msra.mxu1 %v4374_v13  ;;  %v4407_v45 = vld [vmem:[%s8887_s4 + $0x168] sm:$0xff]  ;;  %v4406_v47 = vld [vmem:[%s8887_s4 + $0x160] sm:$0xff]  ;;  %v4397_v48 = vld [vmem:[%s8887_s4 + $0x118] sm:$0xff] }
  0x10   :  { %458 = vmatpush.bf16.msra.mxu2 %v4382_v14  ;;  %v4405_v49 = vld [vmem:[%s8887_s4 + $0x158] sm:$0xff]  ;;  %v4396_v50 = vld [vmem:[%s8887_s4 + $0x110] sm:$0xff]  ;;  %v4395_v52 = vld [vmem:[%s8887_s4 + $0x108] sm:$0xff] }
  0x11   :  { %471 = vmatpush.bf16.msra.mxu3 %v4390_v15  ;;  %v4404_v51 = vld [vmem:[%s8887_s4 + $0x150] sm:$0xff]  ;;  %v4403_v53 = vld [vmem:[%s8887_s4 + $0x148] sm:$0xff]  ;;  %v4394_v54 = vld [vmem:[%s8887_s4 + $0x100] sm:$0xff] }
  0x12   :  { %433 = vmatpush.bf16.msra.mxu0 %v4365_v16  ;;  %v4402_v55 = vld [vmem:[%s8887_s4 + $0x140] sm:$0xff]  ;;  %v36_v57 = vld [vmem:[%s8889_s0 + $0x28] sm:$0xff]  ;;  %v4417_v60 = vld [vmem:[%s8890_s3 + $0x38] sm:$0xff] }
  0x13   :  { %446 = vmatpush.bf16.msra.mxu1 %v4373_v17  ;;  %v35_v56 = vld [vmem:[%s8889_s0 + $0x20] sm:$0xff]  ;;  %v42_v59 = vpack.c.bf16 %v36_v57, %v36_v57  ;;  %v4416_v61 = vld [vmem:[%s8890_s3 + $0x30] sm:$0xff]  ;;  %v4415_v62 = vld [vmem:[%s8890_s3 + $0x28] sm:$0xff] }
  0x14   :  { %459 = vmatpush.bf16.msra.mxu2 %v4381_v18  ;;  %v41_v58 = vpack.c.bf16 %v35_v56, %v35_v56  ;;  %v4414_v63 = vld [vmem:[%s8890_s3 + $0x20] sm:$0xff]  ;;  %v4413_v0 = vld [vmem:[%s8890_s3 + $0x18] sm:$0xff]  ;;  %v4412_v1 = vld [vmem:[%s8890_s3 + $0x10] sm:$0xff] }
  0x15   :  { %472 = vmatpush.bf16.msra.mxu3 %v4389_v19  ;;  %v4411_v2 = vld [vmem:[%s8890_s3 + $0x8] sm:$0xff]  ;;  %v4410_v5 = vld [vmem:[%s8890_s3] sm:$0xff]  ;;  %v4424_v37 = vld [vmem:[%s8890_s3 + $0x70] sm:$0xff] }
  0x16   :  { %434 = vmatpush.bf16.msra.mxu0 %v4364_v20  ;;  %v4531_v10 = vld [vmem:[%s8888_s6] ss:$0 sm:$0xff]  ;;  %v4532_v29 = vld [vmem:[%s8888_s6 + $0x1] ss:$0 sm:$0xff] }
  0x17   :  { %447 = vmatpush.bf16.msra.mxu1 %v4372_v21  ;;  %v4418_v57 = vld [vmem:[%s8890_s3 + $0x40] sm:$0xff] }
  0x18   :  { %460 = vmatpush.bf16.msra.mxu2 %v4380_v22 }
  0x19   :  { %473 = vmatpush.bf16.msra.mxu3 %v4388_v24 }
  0x1a   :  { %435 = vmatpush.bf16.msra.mxu0 %v4363_v23 }
  0x1b   :  { %448 = vmatpush.bf16.msra.mxu1 %v4371_v25 }
  0x1c   :  { %461 = vmatpush.bf16.msra.mxu2 %v4379_v26  ;;  %v4839_v26 = vmov 8.0  }
  0x1d   :  { %474 = vmatpush.bf16.msra.mxu3 %v4387_v30  ;;  %4547 = vrcp.f32 %v4839_v26  ;;  %v4427_v26 = vld [vmem:[%s8890_s3 + $0x88] sm:$0xff] }
  0x1e   :  { %436 = vmatpush.bf16.msra.mxu0 %v4362_v27 }
  0x1f   :  { %449 = vmatpush.bf16.msra.mxu1 %v4370_v28 }
  0x20   :  { %462 = vmatpush.bf16.msra.mxu2 %v4378_v34 }
  0x21   :  { %437 = vmatmul.bf16.vlgmr.msra.gmra.mxu0 %v37_v35  ;;  %475 = vmatpush.bf16.msra.mxu3 %v4386_v38 }
  0x22   :  { %481 = vmatpush.bf16.msrb.mxu0 %v4401_v32  ;;  %450 = vmatmul.bf16.vlgmr.msra.gmra.mxu1 %v38_v36 }
  0x23   :  { %494 = vmatpush.bf16.msrb.mxu1 %v4409_v33  ;;  %463 = vmatmul.bf16.vlgmr.msra.gmra.mxu2 %v39_v42  ;;  %v4548_v27 = vpop.eup %4547  ;;  %v4425_v33 = vld [vmem:[%s8890_s3 + $0x78] sm:$0xff]  ;;  %v4423_v42 = vld [vmem:[%s8890_s3 + $0x68] sm:$0xff] }
  0x24   :  { %476 = vmatmul.bf16.vlgmr.msra.gmra.mxu3 %v40_v43  ;;  %577 = vmatpush.bf16.msrb.mxu2 %v4417_v60  ;;  %v597_v28 = vmul.f32 8.0, %v4548_v27  ;;  %vm601_vm1 = vweird.f32 %v4548_v27 }
  0x25   :  { %701 = vmatpush.bf16.msrb.mxu3 %v4425_v33 }
  0x26   :  { %482 = vmatpush.bf16.msrb.mxu0 %v4400_v40  ;;  %v598_v31 = vsub.f32 1.0, %v597_v28  ;;  %v4426_v28 = vld [vmem:[%s8890_s3 + $0x80] sm:$0xff] }
  0x27   :  { %495 = vmatpush.bf16.msrb.mxu1 %v4408_v41 }
  0x28   :  { %578 = vmatpush.bf16.msrb.mxu2 %v4416_v61  ;;  %v599_v35 = vmul.f32 %v4548_v27, %v598_v31  ;;  %v4433_v61 = vld [vmem:[%s8890_s3 + $0xb8] sm:$0xff]  ;;  %v4448_v31 = vld [vmem:[%s8890_s3 + $0x130] sm:$0xff] }
  0x29   :  { %702 = vmatpush.bf16.msrb.mxu3 %v4424_v37 }
  0x2a   :  { %483 = vmatpush.bf16.msrb.mxu0 %v4399_v44  ;;  %v600_v39 = vadd.f32 %v4548_v27, %v599_v35 }
  0x2b   :  { %496 = vmatpush.bf16.msrb.mxu1 %v4407_v45 }
  0x2c   :  { %579 = vmatpush.bf16.msrb.mxu2 %v4415_v62  ;;  %v5095_v44 = vsel %vm601_vm1, %v4548_v27, %v600_v39  ;;  %v4441_v62 = vld [vmem:[%s8890_s3 + $0xf8] sm:$0xff]  ;;  %v4435_v27 = vld [vmem:[%s8890_s3 + $0xc8] sm:$0xff]  ;;  %v4446_v39 = vld [vmem:[%s8890_s3 + $0x120] sm:$0xff] }
  0x2d   :  { %703 = vmatpush.bf16.msrb.mxu3 %v4423_v42  ;;  %v4442_v42 = vld [vmem:[%s8890_s3 + $0x100] sm:$0xff] }
  0x2e   :  { %484 = vmatpush.bf16.msrb.mxu0 %v4398_v46  ;;  %v4422_v46 = vld [vmem:[%s8890_s3 + $0x60] sm:$0xff] }
  0x2f   :  { %497 = vmatpush.bf16.msrb.mxu1 %v4406_v47 }
  0x30   :  { %580 = vmatpush.bf16.msrb.mxu2 %v4414_v63 }
  0x31   :  { %704 = vmatpush.bf16.msrb.mxu3 %v4422_v46 }
  0x32   :  { %485 = vmatpush.bf16.msrb.mxu0 %v4397_v48 }
  0x33   :  { %498 = vmatpush.bf16.msrb.mxu1 %v4405_v49  ;;  %v4421_v49 = vld [vmem:[%s8890_s3 + $0x58] sm:$0xff] }
  0x34   :  { %581 = vmatpush.bf16.msrb.mxu2 %v4413_v0  ;;  %v4432_v0 = vld [vmem:[%s8890_s3 + $0xb0] sm:$0xff] }
  0x35   :  { %705 = vmatpush.bf16.msrb.mxu3 %v4421_v49 }
  0x36   :  { %486 = vmatpush.bf16.msrb.mxu0 %v4396_v50 }
  0x37   :  { %499 = vmatpush.bf16.msrb.mxu1 %v4404_v51 }
  0x38   :  { %582 = vmatpush.bf16.msrb.mxu2 %v4412_v1  ;;  %v4440_v1 = vld [vmem:[%s8890_s3 + $0xf0] sm:$0xff] }
  0x3a   :  { %487 = vmatpush.bf16.msrb.mxu0 %v4395_v52  ;;  %v4420_v52 = vld [vmem:[%s8890_s3 + $0x50] sm:$0xff] }
  0x3b   :  { %500 = vmatpush.bf16.msrb.mxu1 %v4403_v53  ;;  %706 = vmatpush.bf16.msrb.mxu3 %v4420_v52 }
  0x3c   :  { %583 = vmatpush.bf16.msrb.mxu2 %v4411_v2  ;;  %v4431_v2 = vld [vmem:[%s8890_s3 + $0xa8] sm:$0xff] }
  0x3e   :  { %488 = vmatpush.bf16.msrb.mxu0 %v4394_v54 }
  0x3f   :  { %501 = vmatpush.bf16.msrb.mxu1 %v4402_v55  ;;  %v4419_v55 = vld [vmem:[%s8890_s3 + $0x48] sm:$0xff] }
  0x40   :  { %584 = vmatpush.bf16.msrb.mxu2 %v4410_v5  ;;  %707 = vmatpush.bf16.msrb.mxu3 %v4419_v55 }
  0x41   :  { %489 = vmatmul.bf16.vlgmr.msrb.gmra.mxu0 %v41_v58 }
  0x42   :  { %502 = vmatmul.bf16.vlgmr.msrb.gmra.mxu1 %v42_v59  ;;  %782 = vmatpush.bf16.msra.mxu0 %v4433_v61 }
  0x43   :  { %861 = vmatpush.bf16.msra.mxu1 %v4441_v62 }
  0x44   :  { %708 = vmatpush.bf16.msrb.mxu3 %v4418_v57 }
  0x46   :  { %783 = vmatpush.bf16.msra.mxu0 %v4432_v0 }
  0x47   :  { %862 = vmatpush.bf16.msra.mxu1 %v4440_v1 }
  0x4a   :  { %784 = vmatpush.bf16.msra.mxu0 %v4431_v2 }
  0x9e   :  { %v438_v3 = vpop.f32.mrf.mxu0 }
  0x9f   :  { %v451_v4 = vpop.f32.mrf.mxu1  ;;  %v439_v11 = vadd.f32 %v4531_v10, %v438_v3  ;;  %v4439_v3 = vld [vmem:[%s8890_s3 + $0xe8] sm:$0xff]  ;;  %v4429_v10 = vld [vmem:[%s8890_s3 + $0x98] sm:$0xff] }
  0xa0   :  { %863 = vmatpush.bf16.msra.mxu1 %v4439_v3 }
  0xa1   :  { %v452_v14 = vadd.f32 %v451_v4, %v439_v11  ;;  %v4437_v11 = vld [vmem:[%s8890_s3 + $0xd8] sm:$0xff] }
  0xa6   :  { %v440_v6 = vpop.f32.mrf.mxu0  ;;  %v464_v8 = vpop.f32.mrf.mxu2 }
  0xa7   :  { %v453_v7 = vpop.f32.mrf.mxu1  ;;  %v477_v9 = vpop.f32.mrf.mxu3  ;;  %v465_v15 = vadd.f32 %v464_v8, %v452_v14  ;;  %v4430_v6 = vld [vmem:[%s8890_s3 + $0xa0] sm:$0xff]  ;;  %v4428_v14 = vld [vmem:[%s8890_s3 + $0x90] sm:$0xff] }
  0xa8   :  { %v4438_v7 = vld [vmem:[%s8890_s3 + $0xe0] sm:$0xff]  ;;  %785 = vmatpush.bf16.msra.mxu0 %v4430_v6 }
  0xa9   :  { %v478_v16 = vadd.f32 %v477_v9, %v465_v15  ;;  %864 = vmatpush.bf16.msra.mxu1 %v4438_v7  ;;  %v4436_v15 = vld [vmem:[%s8890_s3 + $0xd0] sm:$0xff]  ;;  %v4538_v6 = vld [vmem:[%s8888_s6 + $0x7] ss:$0 sm:$0xff] }
  0xac   :  { %786 = vmatpush.bf16.msra.mxu0 %v4429_v10 }
  0xad   :  { %865 = vmatpush.bf16.msra.mxu1 %v4437_v11 }
  0xae   :  { %v466_v12 = vpop.f32.mrf.mxu2 }
  0xaf   :  { %v479_v13 = vpop.f32.mrf.mxu3 }
  0xb0   :  { %787 = vmatpush.bf16.msra.mxu0 %v4428_v14 }
  0xb1   :  { %866 = vmatpush.bf16.msra.mxu1 %v4436_v15 }
  0xb4   :  { %788 = vmatpush.bf16.msra.mxu0 %v4427_v26  ;;  %v4452_v26 = vld [vmem:[%s8890_s3 + $0x150] sm:$0xff] }
  0xb5   :  { %867 = vmatpush.bf16.msra.mxu1 %v4435_v27 }
  0xb8   :  { %789 = vmatpush.bf16.msra.mxu0 %v4426_v28 }
  0xbe   :  { %v490_v17 = vpop.f32.mrf.mxu0 }
  0xbf   :  { %v503_v18 = vpop.f32.mrf.mxu1  ;;  %v491_v19 = vadd.f32 %v490_v17, %v478_v16  ;;  %v4533_v16 = vld [vmem:[%s8888_s6 + $0x2] ss:$0 sm:$0xff] }
  0xc1   :  { %v504_v20 = vadd.f32 %v503_v18, %v491_v19  ;;  %v4534_v19 = vld [vmem:[%s8888_s6 + $0x3] ss:$0 sm:$0xff] }
  0xc3   :  { %vm507_vm0 = vcmp.gt.f32.partialorder %v504_v20, 0.0  ;;  %v508_v21 = vmul.f32 0.01, %v504_v20 }
  0xc5   :  { %v5079_v22 = vsel %vm507_vm0, %v504_v20, %v508_v21 }
  0xc6   :  { %v492_v23 = vpop.f32.mrf.mxu0  ;;  %v510_v25 = vpack.c.bf16 %v5079_v22, %v5079_v22 }
  0xc7   :  { %v505_v24 = vpop.f32.mrf.mxu1 }
  0xc8   :  { %585 = vmatmul.bf16.vlgmr.msrb.gmra.mxu2 %v510_v25 }
 0x14b   :  { %v586_v30 = vpop.f32.mrf.mxu2 }
 0x14c   :  { %v587_v32 = vadd.f32 %v4532_v29, %v586_v30  ;;  %v4434_v29 = vld [vmem:[%s8890_s3 + $0xc0] sm:$0xff]  ;;  %v4449_v30 = vld [vmem:[%s8890_s3 + $0x138] sm:$0xff] }
 0x14d   :  { %868 = vmatpush.bf16.msra.mxu1 %v4434_v29  ;;  %960 = vmatpush.bf16.msra.mxu2 %v4449_v30  ;;  %v4451_v29 = vld [vmem:[%s8890_s3 + $0x148] sm:$0xff] }
 0x14e   :  { %v590_v34 = vrot.slane %v587_v32, 4 }
 0x150   :  { %v591_v36 = vadd.f32 %v590_v34, %v587_v32 }
 0x151   :  { %961 = vmatpush.bf16.msra.mxu2 %v4448_v31  ;;  %v4450_v31 = vld [vmem:[%s8890_s3 + $0x140] sm:$0xff] }
 0x152   :  { %v592_v38 = vrot.slane %v591_v36, 2 }
 0x153   :  { %v588_v40 = vpop.f32.mrf.mxu2 }
 0x154   :  { %v593_v41 = vadd.f32 %v592_v38, %v591_v36  ;;  %v4447_v38 = vld [vmem:[%s8890_s3 + $0x128] sm:$0xff]  ;;  %v4445_v40 = vld [vmem:[%s8890_s3 + $0x118] sm:$0xff] }
 0x155   :  { %962 = vmatpush.bf16.msra.mxu2 %v4447_v38  ;;  %v4463_v38 = vld [vmem:[%s8890_s3 + $0x1a8] sm:$0xff] }
 0x156   :  { %v594_v43 = vrot.slane %v593_v41, 1 }
 0x158   :  { %v595_v45 = vadd.f32 %v594_v43, %v593_v41  ;;  %v4443_v41 = vld [vmem:[%s8890_s3 + $0x108] sm:$0xff]  ;;  %v4537_v43 = vld [vmem:[%s8888_s6 + $0x6] ss:$0 sm:$0xff] }
 0x159   :  { %963 = vmatpush.bf16.msra.mxu2 %v4446_v39 }
 0x15a   :  { %v603_v47 = vmul.f32 %v5095_v44, %v595_v45 }
 0x15c   :  { %v604_v48 = vsub.f32 %v587_v32, %v603_v47  ;;  %v4535_v32 = vld [vmem:[%s8888_s6 + $0x4] ss:$0 sm:$0xff] }
 0x15d   :  { %964 = vmatpush.bf16.msra.mxu2 %v4445_v40 }
 0x15e   :  { %v605_v50 = vmul.f32 %v604_v48, %v604_v48 }
 0x160   :  { %v606_v51 = vrot.slane %v605_v50, 4 }
 0x162   :  { %v607_v53 = vadd.f32 %v606_v51, %v605_v50 }
 0x164   :  { %v608_v54 = vrot.slane %v607_v53, 2 }
 0x166   :  { %v609_v56 = vadd.f32 %v608_v54, %v607_v53  ;;  %v4536_v54 = vld [vmem:[%s8888_s6 + $0x5] ss:$0 sm:$0xff] }
 0x168   :  { %v610_v58 = vrot.slane %v609_v56, 1 }
 0x16a   :  { %v611_v59 = vadd.f32 %v610_v58, %v609_v56  ;;  %v876_v56 = vld [vmem:[%s8892_s2] sm:$0xff] }
 0x16b   :  { %v888_v0 = vmul.f32 %v876_v56, %v876_v56 }
 0x16c   :  { %v612_v60 = vmul.f32 %v611_v59, %v5095_v44 }
 0x16e   :  { %v613_v63 = vadd.f32 1e-05, %v612_v60 }
 0x170   :  { %4549 = vrsqrt.f32 %v613_v63  ;;  %vm620_vm3 = vweird.f32 %v613_v63 }
 0x176   :  { %v4550_v4 = vpop.eup %4549 }
 0x177   :  { %v615_v5 = vmul.f32 %v4550_v4, %v613_v63  ;;  %vm621_vm2 = vweird.f32 %v4550_v4 }
 0x178   :  { %vm622_vm4 = vmor %vm620_vm3, %vm621_vm2 }
 0x179   :  { %v616_v8 = vmul.f32 %v4550_v4, %v615_v5 }
 0x17b   :  { %v617_v9 = vmul.f32 0.5, %v616_v8 }
 0x17d   :  { %v618_v12 = vsub.f32 1.5, %v617_v9  ;;  %v4457_v9 = vld [vmem:[%s8890_s3 + $0x178] sm:$0xff] }
 0x17e   :  { %1077 = vmatpush.bf16.msra.mxu3 %v4457_v9 }
 0x17f   :  { %v619_v13 = vmul.f32 %v4550_v4, %v618_v12  ;;  %v4456_v12 = vld [vmem:[%s8890_s3 + $0x170] sm:$0xff] }
 0x181   :  { %v623_v17 = vsel %vm622_vm4, %v4550_v4, %v619_v13 }
 0x182   :  { %v624_v18 = vmul.f32 %v623_v17, %v604_v48  ;;  %1078 = vmatpush.bf16.msra.mxu3 %v4456_v12 }
 0x184   :  { %v627_v20 = vmul.f32 %v4533_v16, %v624_v18  ;;  %v4455_v16 = vld [vmem:[%s8890_s3 + $0x168] sm:$0xff] }
 0x186   :  { %v630_v21 = vadd.f32 %v4534_v19, %v627_v20  ;;  %1079 = vmatpush.bf16.msra.mxu3 %v4455_v16  ;;  %v4454_v19 = vld [vmem:[%s8890_s3 + $0x160] sm:$0xff] }
 0x188   :  { %vm631_vm5 = vcmp.gt.f32.partialorder %v630_v21, 0.0  ;;  %v632_v23 = vmul.f32 0.01, %v630_v21 }
 0x18a   :  { %v633_v24 = vsel %vm631_vm5, %v630_v21, %v632_v23  ;;  %1080 = vmatpush.bf16.msra.mxu3 %v4454_v19  ;;  %v4453_v23 = vld [vmem:[%s8890_s3 + $0x158] sm:$0xff] }
 0x18b   :  { %v634_v25 = vpack.c.bf16 %v633_v24, %v633_v24 }
 0x18d   :  { %709 = vmatmul.bf16.vlgmr.msrb.gmra.mxu3 %v634_v25 }
 0x18e   :  { %1081 = vmatpush.bf16.msra.mxu3 %v4453_v23 }
 0x192   :  { %1082 = vmatpush.bf16.msra.mxu3 %v4452_v26  ;;  %v4466_v26 = vld [vmem:[%s8890_s3 + $0x1c0] sm:$0xff] }
 0x196   :  { %1083 = vmatpush.bf16.msra.mxu3 %v4451_v29 }
 0x19a   :  { %1084 = vmatpush.bf16.msra.mxu3 %v4450_v31 }
 0x210   :  { %v710_v33 = vpop.f32.mrf.mxu3 }
 0x211   :  { %v711_v34 = vadd.f32 %v4535_v32, %v710_v33 }
 0x213   :  { %v714_v35 = vadd.f32 %v711_v34, %v5079_v22  ;;  %v4444_v22 = vld [vmem:[%s8890_s3 + $0x110] sm:$0xff] }
 0x214   :  { %965 = vmatpush.bf16.msra.mxu2 %v4444_v22  ;;  %v4462_v22 = vld [vmem:[%s8890_s3 + $0x1a0] sm:$0xff] }
 0x215   :  { %v715_v36 = vpack.c.bf16 %v714_v35, %v714_v35  ;;  %v4465_v35 = vld [vmem:[%s8890_s3 + $0x1b8] sm:$0xff] }
 0x216   :  { %1158 = vmatpush.bf16.msrb.mxu0 %v4465_v35 }
 0x217   :  { %790 = vmatmul.bf16.vlgmr.msra.gmra.mxu0 %v715_v36  ;;  %869 = vmatmul.bf16.vlgmr.msra.gmra.mxu1 %v715_v36 }
 0x218   :  { %v712_v37 = vpop.f32.mrf.mxu3  ;;  %966 = vmatpush.bf16.msra.mxu2 %v4443_v41 }
 0x219   :  { %v4464_v37 = vld [vmem:[%s8890_s3 + $0x1b0] sm:$0xff] }
 0x21a   :  { %1159 = vmatpush.bf16.msrb.mxu0 %v4464_v37 }
 0x21c   :  { %967 = vmatpush.bf16.msra.mxu2 %v4442_v42 }
 0x21e   :  { %1160 = vmatpush.bf16.msrb.mxu0 %v4463_v38  ;;  %v4477_v38 = vld [vmem:[%s8890_s3 + $0x218] sm:$0xff] }
 0x222   :  { %1161 = vmatpush.bf16.msrb.mxu0 %v4462_v22  ;;  %v4476_v22 = vld [vmem:[%s8890_s3 + $0x210] sm:$0xff] }
 0x294   :  { %v791_v45 = vpop.f32.mrf.mxu0  ;;  %v870_v46 = vpop.f32.mrf.mxu1 }
 0x295   :  { %v871_v47 = vadd.f32 %v4537_v43, %v870_v46  ;;  %v792_v57 = vadd.f32 %v4536_v54, %v791_v45  ;;  %v4461_v43 = vld [vmem:[%s8890_s3 + $0x198] sm:$0xff] }
 0x296   :  { %1162 = vmatpush.bf16.msrb.mxu0 %v4461_v43 }
 0x297   :  { %v874_v48 = vmax.f32 %v871_v47, -15.0  ;;  %v4460_v47 = vld [vmem:[%s8890_s3 + $0x190] sm:$0xff] }
 0x299   :  { %v875_v49 = vmin.f32 %v874_v48, 10.0  ;;  %v4539_v48 = vld [vmem:[%s8888_s6 + $0x8] ss:$0 sm:$0xff] }
 0x29a   :  { %1163 = vmatpush.bf16.msrb.mxu0 %v4460_v47 }
 0x29b   :  { %v877_v50 = vmul.f32 0.5, %v875_v49  ;;  %3666 = vst [vmem:[%s8891_s9 + $0x8] sm:$0xff] %v875_v49  ;;  %v887_v63 = vadd.f32 1.837877, %v875_v49 }
 0x29c   :  { %v793_v51 = vpop.f32.mrf.mxu0  ;;  %v872_v52 = vpop.f32.mrf.mxu1 }
 0x29d   :  { %v878_v53 = vmul.f32 1.442695, %v877_v50  ;;  %v889_v1 = vadd.f32 %v888_v0, %v887_v63  ;;  %v4540_v51 = vld [vmem:[%s8888_s6 + $0x9] ss:$0 sm:$0xff] }
 0x29f   :  { %4551 = vpow2.f32 %v878_v53 }
 0x2a5   :  { %v4552_v55 = vpop.eup %4551 }
 0x2a6   :  { %v880_v58 = vmul.f32 %v4552_v55, %v876_v56 }
 0x2a8   :  { %v5208_v59 = vadd.f32 %v880_v58, %v792_v57  ;;  %v4459_v57 = vld [vmem:[%s8890_s3 + $0x188] sm:$0xff]  ;;  %v4458_v58 = vld [vmem:[%s8890_s3 + $0x180] sm:$0xff] }
 0x2a9   :  { %1164 = vmatpush.bf16.msrb.mxu0 %v4459_v57  ;;  %v4330_v57 = vld [vmem:[%s8893_s5 + $0x168] sm:$0xf0] }
 0x2aa   :  { %v893_v60 = vpack.c.bf16 %v5208_v59, %v5208_v59  ;;  %3665 = vst [vmem:[%s8891_s9] sm:$0xff] %v5208_v59  ;;  %v882_v61 = vmul.f32 %v5208_v59, %v5208_v59 }
 0x2ac   :  { %968 = vmatmul.bf16.vlgmr.msra.gmra.mxu2 %v893_v60  ;;  %v883_v62 = vadd.f32 1.837877, %v882_v61  ;;  %v4541_v60 = vld [vmem:[%s8888_s6 + $0xa] ss:$0 sm:$0xff] }
 0x2ad   :  { %1165 = vmatpush.bf16.msrb.mxu0 %v4458_v58  ;;  %v4304_v58 = vld [vmem:[%s8893_s5 + $0x120] sm:$0xf] }
 0x2ae   :  { %884 = vadd.xlane.f32.xlu0 %v883_v62 }
 0x2b6   :  { %890 = vadd.xlane.f32.xlu0 %v889_v1 }
 0x321   :  { %v885_v2 = vpop.xlane.xlu0 %884 }
 0x322   :  { %v886_v3 = vmul.f32 -0.5, %v885_v2  ;;  %v4542_v2 = vld [vmem:[%s8888_s6 + $0xb] ss:$0 sm:$0xff] }
 0x324   :  { %3668 = vst [vmem:[%s8891_s9 + $0x18] sm:$0xff] %v886_v3 }
 0x329   :  { %v891_v4 = vpop.xlane.xlu0 %890 }
 0x32a   :  { %v892_v5 = vmul.f32 -0.5, %v891_v4 }
 0x32c   :  { %3669 = vst [vmem:[%s8891_s9 + $0x20] sm:$0xff] %v892_v5  ;;  %v4473_v5 = vld [vmem:[%s8890_s3 + $0x1f8] sm:$0xff] }
 0x32d   :  { %1275 = vmatpush.bf16.msrb.mxu1 %v4473_v5  ;;  %v4512_v5 = vld [vmem:[%s8893_s5 + $0xf4] sm:$0xf] }
 0x32f   :  { %v969_v7 = vpop.f32.mrf.mxu2 }
 0x330   :  { %v970_v8 = vadd.f32 %v4538_v6, %v969_v7 }
 0x332   :  { %v973_v10 = vrot.slane %v970_v8, 4 }
 0x334   :  { %v974_v11 = vadd.f32 %v973_v10, %v970_v8 }
 0x336   :  { %v975_v13 = vrot.slane %v974_v11, 2 }
 0x337   :  { %v971_v14 = vpop.f32.mrf.mxu2 }
 0x338   :  { %v976_v15 = vadd.f32 %v975_v13, %v974_v11  ;;  %v4471_v11 = vld [vmem:[%s8890_s3 + $0x1e8] sm:$0xff]  ;;  %v4470_v14 = vld [vmem:[%s8890_s3 + $0x1e0] sm:$0xff] }
 0x33a   :  { %v977_v17 = vrot.slane %v976_v15, 1 }
 0x33c   :  { %v978_v18 = vadd.f32 %v977_v17, %v976_v15  ;;  %v4469_v17 = vld [vmem:[%s8890_s3 + $0x1d8] sm:$0xff] }
 0x33e   :  { %v979_v20 = vmul.f32 %v978_v18, %v5095_v44 }
 0x340   :  { %v980_v21 = vsub.f32 %v970_v8, %v979_v20  ;;  %v4468_v20 = vld [vmem:[%s8890_s3 + $0x1d0] sm:$0xff] }
 0x342   :  { %v981_v24 = vmul.f32 %v980_v21, %v980_v21 }
 0x344   :  { %v982_v25 = vrot.slane %v981_v24, 4 }
 0x346   :  { %v983_v27 = vadd.f32 %v982_v25, %v981_v24  ;;  %v4467_v24 = vld [vmem:[%s8890_s3 + $0x1c8] sm:$0xff] }
 0x348   :  { %v984_v28 = vrot.slane %v983_v27, 2 }
 0x34a   :  { %v985_v30 = vadd.f32 %v984_v28, %v983_v27 }
 0x34c   :  { %v986_v32 = vrot.slane %v985_v30, 1 }
 0x34e   :  { %v987_v33 = vadd.f32 %v986_v32, %v985_v30  ;;  %v4481_v30 = vld [vmem:[%s8890_s3 + $0x238] sm:$0xff]  ;;  %v4480_v32 = vld [vmem:[%s8890_s3 + $0x230] sm:$0xff] }
 0x34f   :  { %1356 = vmatpush.bf16.msrb.mxu2 %v4481_v30 }
 0x350   :  { %v988_v34 = vmul.f32 %v987_v33, %v5095_v44  ;;  %v4479_v33 = vld [vmem:[%s8890_s3 + $0x228] sm:$0xff] }
 0x352   :  { %v989_v36 = vadd.f32 1e-05, %v988_v34 }
 0x353   :  { %1357 = vmatpush.bf16.msrb.mxu2 %v4480_v32  ;;  %v4503_v32 = vld [vmem:[%s8893_s5 + $0xa4] sm:$0xf0] }
 0x354   :  { %4553 = vrsqrt.f32 %v989_v36  ;;  %vm996_vm7 = vweird.f32 %v989_v36 }
 0x357   :  { %1358 = vmatpush.bf16.msrb.mxu2 %v4479_v33  ;;  %v4500_v33 = vld [vmem:[%s8893_s5 + $0x94] sm:$0xf] }
 0x35a   :  { %v4554_v39 = vpop.eup %4553 }
 0x35b   :  { %v991_v40 = vmul.f32 %v4554_v39, %v989_v36  ;;  %vm997_vm6 = vweird.f32 %v4554_v39 }
 0x35c   :  { %vm998_vm8 = vmor %vm996_vm7, %vm997_vm6 }
 0x35d   :  { %v992_v41 = vmul.f32 %v4554_v39, %v991_v40 }
 0x35f   :  { %v993_v42 = vmul.f32 0.5, %v992_v41  ;;  %v4543_v41 = vld [vmem:[%s8888_s6 + $0xc] ss:$0 sm:$0xff] }
 0x361   :  { %v994_v45 = vsub.f32 1.5, %v993_v42 }
 0x363   :  { %v995_v46 = vmul.f32 %v4554_v39, %v994_v45  ;;  %v4544_v45 = vld [vmem:[%s8888_s6 + $0xd] ss:$0 sm:$0xff] }
 0x365   :  { %v999_v49 = vsel %vm998_vm8, %v4554_v39, %v995_v46 }
 0x366   :  { %v1000_v50 = vmul.f32 %v999_v49, %v980_v21 }
 0x368   :  { %v1003_v52 = vmul.f32 %v4539_v48, %v1000_v50 }
 0x36a   :  { %v1006_v53 = vadd.f32 %v4540_v51, %v1003_v52  ;;  %v4475_v51 = vld [vmem:[%s8890_s3 + $0x208] sm:$0xff]  ;;  %v4474_v52 = vld [vmem:[%s8890_s3 + $0x200] sm:$0xff] }
 0x36c   :  { %vm1007_vm9 = vcmp.gt.f32.partialorder %v1006_v53, 0.0  ;;  %v1008_v54 = vmul.f32 0.01, %v1006_v53 }
 0x36e   :  { %v1009_v55 = vsel %vm1007_vm9, %v1006_v53, %v1008_v54  ;;  %v4328_v53 = vld [vmem:[%s8893_s5 + $0x150] sm:$0xf]  ;;  %v4527_v54 = vld [vmem:[%s8893_s5 + $0x164] sm:$0xf0] }
 0x36f   :  { %v1010_v56 = vpack.c.bf16 %v1009_v55, %v1009_v55  ;;  %v4524_v55 = vld [vmem:[%s8893_s5 + $0x154] sm:$0xf] }
 0x371   :  { %1085 = vmatmul.bf16.vlgmr.msra.gmra.mxu3 %v1010_v56  ;;  %v4329_v56 = vor.u32 %v4527_v54, %v4328_v53 }
 0x373   :  { %1672 = vmatpush.bf16.msrb.mxu3 %v4329_v56  ;;  %v4491_v56 = vld [vmem:[%s8893_s5 + $0x44] sm:$0xf0] }
 0x3f4   :  { %v1086_v61 = vpop.f32.mrf.mxu3 }
 0x3f5   :  { %v1087_v62 = vadd.f32 %v4541_v60, %v1086_v61  ;;  %v4521_v60 = vld [vmem:[%s8893_s5 + $0x134] sm:$0xf0]  ;;  %v4333_v61 = vor.u32 %v4524_v55, %v4330_v57  ;;  %v4184_v55 = vld [vmem:[%s8893_s5 + $0x30] sm:$0xf]  ;;  %v4488_v57 = vld [vmem:[%s8893_s5 + $0x34] sm:$0xf] }
 0x3f7   :  { %v5287_v63 = vadd.f32 %v1087_v62, %v5208_v59  ;;  %v4472_v59 = vld [vmem:[%s8890_s3 + $0x1f0] sm:$0xff]  ;;  %v4518_v62 = vld [vmem:[%s8893_s5 + $0x124] sm:$0xf]  ;;  %1685 = vmatpush.bf16.msra.mxu0 %v4333_v61 }
 0x3f8   :  { %1276 = vmatpush.bf16.msrb.mxu1 %v4472_v59  ;;  %v4528_v59 = vld [vmem:[%s8893_s5 + $0x16c] sm:$0xf0] }
 0x3f9   :  { %v1091_v0 = vpack.c.bf16 %v5287_v63, %v5287_v63 }
 0x3fb   :  { %1166 = vmatmul.bf16.vlgmr.msrb.gmra.mxu0 %v1091_v0  ;;  %v4306_v0 = vld [vmem:[%s8893_s5 + $0x138] sm:$0xf0] }
 0x3fc   :  { %v1088_v1 = vpop.f32.mrf.mxu3  ;;  %1277 = vmatpush.bf16.msrb.mxu1 %v4471_v11 }
 0x3fd   :  { %v4305_v1 = vor.u32 %v4521_v60, %v4304_v58  ;;  %v4186_v60 = vld [vmem:[%s8893_s5 + $0x48] sm:$0xf0] }
 0x3ff   :  { %1673 = vmatpush.bf16.msrb.mxu3 %v4305_v1  ;;  %v4495_v1 = vld [vmem:[%s8893_s5 + $0x6c] sm:$0xf] }
 0x400   :  { %1278 = vmatpush.bf16.msrb.mxu1 %v4470_v14 }
 0x404   :  { %1279 = vmatpush.bf16.msrb.mxu1 %v4469_v17  ;;  %v4522_v17 = vld [vmem:[%s8893_s5 + $0x13c] sm:$0xf0] }
 0x408   :  { %1280 = vmatpush.bf16.msrb.mxu1 %v4468_v20  ;;  %v4258_v20 = vld [vmem:[%s8893_s5 + $0xd8] sm:$0xf0] }
 0x40c   :  { %1281 = vmatpush.bf16.msrb.mxu1 %v4467_v24 }
 0x410   :  { %1282 = vmatpush.bf16.msrb.mxu1 %v4466_v26 }
 0x478   :  { %v1167_v3 = vpop.f32.mrf.mxu0 }
 0x479   :  { %v1168_v4 = vadd.f32 %v4542_v2, %v1167_v3  ;;  %v4309_v2 = vor.u32 %v4518_v62, %v4306_v0  ;;  %v4280_v3 = vld [vmem:[%s8893_s5 + $0xf0] sm:$0xf]  ;;  %v4216_v62 = vld [vmem:[%s8893_s5 + $0x68] sm:$0xf]  ;;  %v4498_v0 = vld [vmem:[%s8893_s5 + $0x7c] sm:$0xf0] }
 0x47b   :  { %v1171_v6 = vrot.slane %v1168_v4, 4  ;;  %1686 = vmatpush.bf16.msra.mxu0 %v4309_v2  ;;  %v4218_v2 = vld [vmem:[%s8893_s5 + $0x80] sm:$0xf0] }
 0x47d   :  { %v1172_v7 = vadd.f32 %v1171_v6, %v1168_v4  ;;  %v4282_v6 = vld [vmem:[%s8893_s5 + $0x108] sm:$0xf0] }
 0x47f   :  { %v1173_v8 = vrot.slane %v1172_v7, 2 }
 0x480   :  { %v1169_v9 = vpop.f32.mrf.mxu0 }
 0x481   :  { %v1174_v10 = vadd.f32 %v1173_v8, %v1172_v7  ;;  %v4336_v7 = vld [vmem:[%s8893_s5 + $0x158] sm:$0xf]  ;;  %v4525_v9 = vld [vmem:[%s8893_s5 + $0x15c] sm:$0xf] }
 0x482   :  { %v4337_v8 = vor.u32 %v4528_v59, %v4336_v7  ;;  %v4485_v7 = vld [vmem:[%s8893_s5 + $0x14] sm:$0xf0]  ;;  %v4482_v59 = vld [vmem:[%s8893_s5 + $0x4] sm:$0xf] }
 0x483   :  { %v1175_v12 = vrot.slane %v1174_v10, 1 }
 0x484   :  { %1698 = vmatpush.bf16.msra.mxu1 %v4337_v8  ;;  %v4162_v8 = vld [vmem:[%s8893_s5 + $0x18] sm:$0xf0] }
 0x485   :  { %v1176_v13 = vadd.f32 %v1175_v12, %v1174_v10  ;;  %v4338_v10 = vld [vmem:[%s8893_s5 + $0x170] sm:$0xf0]  ;;  %v4256_v12 = vld [vmem:[%s8893_s5 + $0xc0] sm:$0xf] }
 0x486   :  { %v4341_v14 = vor.u32 %v4525_v9, %v4338_v10  ;;  %v4217_v9 = vor.u32 %v4498_v0, %v4216_v62  ;;  %v4226_v0 = vld [vmem:[%s8893_s5 + $0x88] sm:$0xf0] }
 0x487   :  { %v1177_v15 = vmul.f32 %v1176_v13, %v5095_v44  ;;  %v4509_v13 = vld [vmem:[%s8893_s5 + $0xd4] sm:$0xf0] }
 0x488   :  { %v4257_v26 = vor.u32 %v4509_v13, %v4256_v12  ;;  %v4529_v12 = vld [vmem:[%s8893_s5 + $0x174] sm:$0xf0]  ;;  %v4526_v13 = vld [vmem:[%s8893_s5 + $0x164] sm:$0xf] }
 0x489   :  { %v1178_v16 = vsub.f32 %v1168_v4, %v1177_v15  ;;  %v4515_v4 = vld [vmem:[%s8893_s5 + $0x104] sm:$0xf0]  ;;  %v4285_v15 = vor.u32 %v4512_v5, %v4282_v6  ;;  %v4189_v6 = vor.u32 %v4488_v57, %v4186_v60 }
 0x48a   :  { %v4281_v11 = vor.u32 %v4515_v4, %v4280_v3  ;;  %v4185_v3 = vor.u32 %v4491_v56, %v4184_v55  ;;  %v4160_v4 = vld [vmem:[%s8893_s5] sm:$0xf]  ;;  %v4250_v56 = vld [vmem:[%s8893_s5 + $0xb8] sm:$0xf0]  ;;  %v4499_v60 = vld [vmem:[%s8893_s5 + $0x84] sm:$0xf0] }
 0x48b   :  { %v1179_v18 = vmul.f32 %v1178_v16, %v1178_v16  ;;  %1687 = vmatpush.bf16.msra.mxu0 %v4285_v15  ;;  %v4346_v15 = vld [vmem:[%s8893_s5 + $0x178] sm:$0xf0] }
 0x48c   :  { %1674 = vmatpush.bf16.msrb.mxu3 %v4281_v11  ;;  %v4344_v11 = vld [vmem:[%s8893_s5 + $0x160] sm:$0xf] }
 0x48d   :  { %v1180_v19 = vrot.slane %v1179_v18, 4 }
 0x48f   :  { %v1181_v21 = vadd.f32 %v1180_v19, %v1179_v18  ;;  %v4519_v18 = vld [vmem:[%s8893_s5 + $0x12c] sm:$0xf]  ;;  %v4506_v19 = vld [vmem:[%s8893_s5 + $0xc4] sm:$0xf] }
 0x490   :  { %v4261_v30 = vor.u32 %v4506_v19, %v4258_v20  ;;  %1675 = vmatpush.bf16.msrb.mxu3 %v4257_v26  ;;  %v4161_v19 = vor.u32 %v4485_v7, %v4160_v4  ;;  %v4489_v20 = vld [vmem:[%s8893_s5 + $0x3c] sm:$0xf]  ;;  %v4349_v26 = vor.u32 %v4526_v13, %v4346_v15  ;;  %v4490_v4 = vld [vmem:[%s8893_s5 + $0x44] sm:$0xf]  ;;  %v4546_v13 = vld [vmem:[%s8888_s6 + $0xf] ss:$0 sm:$0xff] }
 0x491   :  { %v1182_v23 = vrot.slane %v1181_v21, 2 }
 0x492   :  { %1688 = vmatpush.bf16.msra.mxu0 %v4261_v30  ;;  %v4322_v30 = vld [vmem:[%s8893_s5 + $0x148] sm:$0xf0] }
 0x493   :  { %v1183_v25 = vadd.f32 %v1182_v23, %v1181_v21  ;;  %v4314_v23 = vld [vmem:[%s8893_s5 + $0x140] sm:$0xf0] }
 0x494   :  { %v4317_v24 = vor.u32 %v4519_v18, %v4314_v23  ;;  %v4165_v23 = vor.u32 %v4482_v59, %v4162_v8  ;;  %v4176_v59 = vld [vmem:[%s8893_s5 + $0x10] sm:$0xf]  ;;  %v4487_v8 = vld [vmem:[%s8893_s5 + $0x24] sm:$0xf0] }
 0x495   :  { %v1184_v27 = vrot.slane %v1183_v25, 1 }
 0x497   :  { %v1185_v28 = vadd.f32 %v1184_v27, %v1183_v25  ;;  %v4288_v25 = vld [vmem:[%s8893_s5 + $0xf8] sm:$0xf]  ;;  %v4516_v27 = vld [vmem:[%s8893_s5 + $0x10c] sm:$0xf0] }
 0x499   :  { %v1186_v29 = vmul.f32 %v1185_v28, %v5095_v44  ;;  %v4478_v44 = vld [vmem:[%s8890_s3 + $0x220] sm:$0xff]  ;;  %v4513_v28 = vld [vmem:[%s8893_s5 + $0xfc] sm:$0xf] }
 0x49a   :  { %1359 = vmatpush.bf16.msrb.mxu2 %v4478_v44 }
 0x49b   :  { %v1187_v31 = vadd.f32 1e-05, %v1186_v29  ;;  %v4290_v29 = vld [vmem:[%s8893_s5 + $0x110] sm:$0xf0] }
 0x49c   :  { %v4293_v44 = vor.u32 %v4513_v28, %v4290_v29  ;;  %v4520_v29 = vld [vmem:[%s8893_s5 + $0x134] sm:$0xf] }
 0x49d   :  { %4555 = vrsqrt.f32 %v1187_v31  ;;  %vm1194_vm11 = vweird.f32 %v1187_v31 }
 0x49e   :  { %1360 = vmatpush.bf16.msrb.mxu2 %v4477_v38  ;;  %v4507_v38 = vld [vmem:[%s8893_s5 + $0xcc] sm:$0xf] }
 0x4a2   :  { %1361 = vmatpush.bf16.msrb.mxu2 %v4476_v22 }
 0x4a3   :  { %v4556_v34 = vpop.eup %4555 }
 0x4a4   :  { %v1189_v35 = vmul.f32 %v4556_v34, %v1187_v31  ;;  %vm1195_vm10 = vweird.f32 %v4556_v34  ;;  %v4232_v31 = vld [vmem:[%s8893_s5 + $0x90] sm:$0xf] }
 0x4a5   :  { %vm1196_vm12 = vmor %vm1194_vm11, %vm1195_vm10 }
 0x4a6   :  { %v1190_v36 = vmul.f32 %v4556_v34, %v1189_v35  ;;  %1362 = vmatpush.bf16.msrb.mxu2 %v4475_v51  ;;  %v4234_v35 = vld [vmem:[%s8893_s5 + $0xa8] sm:$0xf0]  ;;  %v4242_v51 = vld [vmem:[%s8893_s5 + $0xb0] sm:$0xf0] }
 0x4a7   :  { %v4237_v22 = vor.u32 %v4500_v33, %v4234_v35  ;;  %v4296_v35 = vld [vmem:[%s8893_s5 + $0x100] sm:$0xf] }
 0x4a8   :  { %v1191_v37 = vmul.f32 0.5, %v1190_v36  ;;  %v4264_v36 = vld [vmem:[%s8893_s5 + $0xc8] sm:$0xf] }
 0x4a9   :  { %1689 = vmatpush.bf16.msra.mxu0 %v4237_v22  ;;  %v4486_v22 = vld [vmem:[%s8893_s5 + $0x1c] sm:$0xf0] }
 0x4aa   :  { %v1192_v39 = vsub.f32 1.5, %v1191_v37  ;;  %1363 = vmatpush.bf16.msrb.mxu2 %v4474_v52  ;;  %v4510_v37 = vld [vmem:[%s8893_s5 + $0xdc] sm:$0xf0]  ;;  %v4545_v52 = vld [vmem:[%s8888_s6 + $0xe] ss:$0 sm:$0xff] }
 0x4ac   :  { %v1193_v40 = vmul.f32 %v4556_v34, %v1192_v39  ;;  %v4266_v39 = vld [vmem:[%s8893_s5 + $0xe0] sm:$0xf0] }
 0x4ae   :  { %v1197_v42 = vsel %vm1196_vm12, %v4556_v34, %v1193_v40  ;;  %1711 = vmatpush.bf16.msra.mxu2 %v4341_v14  ;;  %v4289_v34 = vor.u32 %v4516_v27, %v4288_v25  ;;  %v4233_v40 = vor.u32 %v4503_v32, %v4232_v31  ;;  %v4221_v14 = vor.u32 %v4495_v1, %v4218_v2  ;;  %v4523_v27 = vld [vmem:[%s8893_s5 + $0x144] sm:$0xf0]  ;;  %v4200_v1 = vld [vmem:[%s8893_s5 + $0x40] sm:$0xf]  ;;  %v4493_v2 = vld [vmem:[%s8893_s5 + $0x54] sm:$0xf0] }
 0x4af   :  { %v1198_v43 = vmul.f32 %v1197_v42, %v1178_v16  ;;  %v4312_v16 = vld [vmem:[%s8893_s5 + $0x128] sm:$0xf]  ;;  %v4497_v42 = vld [vmem:[%s8893_s5 + $0x74] sm:$0xf0] }
 0x4b0   :  { %v4313_v21 = vor.u32 %v4522_v17, %v4312_v16  ;;  %1676 = vmatpush.bf16.msrb.mxu3 %v4233_v40  ;;  %v4192_v16 = vld [vmem:[%s8893_s5 + $0x38] sm:$0xf]  ;;  %v4492_v17 = vld [vmem:[%s8893_s5 + $0x4c] sm:$0xf0]  ;;  %v4168_v40 = vld [vmem:[%s8893_s5 + $0x8] sm:$0xf] }
 0x4b1   :  { %v1201_v46 = vmul.f32 %v4543_v41, %v1198_v43  ;;  %v4208_v41 = vld [vmem:[%s8893_s5 + $0x60] sm:$0xf]  ;;  %v4494_v43 = vld [vmem:[%s8893_s5 + $0x64] sm:$0xf]  ;;  %v4193_v28 = vor.u32 %v4492_v17, %v4192_v16 }
 0x4b2   :  { %1699 = vmatpush.bf16.msra.mxu1 %v4313_v21  ;;  %1712 = vmatpush.bf16.msra.mxu2 %v4317_v24  ;;  %v4209_v53 = vor.u32 %v4497_v42, %v4208_v41  ;;  %v4194_v21 = vld [vmem:[%s8893_s5 + $0x50] sm:$0xf0]  ;;  %v4345_v24 = vor.u32 %v4529_v12, %v4344_v11  ;;  %v4483_v41 = vld [vmem:[%s8893_s5 + $0xc] sm:$0xf]  ;;  %v4169_v42 = vor.u32 %v4486_v22, %v4168_v40  ;;  %v4836_v40 = vld [vmem:[%s8889_s0 + $0x18] sm:$0xff] }
 0x4b3   :  { %v1204_v47 = vadd.f32 %v4544_v45, %v1201_v46  ;;  %v4265_v45 = vor.u32 %v4510_v37, %v4264_v36  ;;  %v4210_v46 = vld [vmem:[%s8893_s5 + $0x78] sm:$0xf0]  ;;  %v4197_v31 = vor.u32 %v4489_v20, %v4194_v21  ;;  %v4514_v36 = vld [vmem:[%s8893_s5 + $0x104] sm:$0xf]  ;;  %v4177_v11 = vor.u32 %v4487_v8, %v4176_v59  ;;  %v1781_v21 = vld [vmem:[%s8894_s1 + $0x8] sm:$0xff] }
 0x4b4   :  { %v4213_v54 = vor.u32 %v4494_v43, %v4210_v46  ;;  %1677 = vmatpush.bf16.msrb.mxu3 %v4209_v53  ;;  %v4298_v37 = vld [vmem:[%s8893_s5 + $0x118] sm:$0xf0]  ;;  %v4170_v43 = vld [vmem:[%s8893_s5 + $0x20] sm:$0xf0]  ;;  %v4511_v46 = vld [vmem:[%s8893_s5 + $0xe4] sm:$0xf0] }
 0x4b5   :  { %vm1205_vm13 = vcmp.gt.f32.partialorder %v1204_v47, 0.0  ;;  %v1206_v48 = vmul.f32 0.01, %v1204_v47  ;;  %v4505_v53 = vld [vmem:[%s8893_s5 + $0xb4] sm:$0xf0] }
 0x4b6   :  { %1700 = vmatpush.bf16.msra.mxu1 %v4289_v34  ;;  %1713 = vmatpush.bf16.msra.mxu2 %v4293_v44  ;;  %v4325_v34 = vor.u32 %v4520_v29, %v4322_v30  ;;  %v4517_v44 = vld [vmem:[%s8893_s5 + $0x114] sm:$0xf0] }
 0x4b7   :  { %v1207_v49 = vsel %vm1205_vm13, %v1204_v47, %v1206_v48  ;;  %v4269_v47 = vor.u32 %v4507_v38, %v4266_v39  ;;  %v4240_v48 = vld [vmem:[%s8893_s5 + $0x98] sm:$0xf]  ;;  %1690 = vmatpush.bf16.msra.mxu0 %v4213_v54  ;;  %v4297_v38 = vor.u32 %v4517_v44, %v4296_v35  ;;  %v4301_v39 = vor.u32 %v4514_v36, %v4298_v37  ;;  %v4502_v54 = vld [vmem:[%s8893_s5 + $0xa4] sm:$0xf] }
 0x4b8   :  { %v1208_v50 = vpack.c.bf16 %v1207_v49, %v1207_v49  ;;  %v4504_v49 = vld [vmem:[%s8893_s5 + $0xac] sm:$0xf0]  ;;  %1678 = vmatpush.bf16.msrb.mxu3 %v4185_v3  ;;  %v4253_v57 = vor.u32 %v4502_v54, %v4250_v56 }
 0x4b9   :  { %v4241_v58 = vor.u32 %v4504_v49, %v4240_v48  ;;  %v4508_v49 = vld [vmem:[%s8893_s5 + $0xd4] sm:$0xf] }
 0x4ba   :  { %1283 = vmatmul.bf16.vlgmr.msrb.gmra.mxu1 %v1208_v50  ;;  %v4501_v50 = vld [vmem:[%s8893_s5 + $0x9c] sm:$0xf]  ;;  %1714 = vmatpush.bf16.msra.mxu2 %v4269_v47  ;;  %v4173_v47 = vor.u32 %v4483_v41, %v4170_v43 }
 0x4bb   :  { %1701 = vmatpush.bf16.msra.mxu1 %v4265_v45  ;;  %v4245_v61 = vor.u32 %v4501_v50, %v4242_v51  ;;  %1691 = vmatpush.bf16.msra.mxu0 %v4189_v6  ;;  %v4272_v45 = vld [vmem:[%s8893_s5 + $0xd0] sm:$0xf]  ;;  %v4274_v50 = vld [vmem:[%s8893_s5 + $0xe8] sm:$0xf0]  ;;  %v4201_v6 = vor.u32 %v4493_v2, %v4200_v1 }
 0x4bc   :  { %1679 = vmatpush.bf16.msrb.mxu3 %v4161_v19  ;;  %v4273_v48 = vor.u32 %v4511_v46, %v4272_v45  ;;  %v4277_v51 = vor.u32 %v4508_v49, %v4274_v50  ;;  %v4833_v19 = vld [vmem:[%s8889_s0] sm:$0xff] }
 0x4be   :  { %1715 = vmatpush.bf16.msra.mxu2 %v4245_v61  ;;  %v4496_v61 = vld [vmem:[%s8893_s5 + $0x74] sm:$0xf] }
 0x4bf   :  { %1702 = vmatpush.bf16.msra.mxu1 %v4241_v58  ;;  %1692 = vmatpush.bf16.msra.mxu0 %v4165_v23  ;;  %v4224_v58 = vld [vmem:[%s8893_s5 + $0x70] sm:$0xf]  ;;  %v4229_v3 = vor.u32 %v4496_v61, %v4226_v0 }
 0x4c0   :  { %1724 = vmatpush.bf16.msra.mxu3 %v4345_v24  ;;  %v4225_v62 = vor.u32 %v4499_v60, %v4224_v58  ;;  %v1782_v23 = vld [vmem:[%s8894_s1 + $0x10] sm:$0xff] }
 0x4c2   :  { %1716 = vmatpush.bf16.msra.mxu2 %v4221_v14 }
 0x4c3   :  { %1703 = vmatpush.bf16.msra.mxu1 %v4217_v9  ;;  %1737 = vmatpush.bf16.msrb.mxu0 %v4349_v26  ;;  %v4484_v9 = vld [vmem:[%s8893_s5 + $0x14] sm:$0xf] }
 0x4c6   :  { %1717 = vmatpush.bf16.msra.mxu2 %v4197_v31 }
 0x4c7   :  { %1704 = vmatpush.bf16.msra.mxu1 %v4193_v28  ;;  %1738 = vmatpush.bf16.msrb.mxu0 %v4325_v34  ;;  %v5666_v28 = vld [vmem:[%s8895_s7] sm:$0x3f]  ;;  %v1783_v34 = vld [vmem:[%s8894_s1 + $0x18] sm:$0xff] }
 0x4c8   :  { %v1421_v31 = vperm.slane %v5666_v28, 1  ;;  %v1789_v22 = vadd.f32 %v4836_v40, %v1783_v34  ;;  %v1420_v43 = vperm.slane %v5666_v28, 0 }
 0x4ca   :  { %1718 = vmatpush.bf16.msra.mxu2 %v4173_v47  ;;  %v1423_v47 = vperm.slane %v5666_v28, 3  ;;  %v1795_v49 = vmax.f32 %v1789_v22, 1e-05 }
 0x4cb   :  { %1739 = vmatpush.bf16.msrb.mxu0 %v4301_v39  ;;  %1705 = vmatpush.bf16.msra.mxu1 %v4169_v42 }
 0x4cc   :  { %v1801_v61 = vmin.f32 %v1795_v49, 0.99999 }
 0x4ce   :  { %v1861_v8 = vsub.f32 1.0, %v1801_v61 }
 0x4cf   :  { %1740 = vmatpush.bf16.msrb.mxu0 %v4277_v51  ;;  %v1785_v51 = vld [vmem:[%s8894_s1 + $0x28] sm:$0xff] }
 0x4d3   :  { %1741 = vmatpush.bf16.msrb.mxu0 %v4253_v57 }
 0x4d7   :  { %1742 = vmatpush.bf16.msrb.mxu0 %v4229_v3 }
 0x537   :  { %v1284_v5 = vpop.f32.mrf.mxu1 }
 0x538   :  { %v1285_v10 = vadd.f32 %v4545_v52, %v1284_v5  ;;  %v4248_v52 = vld [vmem:[%s8893_s5 + $0xa0] sm:$0xf]  ;;  %v4202_v5 = vld [vmem:[%s8893_s5 + $0x58] sm:$0xf0] }
 0x539   :  { %v4249_v55 = vor.u32 %v4505_v53, %v4248_v52  ;;  %v4205_v7 = vor.u32 %v4490_v4, %v4202_v5 }
 0x53a   :  { %v1288_v18 = vadd.f32 %v1285_v10, %v5287_v63  ;;  %v4320_v63 = vld [vmem:[%s8893_s5 + $0x130] sm:$0xf]  ;;  %v4178_v10 = vld [vmem:[%s8893_s5 + $0x28] sm:$0xf0] }
 0x53b   :  { %v4321_v33 = vor.u32 %v4523_v27, %v4320_v63  ;;  %1743 = vmatpush.bf16.msrb.mxu0 %v4205_v7  ;;  %v4181_v12 = vor.u32 %v4484_v9, %v4178_v10  ;;  %v4835_v63 = vld [vmem:[%s8889_s0 + $0x10] sm:$0xff]  ;;  %v1425_v7 = vperm.slane %v5666_v28, 5  ;;  %v1784_v9 = vld [vmem:[%s8894_s1 + $0x20] sm:$0xff] }
 0x53c   :  { %v1289_v25 = vpack.c.bf16 %v1288_v18, %v1288_v18  ;;  %v1780_v18 = vld [vmem:[%s8894_s1] sm:$0xff]  ;;  %v1788_v27 = vadd.f32 %v4835_v63, %v1782_v23 }
 0x53d   :  { %1725 = vmatpush.bf16.msra.mxu3 %v4321_v33  ;;  %v1786_v20 = vadd.f32 %v4833_v19, %v1780_v18  ;;  %v1422_v33 = vperm.slane %v5666_v28, 2 }
 0x53e   :  { %1364 = vmatmul.bf16.vlgmr.msrb.gmra.mxu2 %v1289_v25  ;;  %v4834_v25 = vld [vmem:[%s8889_s0 + $0x8] sm:$0xff] }
 0x53f   :  { %v1286_v32 = vpop.f32.mrf.mxu1  ;;  %1744 = vmatpush.bf16.msrb.mxu0 %v4181_v12  ;;  %v1792_v24 = vmax.f32 %v1786_v20, 1e-05  ;;  %v1787_v26 = vadd.f32 %v4834_v25, %v1781_v21  ;;  %v4838_v25 = vld [vmem:[%s8889_s0 + $0x20] sm:$0xff] }
 0x540   :  { %v1794_v32 = vmax.f32 %v1788_v27, 1e-05 }
 0x541   :  { %1726 = vmatpush.bf16.msra.mxu3 %v4297_v38  ;;  %v1798_v29 = vmin.f32 %v1792_v24, 0.99999  ;;  %v1793_v30 = vmax.f32 %v1787_v26, 1e-05  ;;  %v1790_v26 = vadd.f32 %v4838_v25, %v1784_v9 }
 0x542   :  { %v1800_v39 = vmin.f32 %v1794_v32, 0.99999 }
 0x543   :  { %v1858_v35 = vsub.f32 1.0, %v1798_v29  ;;  %v1799_v44 = vmin.f32 %v1793_v30, 0.99999  ;;  %4557 = vlog2.f32 %v1798_v29  ;;  %v1796_v40 = vmax.f32 %v1790_v26, 1e-05 }
 0x545   :  { %1727 = vmatpush.bf16.msra.mxu3 %v4273_v48  ;;  %4559 = vlog2.f32 %v1858_v35  ;;  %v1859_v45 = vsub.f32 1.0, %v1799_v44  ;;  %v1860_v48 = vsub.f32 1.0, %v1800_v39 }
 0x549   :  { %1728 = vmatpush.bf16.msra.mxu3 %v4249_v55  ;;  %v4558_v56 = vpop.eup %4557 }
 0x54b   :  { %v4560_v60 = vpop.eup %4559 }
 0x54d   :  { %1729 = vmatpush.bf16.msra.mxu3 %v4225_v62  ;;  %v4837_v62 = vld [vmem:[%s8889_s0 + $0x28] sm:$0xff] }
 0x54e   :  { %v1791_v0 = vadd.f32 %v4837_v62, %v1785_v51  ;;  %v1802_v62 = vmin.f32 %v1796_v40, 0.99999 }
 0x550   :  { %v1797_v10 = vmax.f32 %v1791_v0, 1e-05 }
 0x551   :  { %1730 = vmatpush.bf16.msra.mxu3 %v4201_v6 }
 0x552   :  { %v1803_v30 = vmin.f32 %v1797_v10, 0.99999 }
 0x555   :  { %1731 = vmatpush.bf16.msra.mxu3 %v4177_v11 }
 0x5c1   :  { %v1365_v14 = vpop.f32.mrf.mxu2 }
 0x5c2   :  { %v1366_v15 = vadd.f32 %v4546_v13, %v1365_v14  ;;  %v5688_v14 = vmul.f32 0.6931472, %v4558_v56 }
 0x5c4   :  { %v1369_v16 = vpack.c.bf16 %v1366_v15, %v1366_v15  ;;  %v5690_v15 = vmul.f32 0.6931472, %v4560_v60 }
 0x5c6   :  { %1680 = vmatmul.bf16.vlgmr.msrb.gmra.mxu3 %v1369_v16  ;;  %1693 = vmatmul.bf16.vlgmr.msra.gmra.mxu0 %v1369_v16 }
 0x5c7   :  { %1706 = vmatmul.bf16.vlgmr.msra.gmra.mxu1 %v1369_v16  ;;  %1719 = vmatmul.bf16.vlgmr.msra.gmra.mxu2 %v1369_v16 }
 0x5c9   :  { %v1367_v17 = vpop.f32.mrf.mxu2 }
 0x5d6   :  { %1732 = vmatmul.bf16.vlgmr.msra.gmra.mxu3 %v1369_v16  ;;  %1745 = vmatmul.bf16.vlgmr.msrb.gmra.mxu0 %v1369_v16 }
 0x643   :  { %v1694_v36 = vpop.f32.mrf.mxu0 }
 0x644   :  { %v1695_v37 = vadd.f32 %v1694_v36, %v1421_v31  ;;  %v1707_v38 = vpop.f32.mrf.mxu1 }
 0x645   :  { %v1708_v41 = vadd.f32 %v1707_v38, %v1422_v33 }
 0x646   :  { %v1751_v42 = vmul.f32 0.5, %v1695_v37 }
 0x647   :  { %v1752_v46 = vmul.f32 0.5, %v1708_v41 }
 0x648   :  { %4561 = vtanh.f32 %v1751_v42 }
 0x649   :  { %4563 = vtanh.f32 %v1752_v46  ;;  %v1681_v50 = vpop.f32.mrf.mxu3 }
 0x64a   :  { %4565 = vlog2.f32 %v1799_v44  ;;  %v1682_v52 = vadd.f32 %v1681_v50, %v1420_v43  ;;  %v1720_v53 = vpop.f32.mrf.mxu2  ;;  %v1424_v44 = vperm.slane %v5666_v28, 4  ;;  %v1863_v43 = vsub.f32 1.0, %v1803_v30 }
 0x64b   :  { %4567 = vlog2.f32 %v1859_v45  ;;  %v1721_v54 = vadd.f32 %v1720_v53, %v1423_v47  ;;  %v1696_v55 = vpop.f32.mrf.mxu0 }
 0x64c   :  { %4569 = vlog2.f32 %v1800_v39  ;;  %v1750_v57 = vmul.f32 0.5, %v1682_v52  ;;  %v1709_v58 = vpop.f32.mrf.mxu1 }
 0x64d   :  { %4571 = vlog2.f32 %v1860_v48  ;;  %v1753_v1 = vmul.f32 0.5, %v1721_v54 }
 0x64e   :  { %v4562_v2 = vpop.eup %4561  ;;  %4573 = vtanh.f32 %v1750_v57 }
 0x64f   :  { %v4564_v3 = vpop.eup %4563  ;;  %v1763_v4 = vadd.f32 1.0, %v4562_v2  ;;  %4575 = vtanh.f32 %v1753_v1 }
 0x650   :  { %v4566_v5 = vpop.eup %4565  ;;  %v1764_v6 = vadd.f32 1.0, %v4564_v3  ;;  %4577 = vlog2.f32 %v1801_v61 }
 0x651   :  { %v4568_v59 = vpop.eup %4567  ;;  %v1769_v11 = vmul.f32 0.5, %v1763_v4  ;;  %v1683_v12 = vpop.f32.mrf.mxu3  ;;  %v1837_v19 = vmul.f32 0.6931472, %v4566_v5  ;;  %4579 = vlog2.f32 %v1861_v8 }
 0x652   :  { %v4570_v13 = vpop.eup %4569  ;;  %v1770_v16 = vmul.f32 0.5, %v1764_v6  ;;  %v1722_v17 = vpop.f32.mrf.mxu2  ;;  %v1867_v24 = vmul.f32 0.6931472, %v4568_v59 }
 0x653   :  { %v4572_v18 = vpop.eup %4571  ;;  %1775 = vst [vmem:[%s8896_s8 + $0x8] sm:$0xff] %v1769_v11  ;;  %v1805_v20 = vmax.f32 %v1769_v11, 1e-05  ;;  %v1746_v21 = vpop.f32.mrf.mxu0  ;;  %v1839_v36 = vmul.f32 0.6931472, %v4570_v13 }
 0x654   :  { %v4574_v23 = vpop.eup %4573  ;;  %1776 = vst [vmem:[%s8896_s8 + $0x10] sm:$0xff] %v1770_v16  ;;  %v1806_v63 = vmax.f32 %v1770_v16, 1e-05  ;;  %v1747_v27 = vadd.f32 %v1746_v21, %v1425_v7  ;;  %v1869_v37 = vmul.f32 0.6931472, %v4572_v18  ;;  %v1862_v16 = vsub.f32 1.0, %v1802_v62 }
 0x655   :  { %v4576_v29 = vpop.eup %4575  ;;  %v1811_v31 = vmin.f32 %v1805_v20, 0.99999  ;;  %v1762_v32 = vadd.f32 1.0, %v4574_v23 }
 0x656   :  { %v1812_v33 = vmin.f32 %v1806_v63, 0.99999  ;;  %v1765_v34 = vadd.f32 1.0, %v4576_v29  ;;  %v1755_v35 = vmul.f32 0.5, %v1747_v27  ;;  %v4578_v42 = vpop.eup %4577 }
 0x657   :  { %v1817_v38 = vmul.f32 100.0, %v1811_v31  ;;  %v1768_v39 = vmul.f32 0.5, %v1762_v32  ;;  %v4580_v52 = vpop.eup %4579  ;;  %v1841_v3 = vmul.f32 0.6931472, %v4578_v42 }
 0x658   :  { %v1818_v22 = vmul.f32 100.0, %v1812_v33  ;;  %v1771_v41 = vmul.f32 0.5, %v1765_v34  ;;  %4581 = vtanh.f32 %v1755_v35  ;;  %v1871_v9 = vmul.f32 0.6931472, %v4580_v52 }
 0x659   :  { %v1823_v45 = vsub.f32 100.0, %v1817_v38  ;;  %v5702_v46 = vadd.f32 -1.0, %v1817_v38  ;;  %1774 = vst [vmem:[%s8896_s8] sm:$0xff] %v1768_v39  ;;  %v1804_v47 = vmax.f32 %v1768_v39, 1e-05  ;;  %v1733_v48 = vpop.f32.mrf.mxu3  ;;  %4583 = vlog2.f32 %v1803_v30 }
 0x65a   :  { %v1824_v28 = vsub.f32 100.0, %v1818_v22  ;;  %v5707_v49 = vadd.f32 -1.0, %v1818_v22  ;;  %1777 = vst [vmem:[%s8896_s8 + $0x18] sm:$0xff] %v1771_v41  ;;  %v1807_v50 = vmax.f32 %v1771_v41, 1e-05  ;;  %v1734_v51 = vadd.f32 %v1733_v48, %v1424_v44 }
 0x65b   :  { %v5712_v53 = vadd.f32 -1.0, %v1823_v45  ;;  %v1810_v54 = vmin.f32 %v1804_v47, 0.99999  ;;  %v1748_v55 = vpop.f32.mrf.mxu0  ;;  %v1847_v56 = vmul.f32 %v5702_v46, %v1837_v19  ;;  %4585 = vlog2.f32 %v1863_v43 }
 0x65c   :  { %v5715_v57 = vadd.f32 -1.0, %v1824_v28  ;;  %v1813_v58 = vmin.f32 %v1807_v50, 0.99999  ;;  %v1754_v60 = vmul.f32 0.5, %v1734_v51  ;;  %v1848_v61 = vmul.f32 %v5707_v49, %v1839_v36 }
 0x65d   :  { %v1816_v0 = vmul.f32 100.0, %v1810_v54  ;;  %v1877_v1 = vmul.f32 %v5712_v53, %v1867_v24  ;;  %v5736_v24 = vadd.f32 1.0, %v5702_v46 }
 0x65e   :  { %v4582_v2 = vpop.eup %4581  ;;  %v1819_v4 = vmul.f32 100.0, %v1813_v58  ;;  %4587 = vtanh.f32 %v1754_v60  ;;  %v1878_v5 = vmul.f32 %v5715_v57, %v1869_v37 }
 0x65f   :  { %v1822_v6 = vsub.f32 100.0, %v1816_v0  ;;  %v5720_v7 = vadd.f32 -1.0, %v1816_v0  ;;  %v1767_v59 = vadd.f32 1.0, %v4582_v2  ;;  %v5722_v8 = vadd.f32 %v1877_v1, %v1847_v56  ;;  %v4584_v13 = vpop.eup %4583 }
 0x660   :  { %v1825_v10 = vsub.f32 100.0, %v1819_v4  ;;  %v5724_v11 = vadd.f32 -1.0, %v1819_v4  ;;  %v5726_v12 = vadd.f32 %v1878_v5, %v1848_v61  ;;  %4589 = vlog2.f32 %v1802_v62 }
 0x661   :  { %v5728_v17 = vadd.f32 -1.0, %v1822_v6  ;;  %v1773_v18 = vmul.f32 0.5, %v1767_v59  ;;  %v1735_v19 = vpop.f32.mrf.mxu3  ;;  %v1846_v20 = vmul.f32 %v5720_v7, %v5688_v14  ;;  %v4586_v25 = vpop.eup %4585  ;;  %v5744_v27 = vadd.f32 1.0, %v5720_v7 }
 0x662   :  { %v5732_v21 = vadd.f32 -1.0, %v1825_v10  ;;  %v1849_v23 = vmul.f32 %v5724_v11, %v1841_v3  ;;  %4591 = vlog2.f32 %v1862_v16  ;;  %v1845_v33 = vmul.f32 0.6931472, %v4584_v13 }
 0x663   :  { %1779 = vst [vmem:[%s8896_s8 + $0x28] sm:$0xff] %v1773_v18  ;;  %v1809_v26 = vmax.f32 %v1773_v18, 1e-05  ;;  %v1876_v63 = vmul.f32 %v5728_v17, %v5690_v15  ;;  %4593 = vrcp.f32 %v5736_v24  ;;  %v5753_v15 = vadd.f32 1.0, %v5707_v49 }
 0x664   :  { %v4588_v14 = vpop.eup %4587  ;;  %v1879_v29 = vmul.f32 %v5732_v21, %v1871_v9  ;;  %4595 = vrcp.f32 %v5744_v27  ;;  %v1875_v36 = vmul.f32 0.6931472, %v4586_v25  ;;  %v5757_v37 = vadd.f32 1.0, %v5724_v11 }
 0x665   :  { %v1815_v30 = vmin.f32 %v1809_v26, 0.99999  ;;  %v1766_v31 = vadd.f32 1.0, %v4588_v14  ;;  %v5747_v32 = vadd.f32 %v1876_v63, %v1846_v20  ;;  %4597 = vrcp.f32 %v5753_v15 }
 0x666   :  { %v5749_v34 = vadd.f32 %v1879_v29, %v1849_v23  ;;  %v4590_v22 = vpop.eup %4589  ;;  %4599 = vrcp.f32 %v5757_v37  ;;  %v1918_v18 = vand.u32 2147483647, %v5736_v24  ;;  %v1903_v20 = vand.u32 2147483647, %v5744_v27 }
 0x667   :  { %v1821_v35 = vmul.f32 100.0, %v1815_v30  ;;  %v1772_v44 = vmul.f32 0.5, %v1766_v31  ;;  %v1843_v28 = vmul.f32 0.6931472, %v4590_v22  ;;  %v1905_v63 = vand.u32 2147483648, %v5744_v27 }
 0x668   :  { %v4592_v41 = vpop.eup %4591  ;;  %vm1914_vm14 = vweird.f32 %v5736_v24  ;;  %vm5818_vm0 = vcmp.eq.f32.partialorder %v1918_v18, 8.507059e+37  ;;  %v1920_v31 = vand.u32 2147483648, %v5736_v24  ;;  %vm1899_vm1 = vweird.f32 %v5744_v27 }
 0x669   :  { %v1827_v38 = vsub.f32 100.0, %v1821_v35  ;;  %v5759_v39 = vadd.f32 -1.0, %v1821_v35  ;;  %1778 = vst [vmem:[%s8896_s8 + $0x20] sm:$0xff] %v1772_v44  ;;  %v1808_v40 = vmax.f32 %v1772_v44, 1e-05  ;;  %v5768_v47 = vpop.eup %4593  ;;  %vm5826_vm3 = vcmp.eq.f32.partialorder %v1903_v20, 8.507059e+37 }
 0x66a   :  { %v5771_v48 = vpop.eup %4595  ;;  %v1873_v54 = vmul.f32 0.6931472, %v4592_v41  ;;  %v1910_v60 = vmul.f32 %v5768_v47, %v5736_v24  ;;  %vm1915_vm15 = vweird.f32 %v5768_v47  ;;  %v1906_v22 = vor.u32 1.1754944e-38, %v1905_v63 }
 0x66b   :  { %v5764_v42 = vadd.f32 -1.0, %v1827_v38  ;;  %v1814_v43 = vmin.f32 %v1808_v40, 0.99999  ;;  %v1851_v45 = vmul.f32 %v5759_v39, %v1845_v33  ;;  %v5775_v52 = vadd.f32 1.0, %v5759_v39  ;;  %v5785_v62 = vpop.eup %4597  ;;  %vm5839_vm4 = vmor %vm1914_vm14, %vm1915_vm15 }
 0x66c   :  { %v1895_v61 = vmul.f32 %v5771_v48, %v5744_v27  ;;  %v5794_v3 = vpop.eup %4599  ;;  %v1911_v5 = vsub.f32 1.0, %v1910_v60  ;;  %v1925_v9 = vmul.f32 %v5785_v62, %v5753_v15  ;;  %vm1900_vm2 = vweird.f32 %v5771_v48 }
 0x66d   :  { %v1820_v50 = vmul.f32 100.0, %v1814_v43  ;;  %v1881_v51 = vmul.f32 %v5764_v42, %v1875_v36  ;;  %4601 = vrcp.f32 %v5775_v52  ;;  %v1940_v10 = vmul.f32 %v5794_v3, %v5757_v37  ;;  %vm5847_vm5 = vmor %vm1899_vm1, %vm1900_vm2 }
 0x66e   :  { %v1896_v6 = vsub.f32 1.0, %v1895_v61  ;;  %v1912_v16 = vmul.f32 %v5768_v47, %v1911_v5  ;;  %v1926_v23 = vsub.f32 1.0, %v1925_v9  ;;  %v5835_v40 = vadd.f32 2.0, %v5720_v7 }
 0x66f   :  { %v1826_v55 = vsub.f32 100.0, %v1820_v50  ;;  %v5777_v56 = vadd.f32 -1.0, %v1820_v50  ;;  %v5779_v58 = vadd.f32 %v1881_v51, %v1851_v45  ;;  %v1941_v25 = vsub.f32 1.0, %v1940_v10 }
 0x670   :  { %v1897_v19 = vmul.f32 %v5771_v48, %v1896_v6  ;;  %v1913_v29 = vadd.f32 %v5768_v47, %v1912_v16  ;;  %v1927_v44 = vmul.f32 %v5785_v62, %v1926_v23  ;;  %v1933_v41 = vand.u32 2147483647, %v5753_v15 }
 0x671   :  { %v5787_v0 = vadd.f32 -1.0, %v1826_v55  ;;  %v1850_v1 = vmul.f32 %v5777_v56, %v1843_v28  ;;  %v5791_v2 = vadd.f32 1.0, %v5777_v56  ;;  %v1942_v36 = vmul.f32 %v5794_v3, %v1941_v25 }
 0x672   :  { %v1898_v33 = vadd.f32 %v5771_v48, %v1897_v19  ;;  %v5845_v45 = vadd.f32 2.0, %v5702_v46  ;;  %v1917_v50 = vsel %vm5839_vm4, %v5768_v47, %v1913_v29  ;;  %v1921_v51 = vor.u32 1.1754944e-38, %v1920_v31 }
 0x673   :  { %v1880_v4 = vmul.f32 %v5787_v0, %v1873_v54  ;;  %4603 = vrcp.f32 %v5791_v2  ;;  %v5804_v13 = vpop.eup %4601  ;;  %v1935_v24 = vand.u32 2147483648, %v5753_v15  ;;  %v5856_v54 = vadd.f32 2.0, %v5707_v49 }
 0x674   :  { %v1970_v14 = vmul.f32 %v5804_v13, %v5775_v52  ;;  %v1902_v55 = vsel %vm5847_vm5, %v5771_v48, %v1898_v33  ;;  %vm1930_vm6 = vweird.f32 %v5785_v62  ;;  %vm1945_vm7 = vweird.f32 %v5794_v3 }
 0x675   :  { %v5798_v59 = vadd.f32 %v1880_v4, %v1850_v1  ;;  %v5864_v60 = vadd.f32 2.0, %v5724_v11  ;;  %v1928_v61 = vadd.f32 %v5785_v62, %v1927_v44  ;;  %v1943_v47 = vadd.f32 %v5794_v3, %v1942_v36 }
 0x676   :  { %v1971_v43 = vsub.f32 1.0, %v1970_v14  ;;  %4605 = vrcp.f32 %v5835_v40  ;;  %vm1929_vm8 = vweird.f32 %v5753_v15  ;;  %v1950_v4 = vand.u32 2147483648, %v5757_v37 }
 0x677   :  { %4607 = vrcp.f32 %v5845_v45  ;;  %v1922_v5 = vsel %vm5818_vm0, %v1921_v51, %v1917_v50  ;;  %vm5875_vm9 = vmor %vm1929_vm8, %vm1930_vm6  ;;  %vm1944_vm10 = vweird.f32 %v5757_v37  ;;  %v1948_v9 = vand.u32 2147483647, %v5757_v37 }
 0x678   :  { %v1972_v48 = vmul.f32 %v5804_v13, %v1971_v43  ;;  %4609 = vrcp.f32 %v5856_v54  ;;  %v1907_v15 = vsel %vm5826_vm3, %v1906_v22, %v1902_v55  ;;  %vm5884_vm11 = vcmp.eq.f32.partialorder %v1933_v41, 8.507059e+37  ;;  %vm5890_vm12 = vmor %vm1944_vm10, %vm1945_vm7 }
 0x679   :  { %v5810_v26 = vpop.eup %4603  ;;  %v1936_v16 = vor.u32 1.1754944e-38, %v1935_v24  ;;  %4611 = vrcp.f32 %v5864_v60  ;;  %v1932_v37 = vsel %vm5875_vm9, %v5785_v62, %v1928_v61  ;;  %v1947_v19 = vsel %vm5890_vm12, %v5794_v3, %v1943_v47 }
 0x67a   :  { %v1955_v38 = vmul.f32 %v5810_v26, %v5791_v2  ;;  %v5903_v23 = vadd.f32 2.0, %v5777_v56  ;;  %v1923_v25 = vmul.f32 676.5204, %v1922_v5  ;;  %v1951_v63 = vor.u32 1.1754944e-38, %v1950_v4 }
 0x67b   :  { %v1973_v14 = vadd.f32 %v5804_v13, %v1972_v48  ;;  %vm1975_vm13 = vweird.f32 %v5804_v13  ;;  %vm1949_vm14 = vcmp.eq.f32.partialorder %v1948_v9, 8.507059e+37  ;;  %vm1974_vm15 = vweird.f32 %v5775_v52 }
 0x67c   :  { %v1956_v1 = vsub.f32 1.0, %v1955_v38  ;;  %v5907_v29 = vpop.eup %4605  ;;  %v1980_v62 = vand.u32 2147483648, %v5775_v52  ;;  %v5912_v3 = vadd.f32 2.0, %v5759_v39  ;;  %v1908_v31 = vmul.f32 676.5204, %v1907_v15  ;;  %vm5926_vm2 = vmor %vm1974_vm15, %vm1975_vm13 }
 0x67d   :  { %v5914_v30 = vpop.eup %4607  ;;  %v1937_v33 = vsel %vm5884_vm11, %v1936_v16, %v1932_v37  ;;  %v1952_v35 = vsel %vm1949_vm14, %v1951_v63, %v1947_v19  ;;  %v1978_v44 = vand.u32 2147483647, %v5775_v52  ;;  %vm1959_vm0 = vweird.f32 %v5791_v2 }
 0x67e   :  { %v1957_v20 = vmul.f32 %v5810_v26, %v1956_v1  ;;  %v5919_v36 = vpop.eup %4609  ;;  %vm1960_vm1 = vweird.f32 %v5810_v26  ;;  %4613 = vrcp.f32 %v5903_v23  ;;  %v1963_v52 = vand.u32 2147483647, %v5791_v2 }
 0x67f   :  { %v5931_v27 = vpop.eup %4611  ;;  %v1965_v41 = vand.u32 2147483648, %v5791_v2  ;;  %v1977_v43 = vsel %vm5926_vm2, %v5804_v13, %v1973_v14  ;;  %v1997_v28 = vmul.f32 %v5907_v29, %v5835_v40  ;;  %v1938_v50 = vmul.f32 676.5204, %v1937_v33  ;;  %vm5941_vm3 = vmor %vm1959_vm0, %vm1960_vm1 }
 0x680   :  { %v1958_v38 = vadd.f32 %v5810_v26, %v1957_v20  ;;  %v1953_v51 = vmul.f32 676.5204, %v1952_v35  ;;  %v1981_v24 = vor.u32 1.1754944e-38, %v1980_v62  ;;  %4615 = vrcp.f32 %v5912_v3 }
 0x681   :  { %vm1979_vm4 = vcmp.eq.f32.partialorder %v1978_v44, 8.507059e+37  ;;  %v5945_v61 = vadd.f32 1.0, %v1908_v31  ;;  %v2012_v2 = vmul.f32 %v5914_v30, %v5845_v45  ;;  %v2027_v13 = vmul.f32 %v5919_v36, %v5856_v54 }
 0x682   :  { %v1962_v47 = vsel %vm5941_vm3, %v5810_v26, %v1958_v38  ;;  %v1982_v1 = vsel %vm1979_vm4, %v1981_v24, %v1977_v43  ;;  %v2007_v4 = vand.u32 2147483648, %v5835_v40  ;;  %v2042_v48 = vmul.f32 %v5931_v27, %v5864_v60 }
 0x683   :  { %vm1964_vm5 = vcmp.eq.f32.partialorder %v1963_v52, 8.507059e+37  ;;  %v1966_v5 = vor.u32 1.1754944e-38, %v1965_v41  ;;  %v1998_v6 = vsub.f32 1.0, %v1997_v28  ;;  %v2022_v9 = vand.u32 2147483648, %v5845_v45 }
 0x684   :  { %v5958_v15 = vpop.eup %4613  ;;  %v5960_v10 = vadd.f32 1.0, %v1923_v25  ;;  %v5962_v16 = vadd.f32 1.0, %v1938_v50  ;;  %v5964_v18 = vadd.f32 1.0, %v1953_v51  ;;  %v2005_v26 = vand.u32 2147483647, %v5835_v40 }
 0x685   :  { %v1967_v37 = vsel %vm1964_vm5, %v1966_v5, %v1962_v47  ;;  %v1983_v19 = vmul.f32 676.5204, %v1982_v1  ;;  %vm2001_vm6 = vweird.f32 %v5835_v40  ;;  %v2013_v20 = vsub.f32 1.0, %v2012_v2 }
 0x686   :  { %v2028_v63 = vsub.f32 1.0, %v2027_v13  ;;  %v5968_v14 = vpop.eup %4615  ;;  %v2008_v62 = vor.u32 1.1754944e-38, %v2007_v4  ;;  %vm2016_vm7 = vweird.f32 %v5845_v45  ;;  %v2020_v25 = vand.u32 2147483647, %v5845_v45 }
 0x687   :  { %v2037_v31 = vand.u32 2147483648, %v5856_v54  ;;  %v2043_v33 = vsub.f32 1.0, %v2042_v48  ;;  %v1999_v35 = vmul.f32 %v5907_v29, %v1998_v6  ;;  %v2023_v44 = vor.u32 1.1754944e-38, %v2022_v9 }
 0x688   :  { %v2035_v38 = vand.u32 2147483647, %v5856_v54  ;;  %v2057_v22 = vmul.f32 %v5958_v15, %v5903_v23  ;;  %v1968_v52 = vmul.f32 676.5204, %v1967_v37  ;;  %vm2031_vm8 = vweird.f32 %v5856_v54 }
 0x689   :  { %vm2046_vm9 = vweird.f32 %v5864_v60  ;;  %v5980_v41 = vadd.f32 3.0, %v5720_v7  ;;  %v5982_v43 = vadd.f32 1.0, %v1983_v19  ;;  %vm5984_vm10 = vcmp.eq.f32.partialorder %v2005_v26, 8.507059e+37 }
 0x68a   :  { %v2014_v50 = vmul.f32 %v5914_v30, %v2013_v20  ;;  %v2029_v51 = vmul.f32 %v5919_v36, %v2028_v63  ;;  %v2072_v24 = vmul.f32 %v5968_v14, %v5912_v3  ;;  %vm2002_vm11 = vweird.f32 %v5907_v29 }
 0x68b   :  { %vm2017_vm12 = vweird.f32 %v5914_v30  ;;  %v2038_v55 = vor.u32 1.1754944e-38, %v2037_v31  ;;  %v2044_v2 = vmul.f32 %v5931_v27, %v2043_v33  ;;  %v2000_v13 = vadd.f32 %v5907_v29, %v1999_v35  ;;  %vm6022_vm0 = vmor %vm2001_vm6, %vm2002_vm11 }
 0x68c   :  { %vm5996_vm13 = vcmp.eq.f32.partialorder %v2020_v25, 8.507059e+37  ;;  %vm6000_vm14 = vcmp.eq.f32.partialorder %v2035_v38, 8.507059e+37  ;;  %v2050_v4 = vand.u32 2147483647, %v5864_v60  ;;  %v2058_v48 = vsub.f32 1.0, %v2057_v22  ;;  %vm6039_vm3 = vmor %vm2016_vm7, %vm2017_vm12 }
 0x68d   :  { %v6006_v5 = vadd.f32 3.0, %v5702_v46  ;;  %v6008_v6 = vadd.f32 1.0, %v1968_v52  ;;  %v2052_v9 = vand.u32 2147483648, %v5864_v60  ;;  %v6012_v26 = vadd.f32 3.0, %v5707_v49 }
 0x68e   :  { %4617 = vrcp.f32 %v5980_v41  ;;  %v2015_v37 = vadd.f32 %v5914_v30, %v2014_v50  ;;  %v2030_v19 = vadd.f32 %v5919_v36, %v2029_v51  ;;  %vm2032_vm15 = vweird.f32 %v5919_v36 }
 0x68f   :  { %v2073_v20 = vsub.f32 1.0, %v2072_v24  ;;  %v2045_v25 = vadd.f32 %v5931_v27, %v2044_v2  ;;  %vm2047_vm1 = vweird.f32 %v5931_v27  ;;  %vm2061_vm2 = vweird.f32 %v5903_v23  ;;  %vm6051_vm5 = vmor %vm2031_vm8, %vm2032_vm15 }
 0x690   :  { %v6030_v31 = vadd.f32 3.0, %v5724_v11  ;;  %v2004_v33 = vsel %vm6022_vm0, %v5907_v29, %v2000_v13  ;;  %vm6043_vm4 = vcmp.eq.f32.partialorder %v2050_v4, 8.507059e+37  ;;  %v2059_v38 = vmul.f32 %v5958_v15, %v2058_v48  ;;  %vm6070_vm6 = vmor %vm2046_vm9, %vm2047_vm1 }
 0x691   :  { %4619 = vrcp.f32 %v6006_v5  ;;  %v2053_v22 = vor.u32 1.1754944e-38, %v2052_v9  ;;  %v2065_v45 = vand.u32 2147483647, %v5903_v23  ;;  %v6057_v52 = vadd.f32 3.0, %v5777_v56 }
 0x692   :  { %4621 = vrcp.f32 %v6012_v26  ;;  %v2019_v50 = vsel %vm6039_vm3, %v5914_v30, %v2015_v37  ;;  %v2034_v54 = vsel %vm6051_vm5, %v5919_v36, %v2030_v19  ;;  %v2067_v24 = vand.u32 2147483648, %v5903_v23 }
 0x693   :  { %v2074_v2 = vmul.f32 %v5968_v14, %v2073_v20  ;;  %v2009_v30 = vsel %vm5984_vm10, %v2008_v62, %v2004_v33  ;;  %v2049_v36 = vsel %vm6070_vm6, %v5931_v27, %v2045_v25  ;;  %v6084_v4 = vadd.f32 3.0, %v5759_v39 }
 0x694   :  { %v6076_v13 = vpop.eup %4617  ;;  %4623 = vrcp.f32 %v6030_v31  ;;  %v2060_v60 = vadd.f32 %v5958_v15, %v2059_v38  ;;  %vm2062_vm7 = vweird.f32 %v5958_v15  ;;  %v2080_v48 = vand.u32 2147483647, %v5912_v3 }
 0x695   :  { %v2082_v9 = vand.u32 2147483648, %v5912_v3  ;;  %v2024_v62 = vsel %vm5996_vm13, %v2023_v44, %v2019_v50  ;;  %v2039_v28 = vsel %vm6000_vm14, %v2038_v55, %v2034_v54  ;;  %vm6095_vm8 = vcmp.eq.f32.partialorder %v2065_v45, 8.507059e+37  ;;  %vm6112_vm10 = vmor %vm2061_vm2, %vm2062_vm7 }
 0x696   :  { %4625 = vrcp.f32 %v6057_v52  ;;  %v2054_v19 = vsel %vm6043_vm4, %v2053_v22, %v2049_v36  ;;  %v2075_v20 = vadd.f32 %v5968_v14, %v2074_v2  ;;  %vm2077_vm9 = vweird.f32 %v5968_v14 }
 0x697   :  { %v6100_v37 = vpop.eup %4619  ;;  %v2099_v44 = vmul.f32 %v6076_v13, %v5980_v41  ;;  %v2010_v55 = vmul.f32 -1259.1392, %v2009_v30  ;;  %v2068_v63 = vor.u32 1.1754944e-38, %v2067_v24  ;;  %vm2076_vm11 = vweird.f32 %v5912_v3 }
 0x698   :  { %v6108_v47 = vpop.eup %4621  ;;  %4627 = vrcp.f32 %v6084_v4  ;;  %v2025_v25 = vmul.f32 -1259.1392, %v2024_v62  ;;  %v2064_v33 = vsel %vm6112_vm10, %v5958_v15, %v2060_v60  ;;  %vm6121_vm12 = vcmp.eq.f32.partialorder %v2080_v48, 8.507059e+37  ;;  %vm6129_vm13 = vmor %vm2076_vm11, %vm2077_vm9 }
 0x699   :  { %v2083_v35 = vor.u32 1.1754944e-38, %v2082_v9  ;;  %v2040_v38 = vmul.f32 -1259.1392, %v2039_v28  ;;  %v2055_v29 = vmul.f32 -1259.1392, %v2054_v19  ;;  %v6134_v22 = vadd.f32 %v2010_v55, %v5945_v61 }
 0x69a   :  { %v6125_v23 = vpop.eup %4623  ;;  %v2114_v15 = vmul.f32 %v6100_v37, %v6006_v5  ;;  %v2079_v45 = vsel %vm6129_vm13, %v5968_v14, %v2075_v20  ;;  %v2100_v50 = vsub.f32 1.0, %v2099_v44  ;;  %v2109_v54 = vand.u32 2147483648, %v5980_v41 }
 0x69b   :  { %v2129_v51 = vmul.f32 %v6108_v47, %v6012_v26  ;;  %v2069_v2 = vsel %vm6095_vm8, %v2068_v63, %v2064_v33  ;;  %v6149_v61 = vadd.f32 %v2025_v25, %v5960_v10  ;;  %v6152_v30 = vadd.f32 %v2040_v38, %v5962_v16 }
 0x69c   :  { %v6144_v24 = vpop.eup %4625  ;;  %v2144_v14 = vmul.f32 %v6125_v23, %v6030_v31  ;;  %v6157_v36 = vadd.f32 %v2055_v29, %v5964_v18  ;;  %vm2103_vm14 = vweird.f32 %v5980_v41  ;;  %v2107_v60 = vand.u32 2147483647, %v5980_v41 }
 0x69d   :  { %v2124_v48 = vand.u32 2147483648, %v6006_v5  ;;  %v2084_v10 = vsel %vm6121_vm12, %v2083_v35, %v2079_v45  ;;  %v2115_v62 = vsub.f32 1.0, %v2114_v15  ;;  %v2122_v16 = vand.u32 2147483647, %v6006_v5 }
 0x69e   :  { %v6162_v9 = vpop.eup %4627  ;;  %v2159_v28 = vmul.f32 %v6144_v24, %v6057_v52  ;;  %v2070_v27 = vmul.f32 -1259.1392, %v2069_v2  ;;  %v2101_v18 = vmul.f32 %v6076_v13, %v2100_v50  ;;  %v2110_v19 = vor.u32 1.1754944e-38, %v2109_v54 }
 0x69f   :  { %v2130_v20 = vsub.f32 1.0, %v2129_v51  ;;  %vm2118_vm15 = vweird.f32 %v6006_v5  ;;  %v2137_v44 = vand.u32 2147483647, %v6012_v26  ;;  %v2139_v55 = vand.u32 2147483648, %v6012_v26 }
 0x6a0   :  { %v2145_v1 = vsub.f32 1.0, %v2144_v14  ;;  %v2174_v63 = vmul.f32 %v6162_v9, %v6084_v4  ;;  %v2085_v25 = vmul.f32 -1259.1392, %v2084_v10  ;;  %v6176_v33 = vadd.f32 %v2070_v27, %v6008_v6 }
 0x6a1   :  { %v2125_v40 = vor.u32 1.1754944e-38, %v2124_v48  ;;  %vm2133_vm0 = vweird.f32 %v6012_v26  ;;  %v6180_v35 = vadd.f32 4.0, %v5720_v7  ;;  %vm6182_vm1 = vcmp.eq.f32.partialorder %v2107_v60, 8.507059e+37 }
 0x6a2   :  { %v2116_v29 = vmul.f32 %v6100_v37, %v2115_v62  ;;  %v2152_v3 = vand.u32 2147483647, %v6030_v31  ;;  %v2160_v15 = vsub.f32 1.0, %v2159_v28  ;;  %v6189_v45 = vadd.f32 4.0, %v5702_v46 }
 0x6a3   :  { %v2102_v6 = vadd.f32 %v6076_v13, %v2101_v18  ;;  %vm2104_vm2 = vweird.f32 %v6076_v13  ;;  %v2131_v50 = vmul.f32 %v6108_v47, %v2130_v20  ;;  %v2154_v54 = vand.u32 2147483648, %v6030_v31 }
 0x6a4   :  { %vm6195_vm3 = vcmp.eq.f32.partialorder %v2122_v16, 8.507059e+37  ;;  %v2140_v2 = vor.u32 1.1754944e-38, %v2139_v55  ;;  %v2146_v14 = vmul.f32 %v6125_v23, %v2145_v1  ;;  %vm2148_vm4 = vweird.f32 %v6030_v31  ;;  %vm6215_vm7 = vmor %vm2103_vm14, %vm2104_vm2 }
 0x6a5   :  { %v2175_v60 = vsub.f32 1.0, %v2174_v63  ;;  %v6202_v48 = vadd.f32 %v2085_v25, %v5982_v43  ;;  %vm2119_vm5 = vweird.f32 %v6100_v37  ;;  %vm6205_vm6 = vcmp.eq.f32.partialorder %v2137_v44, 8.507059e+37 }
 0x6a6   :  { %v6210_v62 = vadd.f32 4.0, %v5707_v49  ;;  %4629 = vrcp.f32 %v6180_v35  ;;  %v2117_v43 = vadd.f32 %v6100_v37, %v2116_v29  ;;  %vm6220_vm8 = vcmp.eq.f32.partialorder %v2152_v3, 8.507059e+37  ;;  %vm6242_vm12 = vmor %vm2118_vm15, %vm2119_vm5 }
 0x6a7   :  { %v2161_v27 = vmul.f32 %v6144_v24, %v2160_v15  ;;  %vm2163_vm9 = vweird.f32 %v6057_v52  ;;  %4631 = vrcp.f32 %v6189_v45  ;;  %v2106_v41 = vsel %vm6215_vm7, %v6076_v13, %v2102_v6 }
 0x6a8   :  { %v2132_v18 = vadd.f32 %v6108_v47, %v2131_v50  ;;  %vm2134_vm10 = vweird.f32 %v6108_v47  ;;  %v2155_v20 = vor.u32 1.1754944e-38, %v2154_v54  ;;  %v2147_v44 = vadd.f32 %v6125_v23, %v2146_v14 }
 0x6a9   :  { %vm2149_vm11 = vweird.f32 %v6125_v23  ;;  %v2176_v55 = vmul.f32 %v6162_v9, %v2175_v60  ;;  %v6236_v1 = vadd.f32 4.0, %v5724_v11  ;;  %v2167_v63 = vand.u32 2147483647, %v6057_v52  ;;  %vm6255_vm14 = vmor %vm2133_vm0, %vm2134_vm10 }
 0x6aa   :  { %v2169_v25 = vand.u32 2147483648, %v6057_v52  ;;  %vm2178_vm13 = vweird.f32 %v6084_v4  ;;  %4633 = vrcp.f32 %v6210_v62  ;;  %v2121_v29 = vsel %vm6242_vm12, %v6100_v37, %v2117_v43  ;;  %vm6275_vm0 = vmor %vm2148_vm4, %vm2149_vm11 }
 0x6ab   :  { %v2162_v3 = vadd.f32 %v6144_v24, %v2161_v27  ;;  %vm2164_vm15 = vweird.f32 %v6144_v24  ;;  %v6262_v15 = vadd.f32 4.0, %v5777_v56  ;;  %v2111_v50 = vsel %vm6182_vm1, %v2110_v19, %v2106_v41 }
 0x6ac   :  { %v6264_v6 = vpop.eup %4629  ;;  %v2136_v26 = vsel %vm6255_vm14, %v6108_v47, %v2132_v18  ;;  %v2182_v54 = vand.u32 2147483647, %v6084_v4  ;;  %v2184_v14 = vand.u32 2147483648, %v6084_v4  ;;  %v2151_v19 = vsel %vm6275_vm0, %v6125_v23, %v2147_v44  ;;  %vm6293_vm2 = vmor %vm2163_vm9, %vm2164_vm15 }
 0x6ad   :  { %v6281_v60 = vpop.eup %4631  ;;  %v2177_v47 = vadd.f32 %v6162_v9, %v2176_v55  ;;  %vm2179_vm1 = vweird.f32 %v6162_v9  ;;  %4635 = vrcp.f32 %v6236_v1  ;;  %v2126_v31 = vsel %vm6195_vm3, %v2125_v40, %v2121_v29 }
 0x6ae   :  { %vm6297_vm4 = vcmp.eq.f32.partialorder %v2167_v63, 8.507059e+37  ;;  %v2170_v23 = vor.u32 1.1754944e-38, %v2169_v25  ;;  %v6302_v43 = vadd.f32 4.0, %v5759_v39  ;;  %v2141_v27 = vsel %vm6205_vm6, %v2140_v2, %v2136_v26  ;;  %vm6318_vm3 = vmor %vm2178_vm13, %vm2179_vm1 }
 0x6af   :  { %v2166_v40 = vsel %vm6293_vm2, %v6144_v24, %v2162_v3  ;;  %v2201_v52 = vmul.f32 %v6264_v6, %v6180_v35  ;;  %4637 = vrcp.f32 %v6262_v15  ;;  %v2112_v41 = vmul.f32 771.3234, %v2111_v50 }
 0x6b0   :  { %v6312_v51 = vpop.eup %4633  ;;  %v2156_v18 = vsel %vm6220_vm8, %v2155_v20, %v2151_v19  ;;  %vm2183_vm5 = vcmp.eq.f32.partialorder %v2182_v54, 8.507059e+37  ;;  %v2216_v24 = vmul.f32 %v6281_v60, %v6189_v45  ;;  %v2127_v2 = vmul.f32 771.3234, %v2126_v31 }
 0x6b1   :  { %v2181_v44 = vsel %vm6318_vm3, %v6162_v9, %v2177_v47  ;;  %v2185_v55 = vor.u32 1.1754944e-38, %v2184_v14  ;;  %v2231_v28 = vmul.f32 %v6312_v51, %v6210_v62  ;;  %v2142_v20 = vmul.f32 771.3234, %v2141_v27 }
 0x6b2   :  { %v2171_v4 = vsel %vm6297_vm4, %v2170_v23, %v2166_v40  ;;  %v6332_v13 = vadd.f32 %v2112_v41, %v6134_v22  ;;  %4639 = vrcp.f32 %v6302_v43  ;;  %v2157_v25 = vmul.f32 771.3234, %v2156_v18 }
 0x6b3   :  { %v6335_v63 = vpop.eup %4635  ;;  %v6338_v29 = vadd.f32 %v2127_v2, %v6149_v61  ;;  %v2202_v9 = vsub.f32 1.0, %v2201_v52  ;;  %v2211_v5 = vand.u32 2147483648, %v6180_v35  ;;  %v2186_v3 = vsel %vm2183_vm5, %v2185_v55, %v2181_v44 }
 0x6b4   :  { %v6342_v50 = vadd.f32 %v2142_v20, %v6152_v30  ;;  %v2217_v26 = vsub.f32 1.0, %v2216_v24  ;;  %v2246_v22 = vmul.f32 %v6335_v63, %v6236_v1  ;;  %v2172_v54 = vmul.f32 771.3234, %v2171_v4 }
 0x6b5   :  { %v6346_v37 = vpop.eup %4637  ;;  %v6349_v14 = vadd.f32 %v2157_v25, %v6157_v36  ;;  %vm2205_vm6 = vweird.f32 %v6180_v35  ;;  %v2209_v61 = vand.u32 2147483647, %v6180_v35  ;;  %v2232_v19 = vsub.f32 1.0, %v2231_v28 }
 0x6b6   :  { %vm2220_vm7 = vweird.f32 %v6189_v45  ;;  %v2224_v30 = vand.u32 2147483647, %v6189_v45  ;;  %v2226_v47 = vand.u32 2147483648, %v6189_v45  ;;  %v2241_v31 = vand.u32 2147483648, %v6210_v62 }
 0x6b7   :  { %v2261_v38 = vmul.f32 %v6346_v37, %v6262_v15  ;;  %v2187_v16 = vmul.f32 771.3234, %v2186_v3  ;;  %v2203_v36 = vmul.f32 %v6264_v6, %v2202_v9  ;;  %v2212_v23 = vor.u32 1.1754944e-38, %v2211_v5 }
 0x6b8   :  { %v2239_v27 = vand.u32 2147483647, %v6210_v62  ;;  %v6361_v40 = vpop.eup %4639  ;;  %v6364_v52 = vadd.f32 %v2172_v54, %v6176_v33  ;;  %v2218_v41 = vmul.f32 %v6281_v60, %v2217_v26  ;;  %vm2235_vm8 = vweird.f32 %v6210_v62 }
 0x6b9   :  { %v2247_v18 = vsub.f32 1.0, %v2246_v22  ;;  %v2233_v10 = vmul.f32 %v6312_v51, %v2232_v19  ;;  %v2262_v24 = vsub.f32 1.0, %v2261_v38  ;;  %v2276_v2 = vmul.f32 %v6361_v40, %v6302_v43 }
 0x6ba   :  { %v6372_v44 = vadd.f32 5.0, %v5720_v7  ;;  %v6375_v55 = vadd.f32 %v2187_v16, %v6202_v48  ;;  %vm2206_vm9 = vweird.f32 %v6264_v6  ;;  %vm6378_vm10 = vcmp.eq.f32.partialorder %v2209_v61, 8.507059e+37 }
 0x6bb   :  { %vm6382_vm11 = vcmp.eq.f32.partialorder %v2224_v30, 8.507059e+37  ;;  %v2227_v20 = vor.u32 1.1754944e-38, %v2226_v47  ;;  %v2242_v4 = vor.u32 1.1754944e-38, %v2241_v31  ;;  %v2204_v25 = vadd.f32 %v6264_v6, %v2203_v36  ;;  %vm6407_vm0 = vmor %vm2205_vm6, %vm2206_vm9 }
 0x6bc   :  { %vm6387_vm12 = vcmp.eq.f32.partialorder %v2239_v27, 8.507059e+37  ;;  %vm2250_vm13 = vweird.f32 %v6236_v1  ;;  %v2254_v48 = vand.u32 2147483647, %v6236_v1  ;;  %v6394_v5 = vadd.f32 5.0, %v5702_v46 }
 0x6bd   :  { %v2219_v3 = vadd.f32 %v6281_v60, %v2218_v41  ;;  %vm2221_vm14 = vweird.f32 %v6281_v60  ;;  %vm2236_vm15 = vweird.f32 %v6312_v51  ;;  %v2248_v26 = vmul.f32 %v6335_v63, %v2247_v18 }
 0x6be   :  { %v2234_v22 = vadd.f32 %v6312_v51, %v2233_v10  ;;  %v2263_v54 = vmul.f32 %v6346_v37, %v2262_v24  ;;  %v2277_v61 = vsub.f32 1.0, %v2276_v2  ;;  %4641 = vrcp.f32 %v6372_v44  ;;  %vm6422_vm2 = vmor %vm2220_vm7, %vm2221_vm14 }
 0x6bf   :  { %v2256_v30 = vand.u32 2147483648, %v6236_v1  ;;  %vm2265_vm1 = vweird.f32 %v6262_v15  ;;  %v2269_v47 = vand.u32 2147483647, %v6262_v15  ;;  %v6415_v31 = vadd.f32 5.0, %v5707_v49  ;;  %vm6439_vm3 = vmor %vm2235_vm8, %vm2236_vm15 }
 0x6c0   :  { %v2208_v38 = vsel %vm6407_vm0, %v6264_v6, %v2204_v25  ;;  %vm6426_vm4 = vcmp.eq.f32.partialorder %v2254_v48, 8.507059e+37  ;;  %v2271_v36 = vand.u32 2147483648, %v6262_v15  ;;  %4643 = vrcp.f32 %v6394_v5 }
 0x6c1   :  { %v2223_v27 = vsel %vm6422_vm2, %v6281_v60, %v2219_v3  ;;  %v2249_v6 = vadd.f32 %v6335_v63, %v2248_v26  ;;  %vm2251_vm5 = vweird.f32 %v6335_v63  ;;  %v6446_v41 = vadd.f32 5.0, %v5724_v11 }
 0x6c2   :  { %v2238_v18 = vsel %vm6439_vm3, %v6312_v51, %v2234_v22  ;;  %v2264_v60 = vadd.f32 %v6346_v37, %v2263_v54  ;;  %vm2266_vm6 = vweird.f32 %v6346_v37  ;;  %v2278_v62 = vmul.f32 %v6361_v40, %v2277_v61  ;;  %vm6465_vm7 = vmor %vm2250_vm13, %vm2251_vm5 }
 0x6c3   :  { %v2257_v10 = vor.u32 1.1754944e-38, %v2256_v30  ;;  %v2284_v24 = vand.u32 2147483647, %v6302_v43  ;;  %v2286_v2 = vand.u32 2147483648, %v6302_v43  ;;  %4645 = vrcp.f32 %v6415_v31  ;;  %vm6483_vm9 = vmor %vm2265_vm1, %vm2266_vm6 }
 0x6c4   :  { %v6457_v25 = vpop.eup %4641  ;;  %v2213_v48 = vsel %vm6378_vm10, %v2212_v23, %v2208_v38  ;;  %v2228_v51 = vsel %vm6382_vm11, %v2227_v20, %v2223_v27  ;;  %vm6469_vm8 = vcmp.eq.f32.partialorder %v2269_v47, 8.507059e+37  ;;  %v6474_v22 = vadd.f32 5.0, %v5777_v56 }
 0x6c5   :  { %v2243_v33 = vsel %vm6387_vm12, %v2242_v4, %v2238_v18  ;;  %v2253_v23 = vsel %vm6465_vm7, %v6335_v63, %v2249_v6  ;;  %vm2281_vm10 = vweird.f32 %v6361_v40  ;;  %4647 = vrcp.f32 %v6446_v41 }
 0x6c6   :  { %v6489_v28 = vpop.eup %4643  ;;  %v2268_v20 = vsel %vm6483_vm9, %v6346_v37, %v2264_v60  ;;  %v2279_v4 = vadd.f32 %v6361_v40, %v2278_v62  ;;  %v6496_v63 = vadd.f32 5.0, %v5759_v39  ;;  %v2303_v15 = vmul.f32 %v6457_v25, %v6372_v44 }
 0x6c7   :  { %v2272_v9 = vor.u32 1.1754944e-38, %v2271_v36  ;;  %vm2280_vm11 = vweird.f32 %v6302_v43  ;;  %vm6501_vm12 = vcmp.eq.f32.partialorder %v2284_v24, 8.507059e+37  ;;  %v2287_v61 = vor.u32 1.1754944e-38, %v2286_v2 }
 0x6c8   :  { %v2214_v19 = vmul.f32 -176.61504, %v2213_v48  ;;  %v2258_v37 = vsel %vm6426_vm4, %v2257_v10, %v2253_v23  ;;  %v2318_v30 = vmul.f32 %v6489_v28, %v6394_v5  ;;  %4649 = vrcp.f32 %v6474_v22  ;;  %vm6516_vm13 = vmor %vm2280_vm11, %vm2281_vm10 }
 0x6c9   :  { %v6510_v47 = vpop.eup %4645  ;;  %v2229_v38 = vmul.f32 -176.61504, %v2228_v51  ;;  %v2244_v35 = vmul.f32 -176.61504, %v2243_v33  ;;  %v2273_v43 = vsel %vm6469_vm8, %v2272_v9, %v2268_v20  ;;  %v2313_v16 = vand.u32 2147483648, %v6372_v44 }
 0x6ca   :  { %v2283_v27 = vsel %vm6516_vm13, %v6361_v40, %v2279_v4  ;;  %v2304_v45 = vsub.f32 1.0, %v2303_v15  ;;  %v2333_v6 = vmul.f32 %v6510_v47, %v6415_v31  ;;  %4651 = vrcp.f32 %v6496_v63 }
 0x6cb   :  { %v6527_v18 = vpop.eup %4647  ;;  %v2259_v60 = vmul.f32 -176.61504, %v2258_v37  ;;  %v6530_v62 = vadd.f32 %v2214_v19, %v6332_v13  ;;  %v6533_v10 = vadd.f32 %v2229_v38, %v6338_v29  ;;  %v6536_v24 = vadd.f32 %v2244_v35, %v6342_v50 }
 0x6cc   :  { %vm2307_vm14 = vweird.f32 %v6372_v44  ;;  %v2319_v40 = vsub.f32 1.0, %v2318_v30  ;;  %v2328_v2 = vand.u32 2147483648, %v6394_v5  ;;  %v2348_v48 = vmul.f32 %v6527_v18, %v6446_v41 }
 0x6cd   :  { %v2274_v51 = vmul.f32 -176.61504, %v2273_v43  ;;  %v2288_v3 = vsel %vm6501_vm12, %v2287_v61, %v2283_v27  ;;  %v6545_v13 = vadd.f32 %v2259_v60, %v6349_v14  ;;  %v2311_v29 = vand.u32 2147483647, %v6372_v44 }
 0x6ce   :  { %v6548_v26 = vpop.eup %4649  ;;  %v2305_v50 = vmul.f32 %v6457_v25, %v2304_v45  ;;  %v2314_v33 = vor.u32 1.1754944e-38, %v2313_v16  ;;  %vm2322_vm15 = vweird.f32 %v6394_v5  ;;  %v2334_v23 = vsub.f32 1.0, %v2333_v6 }
 0x6cf   :  { %v6553_v1 = vadd.f32 %v2274_v51, %v6364_v52  ;;  %v2326_v20 = vand.u32 2147483647, %v6394_v5  ;;  %v2349_v4 = vsub.f32 1.0, %v2348_v48  ;;  %v2363_v14 = vmul.f32 %v6548_v26, %v6474_v22 }
 0x6d0   :  { %v6558_v15 = vpop.eup %4651  ;;  %v2289_v9 = vmul.f32 -176.61504, %v2288_v3  ;;  %v2320_v54 = vmul.f32 %v6489_v28, %v2319_v40  ;;  %v2329_v61 = vor.u32 1.1754944e-38, %v2328_v2  ;;  %vm2337_vm0 = vweird.f32 %v6415_v31 }
 0x6d1   :  { %v2343_v19 = vand.u32 2147483648, %v6415_v31  ;;  %vm6563_vm1 = vcmp.eq.f32.partialorder %v2311_v29, 8.507059e+37  ;;  %v2341_v52 = vand.u32 2147483647, %v6415_v31  ;;  %v2356_v30 = vand.u32 2147483647, %v6446_v41 }
 0x6d2   :  { %v2364_v38 = vsub.f32 1.0, %v2363_v14  ;;  %v2378_v35 = vmul.f32 %v6558_v15, %v6496_v63  ;;  %v6572_v43 = vadd.f32 %v2289_v9, %v6375_v55  ;;  %v2306_v36 = vadd.f32 %v6457_v25, %v2305_v50 }
 0x6d3   :  { %vm2308_vm2 = vweird.f32 %v6457_v25  ;;  %v2335_v16 = vmul.f32 %v6510_v47, %v2334_v23  ;;  %vm6577_vm4 = vcmp.eq.f32.partialorder %v2326_v20, 8.507059e+37  ;;  %v2350_v45 = vmul.f32 %v6527_v18, %v2349_v4 }
 0x6d4   :  { %vm2352_vm3 = vweird.f32 %v6446_v41  ;;  %v2379_v6 = vsub.f32 1.0, %v2378_v35  ;;  %v6584_v60 = vadd.f32 6.0, %v5720_v7  ;;  %v2321_v55 = vadd.f32 %v6489_v28, %v2320_v54  ;;  %vm6591_vm6 = vmor %vm2307_vm14, %vm2308_vm2 }
 0x6d5   :  { %vm2323_vm5 = vweird.f32 %v6489_v28  ;;  %v2344_v40 = vor.u32 1.1754944e-38, %v2343_v19  ;;  %v2358_v2 = vand.u32 2147483648, %v6446_v41  ;;  %vm6595_vm7 = vcmp.eq.f32.partialorder %v2341_v52, 8.507059e+37 }
 0x6d6   :  { %vm6599_vm8 = vcmp.eq.f32.partialorder %v2356_v30, 8.507059e+37  ;;  %v2365_v29 = vmul.f32 %v6548_v26, %v2364_v38  ;;  %vm2367_vm9 = vweird.f32 %v6474_v22  ;;  %v2371_v50 = vand.u32 2147483647, %v6474_v22  ;;  %vm6617_vm12 = vmor %vm2322_vm15, %vm2323_vm5 }
 0x6d7   :  { %v6607_v44 = vadd.f32 6.0, %v5702_v46  ;;  %v2310_v23 = vsel %vm6591_vm6, %v6457_v25, %v2306_v36  ;;  %v2336_v20 = vadd.f32 %v6510_v47, %v2335_v16  ;;  %vm2338_vm10 = vweird.f32 %v6510_v47 }
 0x6d8   :  { %vm2353_vm11 = vweird.f32 %v6527_v18  ;;  %v2351_v14 = vadd.f32 %v6527_v18, %v2350_v45  ;;  %v2380_v9 = vmul.f32 %v6558_v15, %v2379_v6  ;;  %v6624_v54 = vadd.f32 6.0, %v5707_v49  ;;  %vm6634_vm13 = vmor %vm2337_vm0, %vm2338_vm10 }
 0x6d9   :  { %4653 = vrcp.f32 %v6584_v60  ;;  %v2325_v25 = vsel %vm6617_vm12, %v6489_v28, %v2321_v55  ;;  %v2359_v19 = vor.u32 1.1754944e-38, %v2358_v2  ;;  %v2373_v5 = vand.u32 2147483648, %v6474_v22  ;;  %vm6653_vm15 = vmor %vm2352_vm3, %vm2353_vm11 }
 0x6da   :  { %v2386_v52 = vand.u32 2147483647, %v6496_v63  ;;  %v2366_v38 = vadd.f32 %v6548_v26, %v2365_v29  ;;  %vm2368_vm14 = vweird.f32 %v6548_v26  ;;  %v6641_v35 = vadd.f32 6.0, %v5724_v11 }
 0x6db   :  { %4655 = vrcp.f32 %v6607_v44  ;;  %v2315_v28 = vsel %vm6563_vm1, %v2314_v33, %v2310_v23  ;;  %v2340_v31 = vsel %vm6634_vm13, %v6510_v47, %v2336_v20  ;;  %vm2383_vm0 = vweird.f32 %v6558_v15  ;;  %vm6671_vm1 = vmor %vm2367_vm9, %vm2368_vm14 }
 0x6dc   :  { %v2388_v16 = vand.u32 2147483648, %v6496_v63  ;;  %v2355_v33 = vsel %vm6653_vm15, %v6527_v18, %v2351_v14  ;;  %v2381_v37 = vadd.f32 %v6558_v15, %v2380_v9  ;;  %v6664_v47 = vadd.f32 6.0, %v5777_v56 }
 0x6dd   :  { %4657 = vrcp.f32 %v6624_v54  ;;  %v2330_v41 = vsel %vm6577_vm4, %v2329_v61, %v2325_v25  ;;  %vm6675_vm2 = vcmp.eq.f32.partialorder %v2371_v50, 8.507059e+37  ;;  %v2374_v18 = vor.u32 1.1754944e-38, %v2373_v5 }
 0x6de   :  { %vm2382_vm3 = vweird.f32 %v6496_v63  ;;  %v2316_v2 = vmul.f32 12.507343, %v2315_v28  ;;  %v2370_v61 = vsel %vm6671_vm1, %v6548_v26, %v2366_v38  ;;  %v6686_v22 = vadd.f32 6.0, %v5759_v39 }
 0x6df   :  { %v6680_v55 = vpop.eup %4653  ;;  %4659 = vrcp.f32 %v6641_v35  ;;  %v2345_v27 = vsel %vm6595_vm7, %v2344_v40, %v2340_v31  ;;  %v2360_v48 = vsel %vm6599_vm8, %v2359_v19, %v2355_v33  ;;  %vm6695_vm4 = vmor %vm2382_vm3, %vm2383_vm0  ;;  %vm6699_vm5 = vcmp.eq.f32.partialorder %v2386_v52, 8.507059e+37 }
 0x6e0   :  { %v2405_v26 = vmul.f32 %v6680_v55, %v6584_v60  ;;  %v2331_v51 = vmul.f32 12.507343, %v2330_v41  ;;  %v2385_v40 = vsel %vm6695_vm4, %v6558_v15, %v2381_v37  ;;  %v2389_v3 = vor.u32 1.1754944e-38, %v2388_v16 }
 0x6e1   :  { %v6705_v50 = vpop.eup %4655  ;;  %4661 = vrcp.f32 %v6664_v47  ;;  %v2375_v23 = vsel %vm6675_vm2, %v2374_v18, %v2370_v61  ;;  %v6714_v20 = vadd.f32 %v2316_v2, %v6530_v62  ;;  %v2346_v25 = vmul.f32 12.507343, %v2345_v27 }
 0x6e2   :  { %v2406_v4 = vsub.f32 1.0, %v2405_v26  ;;  %v2420_v14 = vmul.f32 %v6705_v50, %v6607_v44  ;;  %v2361_v19 = vmul.f32 12.507343, %v2360_v48  ;;  %v2415_v5 = vand.u32 2147483648, %v6584_v60 }
 0x6e3   :  { %v6718_v9 = vpop.eup %4657  ;;  %4663 = vrcp.f32 %v6686_v22  ;;  %v2390_v15 = vsel %vm6699_vm5, %v2389_v3, %v2385_v40  ;;  %v6725_v52 = vadd.f32 %v2331_v51, %v6533_v10  ;;  %v2413_v62 = vand.u32 2147483647, %v6584_v60 }
 0x6e4   :  { %v2435_v30 = vmul.f32 %v6718_v9, %v6624_v54  ;;  %v2376_v28 = vmul.f32 12.507343, %v2375_v23  ;;  %v6733_v31 = vadd.f32 %v2346_v25, %v6536_v24  ;;  %v6736_v36 = vadd.f32 %v2361_v19, %v6545_v13 }
 0x6e5   :  { %v6730_v38 = vpop.eup %4659  ;;  %vm2409_vm6 = vweird.f32 %v6584_v60  ;;  %v2407_v16 = vmul.f32 %v6680_v55, %v2406_v4  ;;  %v2421_v10 = vsub.f32 1.0, %v2420_v14  ;;  %v2391_v45 = vmul.f32 12.507343, %v2390_v15 }
 0x6e6   :  { %v2436_v33 = vsub.f32 1.0, %v2435_v30  ;;  %v2450_v37 = vmul.f32 %v6730_v38, %v6641_v35  ;;  %v2416_v6 = vor.u32 1.1754944e-38, %v2415_v5  ;;  %vm2424_vm7 = vweird.f32 %v6607_v44 }
 0x6e7   :  { %v6742_v41 = vpop.eup %4661  ;;  %v2430_v24 = vand.u32 2147483648, %v6607_v44  ;;  %v6747_v13 = vadd.f32 %v2376_v28, %v6553_v1  ;;  %vm6749_vm8 = vcmp.eq.f32.partialorder %v2413_v62, 8.507059e+37  ;;  %v2428_v2 = vand.u32 2147483647, %v6607_v44 }
 0x6e8   :  { %vm2439_vm9 = vweird.f32 %v6624_v54  ;;  %v2445_v61 = vand.u32 2147483648, %v6624_v54  ;;  %v6759_v48 = vadd.f32 %v2391_v45, %v6572_v43  ;;  %v2443_v63 = vand.u32 2147483647, %v6624_v54 }
 0x6e9   :  { %v6756_v27 = vpop.eup %4663  ;;  %v2451_v29 = vsub.f32 1.0, %v2450_v37  ;;  %v2465_v1 = vmul.f32 %v6742_v41, %v6664_v47  ;;  %v2408_v26 = vadd.f32 %v6680_v55, %v2407_v16  ;;  %vm2410_vm10 = vweird.f32 %v6680_v55 }
 0x6ea   :  { %v2422_v51 = vmul.f32 %v6705_v50, %v2421_v10  ;;  %v2437_v40 = vmul.f32 %v6718_v9, %v2436_v33  ;;  %v2431_v3 = vor.u32 1.1754944e-38, %v2430_v24  ;;  %vm2454_vm11 = vweird.f32 %v6641_v35  ;;  %vm6780_vm14 = vmor %vm2409_vm6, %vm2410_vm10 }
 0x6eb   :  { %v2466_v23 = vsub.f32 1.0, %v2465_v1  ;;  %v2480_v43 = vmul.f32 %v6756_v27, %v6686_v22  ;;  %vm6771_vm12 = vcmp.eq.f32.partialorder %v2428_v2, 8.507059e+37  ;;  %v2446_v14 = vor.u32 1.1754944e-38, %v2445_v61 }
 0x6ec   :  { %v2458_v25 = vand.u32 2147483647, %v6641_v35  ;;  %v2460_v19 = vand.u32 2147483648, %v6641_v35  ;;  %vm2469_vm13 = vweird.f32 %v6664_v47  ;;  %vm2425_vm15 = vweird.f32 %v6705_v50 }
 0x6ed   :  { %vm6785_vm0 = vcmp.eq.f32.partialorder %v2443_v63, 8.507059e+37  ;;  %v2452_v62 = vmul.f32 %v6730_v38, %v2451_v29  ;;  %v2481_v30 = vsub.f32 1.0, %v2480_v43  ;;  %v6791_v28 = vadd.f32 7.0, %v5720_v7  ;;  %vm6807_vm2 = vmor %vm2424_vm7, %vm2425_vm15 }
 0x6ee   :  { %v2412_v60 = vsel %vm6780_vm14, %v6680_v55, %v2408_v26  ;;  %v2423_v16 = vadd.f32 %v6705_v50, %v2422_v51  ;;  %v2438_v10 = vadd.f32 %v6718_v9, %v2437_v40  ;;  %vm2440_vm1 = vweird.f32 %v6718_v9 }
 0x6ef   :  { %v2467_v33 = vmul.f32 %v6742_v41, %v2466_v23  ;;  %v2473_v37 = vand.u32 2147483647, %v6664_v47  ;;  %v2482_v45 = vmul.f32 %v6756_v27, %v2481_v30  ;;  %v6803_v24 = vadd.f32 7.0, %v5702_v46  ;;  %vm6822_vm5 = vmor %vm2439_vm9, %vm2440_vm1 }
 0x6f0   :  { %vm2455_vm3 = vweird.f32 %v6730_v38  ;;  %vm6812_vm4 = vcmp.eq.f32.partialorder %v2458_v25, 8.507059e+37  ;;  %v2475_v61 = vand.u32 2147483648, %v6664_v47  ;;  %v2488_v63 = vand.u32 2147483647, %v6686_v22 }
 0x6f1   :  { %v2417_v29 = vsel %vm6749_vm8, %v2416_v6, %v2412_v60  ;;  %v2453_v1 = vadd.f32 %v6730_v38, %v2452_v62  ;;  %v6828_v26 = vadd.f32 7.0, %v5707_v49  ;;  %4665 = vrcp.f32 %v6791_v28  ;;  %vm6849_vm8 = vmor %vm2454_vm11, %vm2455_vm3 }
 0x6f2   :  { %v2427_v51 = vsel %vm6807_vm2, %v6705_v50, %v2423_v16  ;;  %v2442_v6 = vsel %vm6822_vm5, %v6718_v9, %v2438_v10  ;;  %vm2470_vm6 = vweird.f32 %v6742_v41  ;;  %vm2485_vm7 = vweird.f32 %v6756_v27 }
 0x6f3   :  { %v2468_v54 = vadd.f32 %v6742_v41, %v2467_v33  ;;  %v2483_v18 = vadd.f32 %v6756_v27, %v2482_v45  ;;  %v6842_v40 = vadd.f32 7.0, %v5724_v11  ;;  %4667 = vrcp.f32 %v6803_v24  ;;  %vm6866_vm11 = vmor %vm2469_vm13, %vm2470_vm6 }
 0x6f4   :  { %v2461_v9 = vor.u32 1.1754944e-38, %v2460_v19  ;;  %vm6853_vm9 = vcmp.eq.f32.partialorder %v2473_v37, 8.507059e+37  ;;  %vm2484_vm10 = vweird.f32 %v6686_v22  ;;  %v2490_v43 = vand.u32 2147483648, %v6686_v22 }
 0x6f5   :  { %v2432_v25 = vsel %vm6771_vm12, %v2431_v3, %v2427_v51  ;;  %v2457_v35 = vsel %vm6849_vm8, %v6730_v38, %v2453_v1  ;;  %v6871_v19 = vadd.f32 7.0, %v5777_v56  ;;  %4669 = vrcp.f32 %v6828_v26  ;;  %vm6878_vm12 = vmor %vm2484_vm10, %vm2485_vm7 }
 0x6f6   :  { %v2418_v62 = vmul.f32 -0.1385711, %v2417_v29  ;;  %v2447_v22 = vsel %vm6785_vm0, %v2446_v14, %v2442_v6  ;;  %v2476_v3 = vor.u32 1.1754944e-38, %v2475_v61  ;;  %vm6882_vm13 = vcmp.eq.f32.partialorder %v2488_v63, 8.507059e+37 }
 0x6f7   :  { %v6886_v4 = vpop.eup %4665  ;;  %v2472_v30 = vsel %vm6866_vm11, %v6742_v41, %v2468_v54  ;;  %v2487_v14 = vsel %vm6878_vm12, %v6756_v27, %v2483_v18  ;;  %v6895_v15 = vadd.f32 7.0, %v5759_v39  ;;  %4671 = vrcp.f32 %v6842_v40 }
 0x6f8   :  { %v2433_v60 = vmul.f32 -0.1385711, %v2432_v25  ;;  %v2462_v16 = vsel %vm6812_vm4, %v2461_v9, %v2457_v35  ;;  %v2491_v10 = vor.u32 1.1754944e-38, %v2490_v43  ;;  %v2507_v33 = vmul.f32 %v6886_v4, %v6791_v28 }
 0x6f9   :  { %v6902_v37 = vpop.eup %4667  ;;  %v2448_v41 = vmul.f32 -0.1385711, %v2447_v22  ;;  %v6905_v45 = vadd.f32 %v2418_v62, %v6714_v20  ;;  %v2517_v27 = vand.u32 2147483648, %v6791_v28  ;;  %4673 = vrcp.f32 %v6871_v19 }
 0x6fa   :  { %v2477_v2 = vsel %vm6853_vm9, %v2476_v3, %v2472_v30  ;;  %v2492_v55 = vsel %vm6882_vm13, %v2491_v10, %v2487_v14  ;;  %v6914_v61 = vadd.f32 %v2433_v60, %v6725_v52  ;;  %v2522_v63 = vmul.f32 %v6902_v37, %v6803_v24 }
 0x6fb   :  { %v6918_v29 = vpop.eup %4669  ;;  %v2463_v20 = vmul.f32 -0.1385711, %v2462_v16  ;;  %v6921_v44 = vadd.f32 %v2448_v41, %v6733_v31  ;;  %v2515_v1 = vand.u32 2147483647, %v6791_v28  ;;  %4675 = vrcp.f32 %v6895_v15 }
 0x6fc   :  { %v2508_v51 = vsub.f32 1.0, %v2507_v33  ;;  %v2523_v6 = vsub.f32 1.0, %v2522_v63  ;;  %v2532_v54 = vand.u32 2147483648, %v6803_v24  ;;  %v2537_v52 = vmul.f32 %v6918_v29, %v6828_v26 }
 0x6fd   :  { %v6928_v18 = vpop.eup %4671  ;;  %v2478_v50 = vmul.f32 -0.1385711, %v2477_v2  ;;  %v2493_v9 = vmul.f32 -0.1385711, %v2492_v55  ;;  %v6931_v23 = vadd.f32 %v2463_v20, %v6736_v36  ;;  %vm2511_vm14 = vweird.f32 %v6791_v28 }
 0x6fe   :  { %v6934_v31 = vor.u32 1.1754944e-38, %v2517_v27  ;;  %vm2526_vm15 = vweird.f32 %v6803_v24  ;;  %v2530_v43 = vand.u32 2147483647, %v6803_v24  ;;  %v2538_v25 = vsub.f32 1.0, %v2537_v52 }
 0x6ff   :  { %v2547_v35 = vand.u32 2147483648, %v6828_v26  ;;  %v2552_v5 = vmul.f32 %v6928_v18, %v6842_v40  ;;  %v6941_v62 = vpop.eup %4673  ;;  %v6944_v22 = vadd.f32 %v2478_v50, %v6747_v13  ;;  %v6947_v36 = vadd.f32 %v2493_v9, %v6759_v48 }
 0x700   :  { %vm2541_vm0 = vweird.f32 %v6828_v26  ;;  %v2545_v3 = vand.u32 2147483647, %v6828_v26  ;;  %v2509_v38 = vmul.f32 %v6886_v4, %v2508_v51  ;;  %v2524_v47 = vmul.f32 %v6902_v37, %v2523_v6 }
 0x701   :  { %v2533_v30 = vor.u32 1.1754944e-38, %v2532_v54  ;;  %v2553_v14 = vsub.f32 1.0, %v2552_v5  ;;  %v6953_v60 = vpop.eup %4675  ;;  %vm2512_vm1 = vweird.f32 %v6886_v4  ;;  %v2539_v13 = vmul.f32 %v6918_v29, %v2538_v25 }
 0x702   :  { %vm2556_vm2 = vweird.f32 %v6842_v40  ;;  %v2567_v48 = vmul.f32 %v6941_v62, %v6871_v19  ;;  %vm6960_vm3 = vcmp.eq.f32.partialorder %v2515_v1, 8.507059e+37  ;;  %vm6964_vm4 = vcmp.eq.f32.partialorder %v2530_v43, 8.507059e+37  ;;  %vm6992_vm9 = vmor %vm2511_vm14, %vm2512_vm1 }
 0x703   :  { %v2548_v33 = vor.u32 1.1754944e-38, %v2547_v35  ;;  %v2554_v41 = vmul.f32 %v6928_v18, %v2553_v14  ;;  %v2560_v27 = vand.u32 2147483647, %v6842_v40  ;;  %v2562_v2 = vand.u32 2147483648, %v6842_v40 }
 0x704   :  { %vm6971_vm5 = vcmp.eq.f32.partialorder %v2545_v3, 8.507059e+37  ;;  %v2568_v63 = vsub.f32 1.0, %v2567_v48  ;;  %vm2571_vm6 = vweird.f32 %v6871_v19  ;;  %v2575_v20 = vand.u32 2147483647, %v6871_v19 }
 0x705   :  { %v2582_v1 = vmul.f32 %v6953_v60, %v6895_v15  ;;  %v2510_v51 = vadd.f32 %v6886_v4, %v2509_v38  ;;  %v2525_v6 = vadd.f32 %v6902_v37, %v2524_v47  ;;  %vm2527_vm7 = vweird.f32 %v6902_v37 }
 0x706   :  { %vm2542_vm8 = vweird.f32 %v6918_v29  ;;  %v2540_v54 = vadd.f32 %v6918_v29, %v2539_v13  ;;  %v2569_v52 = vmul.f32 %v6941_v62, %v2568_v63  ;;  %v6986_v9 = vadd.f32 8.0, %v5720_v7  ;;  %vm7004_vm12 = vmor %vm2526_vm15, %vm2527_vm7 }
 0x707   :  { %v2583_v50 = vsub.f32 1.0, %v2582_v1  ;;  %v2555_v25 = vadd.f32 %v6928_v18, %v2554_v41  ;;  %vm2557_vm10 = vweird.f32 %v6928_v18  ;;  %vm6998_vm11 = vcmp.eq.f32.partialorder %v2560_v27, 8.507059e+37  ;;  %vm7027_vm14 = vmor %vm2541_vm0, %vm2542_vm8 }
 0x708   :  { %v2563_v5 = vor.u32 1.1754944e-38, %v2562_v2  ;;  %vm7008_vm13 = vcmp.eq.f32.partialorder %v2575_v20, 8.507059e+37  ;;  %v2577_v38 = vand.u32 2147483648, %v6871_v19  ;;  %v7015_v14 = vadd.f32 8.0, %v5702_v46  ;;  %vm7038_vm1 = vmor %vm2556_vm2, %vm2557_vm10 }
 0x709   :  { %v2584_v47 = vmul.f32 %v6953_v60, %v2583_v50  ;;  %v2514_v13 = vsel %vm6992_vm9, %v6886_v4, %v2510_v51  ;;  %v2529_v24 = vsel %vm7004_vm12, %v6902_v37, %v2525_v6  ;;  %vm2572_vm15 = vweird.f32 %v6941_v62 }
 0x70a   :  { %v2590_v41 = vand.u32 2147483647, %v6895_v15  ;;  %v2544_v4 = vsel %vm7027_vm14, %v6918_v29, %v2540_v54  ;;  %v2570_v26 = vadd.f32 %v6941_v62, %v2569_v52  ;;  %v7044_v27 = vadd.f32 8.0, %v5707_v49  ;;  %vm7068_vm2 = vmor %vm2571_vm6, %vm2572_vm15 }
 0x70b   :  { %4677 = vrcp.f32 %v6986_v9  ;;  %v2559_v2 = vsel %vm7038_vm1, %v6928_v18, %v2555_v25  ;;  %v2585_v63 = vadd.f32 %v6953_v60, %v2584_v47  ;;  %vm2587_vm0 = vweird.f32 %v6953_v60 }
 0x70c   :  { %v2592_v40 = vand.u32 2147483648, %v6895_v15  ;;  %v2519_v29 = vsel %vm6960_vm3, %v6934_v31, %v2514_v13  ;;  %v2534_v20 = vsel %vm6964_vm4, %v2533_v30, %v2529_v24  ;;  %v7059_v1 = vadd.f32 8.0, %v5724_v11 }
 0x70d   :  { %4679 = vrcp.f32 %v7015_v14  ;;  %v2549_v18 = vsel %vm6971_vm5, %v2548_v33, %v2544_v4  ;;  %v2578_v31 = vor.u32 1.1754944e-38, %v2577_v38  ;;  %vm2586_vm3 = vweird.f32 %v6895_v15 }
 0x70e   :  { %vm7073_vm4 = vcmp.eq.f32.partialorder %v2590_v41, 8.507059e+37  ;;  %v2564_v16 = vsel %vm6998_vm11, %v2563_v5, %v2559_v2  ;;  %v2574_v10 = vsel %vm7068_vm2, %v6941_v62, %v2570_v26  ;;  %vm7082_vm5 = vmor %vm2586_vm3, %vm2587_vm0  ;;  %v7087_v33 = vadd.f32 8.0, %v5777_v56 }
 0x70f   :  { %4681 = vrcp.f32 %v7044_v27  ;;  %v2520_v15 = vmul.f32 9.984369e-06, %v2519_v29  ;;  %v2535_v55 = vmul.f32 9.984369e-06, %v2534_v20  ;;  %v2589_v6 = vsel %vm7082_vm5, %v6953_v60, %v2585_v63 }
 0x710   :  { %v2593_v54 = vor.u32 1.1754944e-38, %v2592_v40  ;;  %v2550_v50 = vmul.f32 9.984369e-06, %v2549_v18  ;;  %v7096_v62 = vadd.f32 8.0, %v5759_v39  ;;  %v2619_v43 = vand.u32 2147483648, %v6986_v9 }
 0x711   :  { %v7093_v52 = vpop.eup %4677  ;;  %4683 = vrcp.f32 %v7059_v1  ;;  %v2565_v25 = vmul.f32 9.984369e-06, %v2564_v16  ;;  %v2579_v35 = vsel %vm7008_vm13, %v2578_v31, %v2574_v10  ;;  %v7103_v5 = vadd.f32 %v2520_v15, %v6905_v45 }
 0x712   :  { %v2609_v60 = vmul.f32 %v7093_v52, %v6986_v9  ;;  %v2594_v38 = vsel %vm7073_vm4, %v2593_v54, %v2589_v6  ;;  %v7112_v47 = vadd.f32 %v2535_v55, %v6914_v61  ;;  %v7115_v13 = vadd.f32 %v2550_v50, %v6921_v44 }
 0x713   :  { %v7107_v3 = vpop.eup %4679  ;;  %4685 = vrcp.f32 %v7087_v33  ;;  %v7119_v28 = vadd.f32 %v2565_v25, %v6931_v23  ;;  %v2617_v24 = vand.u32 2147483647, %v6986_v9  ;;  %v2580_v4 = vmul.f32 9.984369e-06, %v2579_v35 }
 0x714   :  { %v2610_v45 = vsub.f32 1.0, %v2609_v60  ;;  %v2624_v48 = vmul.f32 %v7107_v3, %v7015_v14  ;;  %vm2613_vm6 = vweird.f32 %v6986_v9  ;;  %v2620_v61 = vor.u32 1.1754944e-38, %v2619_v43 }
 0x715   :  { %v7124_v41 = vpop.eup %4681  ;;  %v2634_v44 = vand.u32 2147483648, %v7015_v14  ;;  %4687 = vrcp.f32 %v7096_v62  ;;  %v7129_v37 = vmul.f32 9.984369e-06, %v2594_v38  ;;  %vm2628_vm7 = vweird.f32 %v7015_v14 }
 0x716   :  { %v2625_v23 = vsub.f32 1.0, %v2624_v48  ;;  %v2632_v26 = vand.u32 2147483647, %v7015_v14  ;;  %v2639_v2 = vmul.f32 %v7124_v41, %v7044_v27  ;;  %v7138_v40 = vadd.f32 %v2580_v4, %v6944_v22 }
 0x717   :  { %v7135_v63 = vpop.eup %4683  ;;  %v2611_v29 = vmul.f32 %v7093_v52, %v2610_v45  ;;  %v2647_v20 = vand.u32 2147483647, %v7044_v27  ;;  %v2649_v18 = vand.u32 2147483648, %v7044_v27  ;;  %vm2643_vm8 = vweird.f32 %v7044_v27 }
 0x718   :  { %v2626_v51 = vmul.f32 %v7107_v3, %v2625_v23  ;;  %v2640_v31 = vsub.f32 1.0, %v2639_v2  ;;  %v2654_v30 = vmul.f32 %v7135_v63, %v7059_v1  ;;  %vm2614_vm9 = vweird.f32 %v7093_v52 }
 0x719   :  { %v7147_v16 = vpop.eup %4685  ;;  %vm7150_vm10 = vcmp.eq.f32.partialorder %v2617_v24, 8.507059e+37  ;;  %v2635_v10 = vor.u32 1.1754944e-38, %v2634_v44  ;;  %vm2658_vm11 = vweird.f32 %v7059_v1  ;;  %v2662_v19 = vand.u32 2147483647, %v7059_v1  ;;  %vm7188_vm2 = vmor %vm2613_vm6, %vm2614_vm9 }
 0x71a   :  { %vm7156_vm12 = vcmp.eq.f32.partialorder %v2632_v26, 8.507059e+37  ;;  %v2641_v55 = vmul.f32 %v7124_v41, %v2640_v31  ;;  %v2655_v6 = vsub.f32 1.0, %v2654_v30  ;;  %v2664_v54 = vand.u32 2147483648, %v7059_v1 }
 0x71b   :  { %v2677_v50 = vand.u32 2147483647, %v7087_v33  ;;  %v7163_v43 = vpop.eup %4687  ;;  %v2612_v25 = vadd.f32 %v7093_v52, %v2611_v29  ;;  %vm7166_vm13 = vcmp.eq.f32.partialorder %v2647_v20, 8.507059e+37  ;;  %v2650_v60 = vor.u32 1.1754944e-38, %v2649_v18 }
 0x71c   :  { %v2669_v38 = vmul.f32 %v7147_v16, %v7087_v33  ;;  %v2627_v45 = vadd.f32 %v7107_v3, %v2626_v51  ;;  %vm2629_vm14 = vweird.f32 %v7107_v3  ;;  %v2656_v24 = vmul.f32 %v7135_v63, %v2655_v6 }
 0x71d   :  { %vm2673_vm15 = vweird.f32 %v7087_v33  ;;  %v2642_v48 = vadd.f32 %v7124_v41, %v2641_v55  ;;  %vm2644_vm1 = vweird.f32 %v7124_v41  ;;  %vm7178_vm0 = vcmp.eq.f32.partialorder %v2662_v19, 8.507059e+37  ;;  %vm7203_vm5 = vmor %vm2628_vm7, %vm2629_vm14 }
 0x71e   :  { %v2670_v44 = vsub.f32 1.0, %v2669_v38  ;;  %v2684_v23 = vmul.f32 %v7163_v43, %v7096_v62  ;;  %vm2659_vm3 = vweird.f32 %v7135_v63  ;;  %v2665_v2 = vor.u32 1.1754944e-38, %v2664_v54  ;;  %vm7216_vm6 = vmor %vm2643_vm8, %vm2644_vm1 }
 0x71f   :  { %vm7193_vm4 = vcmp.eq.f32.partialorder %v2677_v50, 8.507059e+37  ;;  %v2679_v20 = vand.u32 2147483648, %v7087_v33  ;;  %v2616_v18 = vsel %vm7188_vm2, %v7093_v52, %v2612_v25  ;;  %v2657_v51 = vadd.f32 %v7135_v63, %v2656_v24  ;;  %vm7235_vm8 = vmor %vm2658_vm11, %vm2659_vm3 }
 0x720   :  { %v2671_v31 = vmul.f32 %v7147_v16, %v2670_v44  ;;  %v2685_v30 = vsub.f32 1.0, %v2684_v23  ;;  %v2631_v19 = vsel %vm7203_vm5, %v7107_v3, %v2627_v45  ;;  %vm2674_vm7 = vweird.f32 %v7147_v16 }
 0x721   :  { %v2692_v14 = vand.u32 2147483647, %v7096_v62  ;;  %v2694_v55 = vand.u32 2147483648, %v7096_v62  ;;  %v2646_v6 = vsel %vm7216_vm6, %v7124_v41, %v2642_v48  ;;  %vm2689_vm9 = vweird.f32 %v7163_v43 }
 0x722   :  { %v2672_v3 = vadd.f32 %v7147_v16, %v2671_v31  ;;  %v2686_v54 = vmul.f32 %v7163_v43, %v2685_v30  ;;  %v2621_v27 = vsel %vm7150_vm10, %v2620_v61, %v2616_v18  ;;  %v2680_v25 = vor.u32 1.1754944e-38, %v2679_v20  ;;  %vm7250_vm10 = vmor %vm2673_vm15, %vm2674_vm7 }
 0x723   :  { %vm2688_vm14 = vweird.f32 %v7096_v62  ;;  %v7241_v41 = vadd.f32 7.5, %v5720_v7  ;;  %v2636_v38 = vsel %vm7156_vm12, %v2635_v10, %v2631_v19  ;;  %v2661_v61 = vsel %vm7235_vm8, %v7135_v63, %v2657_v51 }
 0x724   :  { %v2687_v22 = vadd.f32 %v7163_v43, %v2686_v54  ;;  %v7256_v62 = vadd.f32 7.5, %v5702_v46  ;;  %v2651_v45 = vsel %vm7166_vm13, %v2650_v60, %v2646_v6  ;;  %v2676_v10 = vsel %vm7250_vm10, %v7147_v16, %v2672_v3  ;;  %vm7263_vm11 = vmor %vm2688_vm14, %vm2689_vm9 }
 0x725   :  { %vm2693_vm12 = vcmp.eq.f32.partialorder %v2692_v14, 8.507059e+37  ;;  %v7268_v33 = vadd.f32 7.5, %v5707_v49  ;;  %v2622_v15 = vmul.f32 1.5056327e-07, %v2621_v27  ;;  %v2695_v48 = vor.u32 1.1754944e-38, %v2694_v55 }
 0x726   :  { %v2691_v24 = vsel %vm7263_vm11, %v7163_v43, %v2687_v22  ;;  %v7274_v35 = vadd.f32 7.5, %v5724_v11  ;;  %v2637_v60 = vmul.f32 1.5056327e-07, %v2636_v38  ;;  %v2666_v16 = vsel %vm7178_vm0, %v2665_v2, %v2661_v61 }
 0x727   :  { %v7279_v44 = vadd.f32 7.5, %v5777_v56  ;;  %4689 = vlog2.f32 %v7241_v41  ;;  %v2652_v23 = vmul.f32 1.5056327e-07, %v2651_v45  ;;  %v2681_v26 = vsel %vm7193_vm4, %v2680_v25, %v2676_v10 }
 0x728   :  { %v7285_v20 = vadd.f32 7.5, %v5759_v39  ;;  %4691 = vlog2.f32 %v7256_v62  ;;  %v2601_v43 = vadd.f32 %v7129_v37, %v6947_v36  ;;  %v2696_v18 = vsel %vm2693_vm12, %v2695_v48, %v2691_v24 }
 0x729   :  { %v2698_v4 = vadd.f32 %v2622_v15, %v7103_v5  ;;  %4693 = vlog2.f32 %v7268_v33  ;;  %v2667_v2 = vmul.f32 1.5056327e-07, %v2666_v16  ;;  %v2699_v9 = vadd.f32 %v2637_v60, %v7112_v47 }
 0x72a   :  { %v2700_v51 = vadd.f32 %v2652_v23, %v7115_v13  ;;  %4695 = vlog2.f32 %v7274_v35  ;;  %v2682_v29 = vmul.f32 1.5056327e-07, %v2681_v26  ;;  %v2710_v31 = vadd.f32 0.5, %v5720_v7 }
 0x72b   :  { %v2711_v30 = vadd.f32 0.5, %v5702_v46  ;;  %4697 = vlog2.f32 %v7279_v44  ;;  %v2697_v36 = vmul.f32 1.5056327e-07, %v2696_v18  ;;  %v2701_v37 = vadd.f32 %v2667_v2, %v7119_v28 }
 0x72c   :  { %v2712_v5 = vadd.f32 0.5, %v5707_v49  ;;  %4699 = vlog2.f32 %v7285_v20  ;;  %v2702_v47 = vadd.f32 %v2682_v29, %v7138_v40  ;;  %v2713_v13 = vadd.f32 0.5, %v5724_v11 }
 0x72d   :  { %v4690_v19 = vpop.eup %4689  ;;  %v2714_v52 = vadd.f32 0.5, %v5777_v56  ;;  %4701 = vlog2.f32 %v2698_v4  ;;  %v2703_v14 = vadd.f32 %v2697_v36, %v2601_v43  ;;  %v2715_v46 = vadd.f32 0.5, %v5759_v39 }
 0x72e   :  { %v4692_v7 = vpop.eup %4691  ;;  %v2717_v55 = vmul.f32 0.6931472, %v4690_v19  ;;  %4703 = vlog2.f32 %v2699_v9  ;;  %v7306_v49 = vadd.f32 1.0, %v5728_v17  ;;  %v7309_v3 = vadd.f32 1.0, %v5712_v53 }
 0x72f   :  { %v4694_v6 = vpop.eup %4693  ;;  %v2719_v28 = vmul.f32 0.6931472, %v4692_v7  ;;  %4705 = vlog2.f32 %v2700_v51  ;;  %v7312_v56 = vadd.f32 1.0, %v5715_v57  ;;  %v7315_v25 = vadd.f32 1.0, %v5732_v21 }
 0x730   :  { %v4696_v40 = vpop.eup %4695  ;;  %v2721_v11 = vmul.f32 0.6931472, %v4694_v6  ;;  %v2728_v54 = vmul.f32 %v2717_v55, %v2710_v31  ;;  %4707 = vlog2.f32 %v2701_v37  ;;  %vm2781_vm13 = vweird.f32 %v7306_v49 }
 0x731   :  { %v4698_v27 = vpop.eup %4697  ;;  %v2723_v39 = vmul.f32 0.6931472, %v4696_v40  ;;  %v2729_v50 = vmul.f32 %v2719_v28, %v2711_v30  ;;  %4709 = vlog2.f32 %v2702_v47  ;;  %v7343_v28 = vadd.f32 1.0, %v5787_v0 }
 0x732   :  { %v4700_v38 = vpop.eup %4699  ;;  %v2725_v61 = vmul.f32 0.6931472, %v4698_v27  ;;  %v2730_v1 = vmul.f32 %v2721_v11, %v2712_v5  ;;  %v2734_v22 = vadd.f32 0.9189385, %v2728_v54  ;;  %4711 = vlog2.f32 %v2703_v14 }
 0x733   :  { %v4702_v45 = vpop.eup %4701  ;;  %v2727_v10 = vmul.f32 0.6931472, %v4700_v38  ;;  %v2731_v63 = vmul.f32 %v2723_v39, %v2713_v13  ;;  %v2735_v15 = vadd.f32 0.9189385, %v2729_v50  ;;  %4713 = vrcp.f32 %v7306_v49 }
 0x734   :  { %v4704_v24 = vpop.eup %4703  ;;  %v2732_v48 = vmul.f32 %v2725_v61, %v2714_v52  ;;  %v2736_v60 = vadd.f32 0.9189385, %v2730_v1  ;;  %v2740_v16 = vsub.f32 %v2734_v22, %v7241_v41  ;;  %v2747_v23 = vmul.f32 0.6931472, %v4702_v45 }
 0x735   :  { %v4706_v26 = vpop.eup %4705  ;;  %v2733_v43 = vmul.f32 %v2727_v10, %v2715_v46  ;;  %v2737_v18 = vadd.f32 0.9189385, %v2731_v63  ;;  %v2741_v4 = vsub.f32 %v2735_v15, %v7256_v62  ;;  %v2749_v2 = vmul.f32 0.6931472, %v4704_v24 }
 0x736   :  { %v4708_v9 = vpop.eup %4707  ;;  %v2738_v51 = vadd.f32 0.9189385, %v2732_v48  ;;  %v2742_v29 = vsub.f32 %v2736_v60, %v7268_v33  ;;  %v2751_v31 = vmul.f32 0.6931472, %v4706_v26  ;;  %v7321_v30 = vadd.f32 %v2747_v23, %v2740_v16 }
 0x737   :  { %v4710_v36 = vpop.eup %4709  ;;  %v2739_v37 = vadd.f32 0.9189385, %v2733_v43  ;;  %v2743_v5 = vsub.f32 %v2737_v18, %v7274_v35  ;;  %v2753_v19 = vmul.f32 0.6931472, %v4708_v9  ;;  %v7324_v41 = vadd.f32 %v2749_v2, %v2741_v4 }
 0x738   :  { %v4712_v47 = vpop.eup %4711  ;;  %v2744_v13 = vsub.f32 %v2738_v51, %v7279_v44  ;;  %v2755_v52 = vmul.f32 0.6931472, %v4710_v36  ;;  %v7327_v62 = vadd.f32 %v2751_v31, %v2742_v29  ;;  %v2764_v7 = vsub.f32 %v5747_v32, %v7321_v30 }
 0x739   :  { %v7331_v33 = vpop.eup %4713  ;;  %v2745_v14 = vsub.f32 %v2739_v37, %v7285_v20  ;;  %v2757_v46 = vmul.f32 0.6931472, %v4712_v47  ;;  %v7334_v55 = vadd.f32 %v2753_v19, %v2743_v5  ;;  %v2765_v35 = vsub.f32 %v5722_v8, %v7324_v41 }
 0x73a   :  { %v7338_v6 = vadd.f32 %v2755_v52, %v2744_v13  ;;  %v2766_v44 = vsub.f32 %v5726_v12, %v7327_v62  ;;  %v7350_v20 = vadd.f32 1.0, %v5764_v42  ;;  %4715 = vrcp.f32 %v7309_v3 }
 0x73b   :  { %v7345_v40 = vadd.f32 %v2757_v46, %v2745_v14  ;;  %v2767_v11 = vsub.f32 %v5749_v34, %v7334_v55  ;;  %4717 = vrcp.f32 %v7312_v56  ;;  %v2777_v50 = vmul.f32 %v7331_v33, %v7306_v49 }
 0x73c   :  { %v2768_v54 = vsub.f32 %v5798_v59, %v7338_v6  ;;  %4719 = vrcp.f32 %v7315_v25  ;;  %v2785_v24 = vand.u32 2147483647, %v7306_v49  ;;  %v2787_v48 = vand.u32 2147483648, %v7306_v49 }
 0x73d   :  { %4721 = vrcp.f32 %v7343_v28  ;;  %v2778_v15 = vsub.f32 1.0, %v2777_v50  ;;  %v7387_v43 = vadd.f32 2.0, %v5728_v17  ;;  %vm2796_vm15 = vweird.f32 %v7309_v3 }
 0x73e   :  { %4723 = vrcp.f32 %v7350_v20  ;;  %v2802_v18 = vand.u32 2147483648, %v7309_v3  ;;  %v2817_v4 = vand.u32 2147483648, %v7312_v56  ;;  %v2800_v51 = vand.u32 2147483647, %v7309_v3 }
 0x73f   :  { %v2779_v9 = vmul.f32 %v7331_v33, %v2778_v15  ;;  %vm2811_vm1 = vweird.f32 %v7312_v56  ;;  %v2815_v29 = vand.u32 2147483647, %v7312_v56  ;;  %v2788_v31 = vor.u32 1.1754944e-38, %v2787_v48 }
 0x740   :  { %v7361_v39 = vpop.eup %4715  ;;  %v2830_v37 = vand.u32 2147483647, %v7315_v25  ;;  %v7399_v5 = vadd.f32 2.0, %v5712_v53  ;;  %vm7401_vm0 = vcmp.eq.f32.partialorder %v2785_v24, 8.507059e+37  ;;  %4725 = vrcp.f32 %v7387_v43 }
 0x741   :  { %v7365_v38 = vpop.eup %4717  ;;  %v2792_v61 = vmul.f32 %v7361_v39, %v7309_v3  ;;  %v2803_v14 = vor.u32 1.1754944e-38, %v2802_v18  ;;  %v2818_v46 = vor.u32 1.1754944e-38, %v2817_v4  ;;  %vm2826_vm2 = vweird.f32 %v7315_v25 }
 0x742   :  { %v7369_v1 = vpop.eup %4719  ;;  %v2807_v22 = vmul.f32 %v7365_v38, %v7312_v56  ;;  %vm2782_vm3 = vweird.f32 %v7331_v33  ;;  %vm7411_vm4 = vcmp.eq.f32.partialorder %v2800_v51, 8.507059e+37  ;;  %vm7415_vm5 = vcmp.eq.f32.partialorder %v2815_v29, 8.507059e+37 }
 0x743   :  { %v7373_v45 = vpop.eup %4721  ;;  %v2822_v10 = vmul.f32 %v7369_v1, %v7315_v25  ;;  %v2793_v60 = vsub.f32 1.0, %v2792_v61  ;;  %v2780_v61 = vadd.f32 %v7331_v33, %v2779_v9  ;;  %v2832_v15 = vand.u32 2147483648, %v7315_v25  ;;  %vm7437_vm14 = vmor %vm2781_vm13, %vm2782_vm3 }
 0x744   :  { %v7377_v63 = vpop.eup %4723  ;;  %v2808_v16 = vsub.f32 1.0, %v2807_v22  ;;  %v2837_v23 = vmul.f32 %v7373_v45, %v7343_v28  ;;  %vm2841_vm6 = vweird.f32 %v7343_v28  ;;  %vm2797_vm7 = vweird.f32 %v7361_v39 }
 0x745   :  { %v2852_v26 = vmul.f32 %v7377_v63, %v7350_v20  ;;  %v2823_v2 = vsub.f32 1.0, %v2822_v10  ;;  %v2794_v36 = vmul.f32 %v7361_v39, %v2793_v60  ;;  %vm2812_vm9 = vweird.f32 %v7365_v38  ;;  %vm7456_vm11 = vmor %vm2796_vm15, %vm2797_vm7 }
 0x746   :  { %v2809_v47 = vmul.f32 %v7365_v38, %v2808_v16  ;;  %v2838_v13 = vsub.f32 1.0, %v2837_v23  ;;  %vm7424_vm8 = vcmp.eq.f32.partialorder %v2830_v37, 8.507059e+37  ;;  %v7429_v60 = vadd.f32 2.0, %v5715_v57  ;;  %v7447_v51 = vpop.eup %4725  ;;  %vm7469_vm12 = vmor %vm2811_vm1, %vm2812_vm9 }
 0x747   :  { %v2853_v52 = vsub.f32 1.0, %v2852_v26  ;;  %v2824_v50 = vmul.f32 %v7369_v1, %v2823_v2  ;;  %v2795_v24 = vadd.f32 %v7361_v39, %v2794_v36  ;;  %4727 = vrcp.f32 %v7399_v5 }
 0x748   :  { %v2810_v16 = vadd.f32 %v7365_v38, %v2809_v47  ;;  %v2839_v23 = vmul.f32 %v7373_v45, %v2838_v13  ;;  %vm2827_vm10 = vweird.f32 %v7369_v1  ;;  %v2845_v2 = vand.u32 2147483647, %v7343_v28 }
 0x749   :  { %v2854_v26 = vmul.f32 %v7377_v63, %v2853_v52  ;;  %v2825_v4 = vadd.f32 %v7369_v1, %v2824_v50  ;;  %v7445_v9 = vadd.f32 2.0, %v5732_v21  ;;  %v2784_v29 = vsel %vm7437_vm14, %v7331_v33, %v2780_v61  ;;  %vm7485_vm3 = vmor %vm2826_vm2, %vm2827_vm10 }
 0x74a   :  { %v2833_v36 = vor.u32 1.1754944e-38, %v2832_v15  ;;  %v2847_v37 = vand.u32 2147483648, %v7343_v28  ;;  %v2862_v47 = vand.u32 2147483648, %v7350_v20  ;;  %v2799_v13 = vsel %vm7456_vm11, %v7361_v39, %v2795_v24 }
 0x74b   :  { %vm2842_vm13 = vweird.f32 %v7373_v45  ;;  %vm2857_vm15 = vweird.f32 %v7377_v63  ;;  %v7476_v3 = vadd.f32 2.0, %v5787_v0  ;;  %v2814_v52 = vsel %vm7469_vm12, %v7365_v38, %v2810_v16 }
 0x74c   :  { %v2840_v39 = vadd.f32 %v7373_v45, %v2839_v23  ;;  %v2855_v50 = vadd.f32 %v7377_v63, %v2854_v26  ;;  %4729 = vrcp.f32 %v7429_v60  ;;  %v2789_v61 = vsel %vm7401_vm0, %v2788_v31, %v2784_v29  ;;  %vm7504_vm1 = vmor %vm2841_vm6, %vm2842_vm13 }
 0x74d   :  { %v2829_v38 = vsel %vm7485_vm3, %v7369_v1, %v2825_v4  ;;  %v2879_v25 = vmul.f32 %v7447_v51, %v7387_v43  ;;  %4731 = vrcp.f32 %v7445_v9  ;;  %v7500_v15 = vpop.eup %4727  ;;  %vm7508_vm2 = vcmp.eq.f32.partialorder %v2845_v2, 8.507059e+37 }
 0x74e   :  { %v2848_v31 = vor.u32 1.1754944e-38, %v2847_v37  ;;  %vm2856_vm0 = vweird.f32 %v7350_v20  ;;  %v2860_v1 = vand.u32 2147483647, %v7350_v20  ;;  %v2804_v16 = vsel %vm7411_vm4, %v2803_v14, %v2799_v13 }
 0x74f   :  { %v2819_v23 = vsel %vm7415_vm5, %v2818_v46, %v2814_v52  ;;  %vm7520_vm6 = vmor %vm2856_vm0, %vm2857_vm15  ;;  %v7525_v26 = vadd.f32 2.0, %v5764_v42  ;;  %4733 = vrcp.f32 %v7476_v3  ;;  %v2790_v18 = vmul.f32 676.5204, %v2789_v61 }
 0x750   :  { %v2834_v20 = vsel %vm7424_vm8, %v2833_v36, %v2829_v38  ;;  %v2844_v14 = vsel %vm7504_vm1, %v7373_v45, %v2840_v39  ;;  %v2859_v46 = vsel %vm7520_vm6, %v7377_v63, %v2855_v50  ;;  %v2863_v22 = vor.u32 1.1754944e-38, %v2862_v47 }
 0x751   :  { %v2880_v10 = vsub.f32 1.0, %v2879_v25  ;;  %v2887_v4 = vand.u32 2147483647, %v7387_v43  ;;  %v2894_v2 = vmul.f32 %v7500_v15, %v7399_v5  ;;  %v2805_v49 = vmul.f32 676.5204, %v2804_v16 }
 0x752   :  { %v7539_v29 = vpop.eup %4729  ;;  %v2820_v48 = vmul.f32 676.5204, %v2819_v23  ;;  %vm2861_vm4 = vcmp.eq.f32.partialorder %v2860_v1, 8.507059e+37  ;;  %v2889_v36 = vand.u32 2147483648, %v7387_v43  ;;  %v2835_v45 = vmul.f32 676.5204, %v2834_v20 }
 0x753   :  { %v7542_v37 = vpop.eup %4731  ;;  %v2849_v63 = vsel %vm7508_vm2, %v2848_v31, %v2844_v14  ;;  %v2864_v47 = vsel %vm2861_vm4, %v2863_v22, %v2859_v46  ;;  %4735 = vrcp.f32 %v7525_v26  ;;  %v7547_v13 = vadd.f32 1.0, %v2790_v18 }
 0x754   :  { %v2881_v52 = vmul.f32 %v7447_v51, %v2880_v10  ;;  %vm2883_vm5 = vweird.f32 %v7387_v43  ;;  %v2895_v56 = vsub.f32 1.0, %v2894_v2  ;;  %v2909_v39 = vmul.f32 %v7539_v29, %v7429_v60 }
 0x755   :  { %v7549_v33 = vpop.eup %4733  ;;  %v2850_v50 = vmul.f32 676.5204, %v2849_v63  ;;  %v2865_v61 = vmul.f32 676.5204, %v2864_v47  ;;  %v2890_v38 = vor.u32 1.1754944e-38, %v2889_v36  ;;  %v2924_v25 = vmul.f32 %v7542_v37, %v7445_v9 }
 0x756   :  { %v7557_v24 = vadd.f32 1.0, %v2805_v49  ;;  %v7559_v19 = vadd.f32 1.0, %v2820_v48  ;;  %v7561_v31 = vadd.f32 1.0, %v2835_v45  ;;  %vm7563_vm7 = vcmp.eq.f32.partialorder %v2887_v4, 8.507059e+37 }
 0x757   :  { %v2902_v16 = vand.u32 2147483647, %v7399_v5  ;;  %vm2884_vm9 = vweird.f32 %v7447_v51  ;;  %vm2898_vm8 = vweird.f32 %v7399_v5  ;;  %v2904_v23 = vand.u32 2147483648, %v7399_v5 }
 0x758   :  { %v2939_v28 = vmul.f32 %v7549_v33, %v7476_v3  ;;  %v2882_v20 = vadd.f32 %v7447_v51, %v2881_v52  ;;  %v2896_v14 = vmul.f32 %v7500_v15, %v2895_v56  ;;  %v2910_v46 = vsub.f32 1.0, %v2909_v39  ;;  %vm7596_vm12 = vmor %vm2883_vm5, %vm2884_vm9 }
 0x759   :  { %v7573_v18 = vpop.eup %4735  ;;  %v7578_v22 = vadd.f32 3.0, %v5728_v17  ;;  %v7580_v10 = vadd.f32 1.0, %v2850_v50  ;;  %v7582_v4 = vadd.f32 1.0, %v2865_v61  ;;  %vm2899_vm14 = vweird.f32 %v7500_v15 }
 0x75a   :  { %v2925_v2 = vsub.f32 1.0, %v2924_v25  ;;  %vm7585_vm10 = vcmp.eq.f32.partialorder %v2902_v16, 8.507059e+37  ;;  %vm2913_vm11 = vweird.f32 %v7429_v60  ;;  %v2917_v48 = vand.u32 2147483647, %v7429_v60  ;;  %vm7630_vm1 = vmor %vm2898_vm8, %vm2899_vm14 }
 0x75b   :  { %v2919_v36 = vand.u32 2147483648, %v7429_v60  ;;  %v2905_v63 = vor.u32 1.1754944e-38, %v2904_v23  ;;  %v2940_v47 = vsub.f32 1.0, %v2939_v28  ;;  %v2954_v52 = vmul.f32 %v7573_v18, %v7525_v26 }
 0x75c   :  { %v7603_v56 = vadd.f32 3.0, %v5712_v53  ;;  %v2886_v39 = vsel %vm7596_vm12, %v7447_v51, %v2882_v20  ;;  %v2897_v50 = vadd.f32 %v7500_v15, %v2896_v14  ;;  %v2911_v43 = vmul.f32 %v7539_v29, %v2910_v46 }
 0x75d   :  { %4737 = vrcp.f32 %v7578_v22  ;;  %v2926_v61 = vmul.f32 %v7542_v37, %v2925_v2  ;;  %vm2928_vm13 = vweird.f32 %v7445_v9  ;;  %v2932_v25 = vand.u32 2147483647, %v7445_v9 }
 0x75e   :  { %v7615_v16 = vadd.f32 3.0, %v5715_v57  ;;  %vm7617_vm15 = vcmp.eq.f32.partialorder %v2917_v48, 8.507059e+37  ;;  %v2920_v51 = vor.u32 1.1754944e-38, %v2919_v36  ;;  %v2934_v28 = vand.u32 2147483648, %v7445_v9 }
 0x75f   :  { %vm2943_vm3 = vweird.f32 %v7476_v3  ;;  %v2947_v20 = vand.u32 2147483647, %v7476_v3  ;;  %v2891_v14 = vsel %vm7563_vm7, %v2890_v38, %v2886_v39  ;;  %v2941_v2 = vmul.f32 %v7549_v33, %v2940_v47 }
 0x760   :  { %v2955_v48 = vsub.f32 1.0, %v2954_v52  ;;  %4739 = vrcp.f32 %v7603_v56  ;;  %v2901_v36 = vsel %vm7630_vm1, %v7500_v15, %v2897_v50  ;;  %v2912_v1 = vadd.f32 %v7539_v29, %v2911_v43 }
 0x761   :  { %vm2914_vm2 = vweird.f32 %v7539_v29  ;;  %v7642_v38 = vadd.f32 3.0, %v5732_v21  ;;  %v2927_v5 = vadd.f32 %v7542_v37, %v2926_v61  ;;  %vm2929_vm0 = vweird.f32 %v7542_v37 }
 0x762   :  { %vm7646_vm6 = vcmp.eq.f32.partialorder %v2932_v25, 8.507059e+37  ;;  %4741 = vrcp.f32 %v7615_v16  ;;  %v2892_v15 = vmul.f32 -1259.1392, %v2891_v14  ;;  %v2935_v52 = vor.u32 1.1754944e-38, %v2934_v28  ;;  %vm7661_vm4 = vmor %vm2913_vm11, %vm2914_vm2 }
 0x763   :  { %v7651_v47 = vpop.eup %4737  ;;  %v2949_v39 = vand.u32 2147483648, %v7476_v3  ;;  %v7655_v50 = vadd.f32 3.0, %v5787_v0  ;;  %v2906_v43 = vsel %vm7585_vm10, %v2905_v63, %v2901_v36  ;;  %v2942_v25 = vadd.f32 %v7549_v33, %v2941_v2  ;;  %vm7673_vm7 = vmor %vm2928_vm13, %vm2929_vm0 }
 0x764   :  { %vm2944_vm5 = vweird.f32 %v7549_v33  ;;  %v2956_v28 = vmul.f32 %v7573_v18, %v2955_v48  ;;  %v2916_v14 = vsel %vm7661_vm4, %v7539_v29, %v2912_v1  ;;  %vm7677_vm9 = vcmp.eq.f32.partialorder %v2947_v20, 8.507059e+37 }
 0x765   :  { %v7682_v63 = vadd.f32 3.0, %v5764_v42  ;;  %4743 = vrcp.f32 %v7642_v38  ;;  %v2931_v29 = vsel %vm7673_vm7, %v7542_v37, %v2927_v5  ;;  %v2962_v9 = vand.u32 2147483647, %v7525_v26  ;;  %vm7696_vm8 = vmor %vm2943_vm3, %vm2944_vm5 }
 0x766   :  { %v7685_v46 = vpop.eup %4739  ;;  %v2964_v2 = vand.u32 2147483648, %v7525_v26  ;;  %v2981_v20 = vmul.f32 %v7651_v47, %v7578_v22  ;;  %v2907_v48 = vmul.f32 -1259.1392, %v2906_v43  ;;  %v2950_v1 = vor.u32 1.1754944e-38, %v2949_v39 }
 0x767   :  { %vm2958_vm14 = vweird.f32 %v7525_v26  ;;  %4745 = vrcp.f32 %v7655_v50  ;;  %v2921_v5 = vsel %vm7617_vm15, %v2920_v51, %v2916_v14  ;;  %v2946_v43 = vsel %vm7696_vm8, %v7549_v33, %v2942_v25 }
 0x768   :  { %v7702_v37 = vpop.eup %4741  ;;  %v2957_v3 = vadd.f32 %v7573_v18, %v2956_v28  ;;  %vm2959_vm10 = vweird.f32 %v7573_v18  ;;  %v2936_v39 = vsel %vm7646_vm6, %v2935_v52, %v2931_v29  ;;  %v2991_v61 = vand.u32 2147483648, %v7578_v22 }
 0x769   :  { %v2996_v49 = vmul.f32 %v7685_v46, %v7603_v56  ;;  %4747 = vrcp.f32 %v7682_v63  ;;  %vm7717_vm11 = vcmp.eq.f32.partialorder %v2962_v9, 8.507059e+37  ;;  %v2965_v51 = vor.u32 1.1754944e-38, %v2964_v2  ;;  %vm7730_vm12 = vmor %vm2958_vm14, %vm2959_vm10 }
 0x76a   :  { %v7722_v33 = vadd.f32 %v2892_v15, %v7547_v13  ;;  %v2982_v25 = vsub.f32 1.0, %v2981_v20  ;;  %v2922_v45 = vmul.f32 -1259.1392, %v2921_v5  ;;  %v2951_v52 = vsel %vm7677_vm9, %v2950_v1, %v2946_v43 }
 0x76b   :  { %v7724_v28 = vpop.eup %4743  ;;  %v7735_v29 = vadd.f32 %v2907_v48, %v7557_v24  ;;  %v3011_v13 = vmul.f32 %v7702_v37, %v7615_v16  ;;  %v2937_v15 = vmul.f32 -1259.1392, %v2936_v39  ;;  %v2961_v9 = vsel %vm7730_vm12, %v7573_v18, %v2957_v3 }
 0x76c   :  { %vm2985_vm13 = vweird.f32 %v7578_v22  ;;  %v2989_v60 = vand.u32 2147483647, %v7578_v22  ;;  %v3026_v26 = vmul.f32 %v7724_v28, %v7642_v38  ;;  %v7749_v24 = vadd.f32 %v2922_v45, %v7559_v19 }
 0x76d   :  { %v7746_v2 = vpop.eup %4745  ;;  %v2992_v20 = vor.u32 1.1754944e-38, %v2991_v61  ;;  %v2997_v48 = vsub.f32 1.0, %v2996_v49  ;;  %v3006_v36 = vand.u32 2147483648, %v7603_v56  ;;  %v2952_v1 = vmul.f32 -1259.1392, %v2951_v52 }
 0x76e   :  { %v7753_v5 = vadd.f32 %v2937_v15, %v7561_v31  ;;  %v2983_v18 = vmul.f32 %v7651_v47, %v2982_v25  ;;  %v3041_v43 = vmul.f32 %v7746_v2, %v7655_v50  ;;  %v2966_v39 = vsel %vm7717_vm11, %v2965_v51, %v2961_v9 }
 0x76f   :  { %v7758_v3 = vpop.eup %4747  ;;  %vm3000_vm15 = vweird.f32 %v7603_v56  ;;  %v3004_v19 = vand.u32 2147483647, %v7603_v56  ;;  %v3012_v61 = vsub.f32 1.0, %v3011_v13  ;;  %v3019_v49 = vand.u32 2147483647, %v7615_v16 }
 0x770   :  { %v7766_v31 = vadd.f32 %v2952_v1, %v7580_v10  ;;  %vm2986_vm3 = vweird.f32 %v7651_v47  ;;  %vm7769_vm1 = vcmp.eq.f32.partialorder %v2989_v60, 8.507059e+37  ;;  %v3027_v45 = vsub.f32 1.0, %v3026_v26 }
 0x771   :  { %v3056_v23 = vmul.f32 %v7758_v3, %v7682_v63  ;;  %v2998_v51 = vmul.f32 %v7685_v46, %v2997_v48  ;;  %v3007_v52 = vor.u32 1.1754944e-38, %v3006_v36  ;;  %vm3015_vm2 = vweird.f32 %v7615_v16  ;;  %vm7802_vm5 = vmor %vm2985_vm13, %vm2986_vm3 }
 0x772   :  { %v3021_v14 = vand.u32 2147483648, %v7615_v16  ;;  %v7779_v10 = vadd.f32 4.0, %v5728_v17  ;;  %v2967_v13 = vmul.f32 -1259.1392, %v2966_v39  ;;  %v2984_v15 = vadd.f32 %v7651_v47, %v2983_v18 }
 0x773   :  { %v3034_v9 = vand.u32 2147483647, %v7642_v38  ;;  %v3042_v60 = vsub.f32 1.0, %v3041_v43  ;;  %vm3001_vm0 = vweird.f32 %v7685_v46  ;;  %vm7784_vm6 = vcmp.eq.f32.partialorder %v3004_v19, 8.507059e+37 }
 0x774   :  { %v3013_v48 = vmul.f32 %v7702_v37, %v3012_v61  ;;  %v3057_v36 = vsub.f32 1.0, %v3056_v23  ;;  %v7790_v1 = vadd.f32 4.0, %v5712_v53  ;;  %v7793_v27 = vadd.f32 %v2967_v13, %v7582_v4  ;;  %vm7835_vm10 = vmor %vm3000_vm15, %vm3001_vm0 }
 0x775   :  { %v3028_v18 = vmul.f32 %v7724_v28, %v3027_v45  ;;  %vm3030_vm4 = vweird.f32 %v7642_v38  ;;  %v3036_v43 = vand.u32 2147483648, %v7642_v38  ;;  %v2999_v19 = vadd.f32 %v7685_v46, %v2998_v51 }
 0x776   :  { %vm7807_vm7 = vcmp.eq.f32.partialorder %v3019_v49, 8.507059e+37  ;;  %v3022_v4 = vor.u32 1.1754944e-38, %v3021_v14  ;;  %v7812_v45 = vadd.f32 4.0, %v5715_v57  ;;  %4749 = vrcp.f32 %v7779_v10 }
 0x777   :  { %v2988_v22 = vsel %vm7802_vm5, %v7651_v47, %v2984_v15  ;;  %vm3016_vm9 = vweird.f32 %v7702_v37  ;;  %vm7819_vm8 = vcmp.eq.f32.partialorder %v3034_v9, 8.507059e+37  ;;  %v3043_v49 = vmul.f32 %v7746_v2, %v3042_v60 }
 0x778   :  { %vm3045_vm14 = vweird.f32 %v7655_v50  ;;  %v3014_v51 = vadd.f32 %v7702_v37, %v3013_v48  ;;  %v3058_v14 = vmul.f32 %v7758_v3, %v3057_v36  ;;  %v7828_v13 = vadd.f32 4.0, %v5732_v21  ;;  %vm7853_vm12 = vmor %vm3015_vm2, %vm3016_vm9 }
 0x779   :  { %4751 = vrcp.f32 %v7790_v1  ;;  %v3029_v15 = vadd.f32 %v7724_v28, %v3028_v18  ;;  %vm3031_vm11 = vweird.f32 %v7724_v28  ;;  %v3037_v9 = vor.u32 1.1754944e-38, %v3036_v43 }
 0x77a   :  { %v3049_v60 = vand.u32 2147483647, %v7655_v50  ;;  %v2993_v48 = vsel %vm7769_vm1, %v2992_v20, %v2988_v22  ;;  %v3003_v36 = vsel %vm7835_vm10, %v7685_v46, %v2999_v19  ;;  %v3051_v56 = vand.u32 2147483648, %v7655_v50  ;;  %vm7870_vm15 = vmor %vm3030_vm4, %vm3031_vm11 }
 0x77b   :  { %4753 = vrcp.f32 %v7812_v45  ;;  %v3044_v43 = vadd.f32 %v7746_v2, %v3043_v49  ;;  %vm3046_vm13 = vweird.f32 %v7746_v2  ;;  %v3064_v20 = vand.u32 2147483647, %v7682_v63 }
 0x77c   :  { %v7861_v46 = vadd.f32 4.0, %v5787_v0  ;;  %v7863_v25 = vpop.eup %4749  ;;  %v3018_v39 = vsel %vm7853_vm12, %v7702_v37, %v3014_v51  ;;  %v3059_v19 = vadd.f32 %v7758_v3, %v3058_v14  ;;  %vm3061_vm3 = vweird.f32 %v7758_v3  ;;  %vm7890_vm2 = vmor %vm3045_vm14, %vm3046_vm13 }
 0x77d   :  { %4755 = vrcp.f32 %v7828_v13  ;;  %v3008_v22 = vsel %vm7784_vm6, %v3007_v52, %v3003_v36  ;;  %v3033_v49 = vsel %vm7870_vm15, %v7724_v28, %v3029_v15  ;;  %vm3060_vm1 = vweird.f32 %v7682_v63 }
 0x77e   :  { %v3066_v38 = vand.u32 2147483648, %v7682_v63  ;;  %v2994_v51 = vmul.f32 771.3234, %v2993_v48  ;;  %vm7894_vm0 = vcmp.eq.f32.partialorder %v3049_v60, 8.507059e+37  ;;  %v3052_v28 = vor.u32 1.1754944e-38, %v3051_v56  ;;  %vm7906_vm6 = vmor %vm3060_vm1, %vm3061_vm3 }
 0x77f   :  { %v7884_v37 = vpop.eup %4751  ;;  %v7899_v26 = vadd.f32 4.0, %v5764_v42  ;;  %v3023_v63 = vsel %vm7807_vm7, %v3022_v4, %v3018_v39  ;;  %v3048_v47 = vsel %vm7890_vm2, %v7746_v2, %v3044_v43  ;;  %v3083_v15 = vmul.f32 %v7863_v25, %v7779_v10 }
 0x780   :  { %4757 = vrcp.f32 %v7861_v46  ;;  %v3009_v48 = vmul.f32 771.3234, %v3008_v22  ;;  %v3038_v61 = vsel %vm7819_vm8, %v3037_v9, %v3033_v49  ;;  %v3063_v4 = vsel %vm7906_vm6, %v7758_v3, %v3059_v19 }
 0x781   :  { %v7913_v60 = vpop.eup %4753  ;;  %vm3065_vm4 = vcmp.eq.f32.partialorder %v3064_v20, 8.507059e+37  ;;  %v3067_v2 = vor.u32 1.1754944e-38, %v3066_v38  ;;  %v7921_v36 = vadd.f32 %v2994_v51, %v7722_v33  ;;  %v3093_v56 = vand.u32 2147483648, %v7779_v10 }
 0x782   :  { %v3098_v18 = vmul.f32 %v7884_v37, %v7790_v1  ;;  %v3024_v39 = vmul.f32 771.3234, %v3023_v63  ;;  %v3053_v23 = vsel %vm7894_vm0, %v3052_v28, %v3048_v47  ;;  %v3113_v9 = vmul.f32 %v7913_v60, %v7812_v45 }
 0x783   :  { %v7926_v43 = vpop.eup %4755  ;;  %4759 = vrcp.f32 %v7899_v26  ;;  %v3039_v3 = vmul.f32 771.3234, %v3038_v61  ;;  %v3068_v20 = vsel %vm3065_vm4, %v3067_v2, %v3063_v4  ;;  %v3084_v33 = vsub.f32 1.0, %v3083_v15 }
 0x784   :  { %v3128_v16 = vmul.f32 %v7926_v43, %v7828_v13  ;;  %v7936_v19 = vadd.f32 %v3009_v48, %v7735_v29  ;;  %v7939_v22 = vadd.f32 %v3024_v39, %v7749_v24  ;;  %v3091_v49 = vand.u32 2147483647, %v7779_v10 }
 0x785   :  { %v3108_v38 = vand.u32 2147483648, %v7790_v1  ;;  %v3054_v14 = vmul.f32 771.3234, %v3053_v23  ;;  %v7946_v52 = vadd.f32 %v3039_v3, %v7753_v5  ;;  %vm3087_vm5 = vweird.f32 %v7779_v10 }
 0x786   :  { %v7943_v51 = vpop.eup %4757  ;;  %v3094_v28 = vor.u32 1.1754944e-38, %v3093_v56  ;;  %v3099_v63 = vsub.f32 1.0, %v3098_v18  ;;  %v3069_v47 = vmul.f32 771.3234, %v3068_v20  ;;  %v3106_v29 = vand.u32 2147483647, %v7790_v1 }
 0x787   :  { %v3114_v50 = vsub.f32 1.0, %v3113_v9  ;;  %v3143_v24 = vmul.f32 %v7943_v51, %v7861_v46  ;;  %v7953_v15 = vadd.f32 %v3054_v14, %v7766_v31  ;;  %v3085_v48 = vmul.f32 %v7863_v25, %v3084_v33 }
 0x788   :  { %vm3102_vm7 = vweird.f32 %v7790_v1  ;;  %v3123_v5 = vand.u32 2147483648, %v7812_v45  ;;  %v3129_v61 = vsub.f32 1.0, %v3128_v16  ;;  %v3109_v2 = vor.u32 1.1754944e-38, %v3108_v38 }
 0x789   :  { %v7958_v4 = vpop.eup %4759  ;;  %vm3117_vm9 = vweird.f32 %v7812_v45  ;;  %v3121_v56 = vand.u32 2147483647, %v7812_v45  ;;  %v3136_v18 = vand.u32 2147483647, %v7828_v13  ;;  %vm7963_vm8 = vcmp.eq.f32.partialorder %v3091_v49, 8.507059e+37 }
 0x78a   :  { %v3100_v31 = vmul.f32 %v7884_v37, %v3099_v63  ;;  %v3138_v23 = vand.u32 2147483648, %v7828_v13  ;;  %v3144_v9 = vsub.f32 1.0, %v3143_v24  ;;  %v3158_v3 = vmul.f32 %v7958_v4, %v7899_v26 }
 0x78b   :  { %v7972_v20 = vadd.f32 %v3069_v47, %v7793_v27  ;;  %vm3088_vm14 = vweird.f32 %v7863_v25  ;;  %v3115_v33 = vmul.f32 %v7913_v60, %v3114_v50  ;;  %v7977_v16 = vadd.f32 5.0, %v5728_v17 }
 0x78c   :  { %v3086_v49 = vadd.f32 %v7863_v25, %v3085_v48  ;;  %vm7980_vm10 = vcmp.eq.f32.partialorder %v3106_v29, 8.507059e+37  ;;  %v3124_v14 = vor.u32 1.1754944e-38, %v3123_v5  ;;  %v3130_v63 = vmul.f32 %v7926_v43, %v3129_v61  ;;  %vm8005_vm3 = vmor %vm3087_vm5, %vm3088_vm14 }
 0x78d   :  { %v3159_v24 = vsub.f32 1.0, %v3158_v3  ;;  %vm3103_vm11 = vweird.f32 %v7884_v37  ;;  %vm7986_vm12 = vcmp.eq.f32.partialorder %v3121_v56, 8.507059e+37  ;;  %vm3132_vm13 = vweird.f32 %v7828_v13 }
 0x78e   :  { %v3151_v47 = vand.u32 2147483647, %v7861_v46  ;;  %v7993_v50 = vadd.f32 5.0, %v5712_v53  ;;  %v3101_v29 = vadd.f32 %v7884_v37, %v3100_v31  ;;  %vm7996_vm15 = vcmp.eq.f32.partialorder %v3136_v18, 8.507059e+37  ;;  %vm8025_vm0 = vmor %vm3102_vm7, %vm3103_vm11 }
 0x78f   :  { %v3139_v5 = vor.u32 1.1754944e-38, %v3138_v23  ;;  %v3145_v61 = vmul.f32 %v7943_v51, %v3144_v9  ;;  %v3116_v3 = vadd.f32 %v7913_v60, %v3115_v33  ;;  %vm3118_vm1 = vweird.f32 %v7913_v60 }
 0x790   :  { %vm3133_vm2 = vweird.f32 %v7926_v43  ;;  %4761 = vrcp.f32 %v7977_v16  ;;  %v3090_v18 = vsel %vm8005_vm3, %v7863_v25, %v3086_v49  ;;  %v3131_v31 = vadd.f32 %v7926_v43, %v3130_v63  ;;  %vm8043_vm5 = vmor %vm3117_vm9, %vm3118_vm1 }
 0x791   :  { %v3160_v10 = vmul.f32 %v7958_v4, %v3159_v24  ;;  %v8019_v23 = vadd.f32 5.0, %v5715_v57  ;;  %vm3147_vm6 = vweird.f32 %v7861_v46  ;;  %vm8030_vm4 = vcmp.eq.f32.partialorder %v3151_v47, 8.507059e+37  ;;  %vm8059_vm9 = vmor %vm3132_vm13, %vm3133_vm2 }
 0x792   :  { %v8035_v25 = vadd.f32 5.0, %v5732_v21  ;;  %4763 = vrcp.f32 %v7993_v50  ;;  %v3105_v49 = vsel %vm8025_vm0, %v7884_v37, %v3101_v29  ;;  %v3146_v63 = vadd.f32 %v7943_v51, %v3145_v61 }
 0x793   :  { %vm3148_vm7 = vweird.f32 %v7943_v51  ;;  %v3153_v24 = vand.u32 2147483648, %v7861_v46  ;;  %v3095_v47 = vsel %vm7963_vm8, %v3094_v28, %v3090_v18  ;;  %v3120_v56 = vsel %vm8043_vm5, %v7913_v60, %v3116_v3 }
 0x794   :  { %vm3163_vm14 = vweird.f32 %v7958_v4  ;;  %v3166_v37 = vand.u32 2147483647, %v7899_v26  ;;  %v3135_v28 = vsel %vm8059_vm9, %v7926_v43, %v3131_v31  ;;  %v3161_v39 = vadd.f32 %v7958_v4, %v3160_v10  ;;  %vm8079_vm8 = vmor %vm3147_vm6, %vm3148_vm7 }
 0x795   :  { %v8070_v60 = vadd.f32 5.0, %v5787_v0  ;;  %4765 = vrcp.f32 %v8019_v23  ;;  %v3110_v29 = vsel %vm7980_vm10, %v3109_v2, %v3105_v49  ;;  %vm3162_vm11 = vweird.f32 %v7899_v26 }
 0x796   :  { %v8073_v13 = vpop.eup %4761  ;;  %v3168_v43 = vand.u32 2147483648, %v7899_v26  ;;  %4767 = vrcp.f32 %v8035_v25  ;;  %v3125_v3 = vsel %vm7986_vm12, %v3124_v14, %v3120_v56  ;;  %v3150_v38 = vsel %vm8079_vm8, %v7943_v51, %v3146_v63  ;;  %vm8100_vm10 = vmor %vm3162_vm11, %vm3163_vm14 }
 0x797   :  { %v3154_v2 = vor.u32 1.1754944e-38, %v3153_v24  ;;  %v8092_v46 = vadd.f32 5.0, %v5764_v42  ;;  %v3096_v31 = vmul.f32 -176.61504, %v3095_v47  ;;  %v3140_v10 = vsel %vm7996_vm15, %v3139_v5, %v3135_v28 }
 0x798   :  { %v8094_v18 = vpop.eup %4763  ;;  %vm8104_vm12 = vcmp.eq.f32.partialorder %v3166_v37, 8.507059e+37  ;;  %v3185_v51 = vmul.f32 %v8073_v13, %v7977_v16  ;;  %v3111_v27 = vmul.f32 -176.61504, %v3110_v29  ;;  %v3165_v9 = vsel %vm8100_vm10, %v7958_v4, %v3161_v39 }
 0x799   :  { %v3200_v48 = vmul.f32 %v8094_v18, %v7993_v50  ;;  %4769 = vrcp.f32 %v8070_v60  ;;  %v3126_v5 = vmul.f32 -176.61504, %v3125_v3  ;;  %v3155_v49 = vsel %vm8030_vm4, %v3154_v2, %v3150_v38 }
 0x79a   :  { %v3169_v1 = vor.u32 1.1754944e-38, %v3168_v43  ;;  %v8119_v63 = vadd.f32 %v3096_v31, %v7921_v36  ;;  %v3141_v47 = vmul.f32 -176.61504, %v3140_v10  ;;  %v8124_v56 = vadd.f32 %v3111_v27, %v7936_v19 }
 0x79b   :  { %v8121_v24 = vpop.eup %4765  ;;  %v3195_v4 = vand.u32 2147483648, %v7977_v16  ;;  %4771 = vrcp.f32 %v8092_v46  ;;  %v8133_v37 = vadd.f32 %v3126_v5, %v7939_v22  ;;  %v3186_v36 = vsub.f32 1.0, %v3185_v51 }
 0x79c   :  { %v8128_v45 = vpop.eup %4767  ;;  %v3170_v33 = vsel %vm8104_vm12, %v3169_v1, %v3165_v9  ;;  %v3215_v28 = vmul.f32 %v8121_v24, %v8019_v23  ;;  %v3156_v39 = vmul.f32 -176.61504, %v3155_v49  ;;  %v3201_v29 = vsub.f32 1.0, %v3200_v48 }
 0x79d   :  { %v3210_v19 = vand.u32 2147483648, %v7993_v50  ;;  %v3230_v61 = vmul.f32 %v8128_v45, %v8035_v25  ;;  %v8141_v43 = vadd.f32 %v3141_v47, %v7946_v52  ;;  %vm3189_vm13 = vweird.f32 %v7977_v16 }
 0x79e   :  { %v3193_v3 = vand.u32 2147483647, %v7977_v16  ;;  %v3216_v22 = vsub.f32 1.0, %v3215_v28  ;;  %v3171_v2 = vmul.f32 -176.61504, %v3170_v33  ;;  %v8148_v31 = vadd.f32 %v3156_v39, %v7953_v15 }
 0x79f   :  { %v8145_v38 = vpop.eup %4769  ;;  %v3196_v10 = vor.u32 1.1754944e-38, %v3195_v4  ;;  %vm3204_vm15 = vweird.f32 %v7993_v50  ;;  %v3208_v26 = vand.u32 2147483647, %v7993_v50  ;;  %v3187_v14 = vmul.f32 %v8073_v13, %v3186_v36 }
 0x7a0   :  { %v3223_v52 = vand.u32 2147483647, %v8019_v23  ;;  %v3231_v51 = vsub.f32 1.0, %v3230_v61  ;;  %v3245_v27 = vmul.f32 %v8145_v38, %v8070_v60  ;;  %v3202_v48 = vmul.f32 %v8094_v18, %v3201_v29 }
 0x7a1   :  { %v8156_v9 = vpop.eup %4771  ;;  %v3211_v5 = vor.u32 1.1754944e-38, %v3210_v19  ;;  %vm3219_vm3 = vweird.f32 %v8019_v23  ;;  %v3225_v15 = vand.u32 2147483648, %v8019_v23  ;;  %v8162_v49 = vadd.f32 %v3171_v2, %v7972_v20 }
 0x7a2   :  { %vm8164_vm1 = vcmp.eq.f32.partialorder %v3193_v3, 8.507059e+37  ;;  %v3217_v47 = vmul.f32 %v8121_v24, %v3216_v22  ;;  %v3238_v4 = vand.u32 2147483647, %v8035_v25  ;;  %v3260_v33 = vmul.f32 %v8156_v9, %v8092_v46 }
 0x7a3   :  { %vm3190_vm2 = vweird.f32 %v8073_v13  ;;  %vm8173_vm0 = vcmp.eq.f32.partialorder %v3208_v26, 8.507059e+37  ;;  %vm3234_vm6 = vweird.f32 %v8035_v25  ;;  %v3240_v20 = vand.u32 2147483648, %v8035_v25 }
 0x7a4   :  { %v3246_v28 = vsub.f32 1.0, %v3245_v27  ;;  %v3188_v39 = vadd.f32 %v8073_v13, %v3187_v14  ;;  %vm8180_vm4 = vcmp.eq.f32.partialorder %v3223_v52, 8.507059e+37  ;;  %v3232_v19 = vmul.f32 %v8128_v45, %v3231_v51  ;;  %vm8201_vm14 = vmor %vm3189_vm13, %vm3190_vm2 }
 0x7a5   :  { %v3261_v61 = vsub.f32 1.0, %v3260_v33  ;;  %v3203_v3 = vadd.f32 %v8094_v18, %v3202_v48  ;;  %vm3205_vm5 = vweird.f32 %v8094_v18  ;;  %v3226_v22 = vor.u32 1.1754944e-38, %v3225_v15 }
 0x7a6   :  { %v8188_v2 = vadd.f32 6.0, %v5728_v17  ;;  %v3218_v26 = vadd.f32 %v8121_v24, %v3217_v47  ;;  %vm3220_vm7 = vweird.f32 %v8121_v24  ;;  %vm8192_vm9 = vcmp.eq.f32.partialorder %v3238_v4, 8.507059e+37  ;;  %vm8215_vm11 = vmor %vm3204_vm15, %vm3205_vm5 }
 0x7a7   :  { %v3253_v52 = vand.u32 2147483647, %v8070_v60  ;;  %v3241_v27 = vor.u32 1.1754944e-38, %v3240_v20  ;;  %v3247_v48 = vmul.f32 %v8145_v38, %v3246_v28  ;;  %vm3249_vm8 = vweird.f32 %v8070_v60  ;;  %vm8227_vm12 = vmor %vm3219_vm3, %vm3220_vm7 }
 0x7a8   :  { %v8208_v15 = vadd.f32 6.0, %v5712_v53  ;;  %v3192_v47 = vsel %vm8201_vm14, %v8073_v13, %v3188_v39  ;;  %v3233_v4 = vadd.f32 %v8128_v45, %v3232_v19  ;;  %vm3235_vm10 = vweird.f32 %v8128_v45 }
 0x7a9   :  { %v3262_v33 = vmul.f32 %v8156_v9, %v3261_v61  ;;  %v3207_v20 = vsel %vm8215_vm11, %v8094_v18, %v3203_v3  ;;  %v3255_v50 = vand.u32 2147483648, %v8070_v60  ;;  %v8233_v28 = vadd.f32 6.0, %v5715_v57  ;;  %vm8251_vm15 = vmor %vm3234_vm6, %vm3235_vm10 }
 0x7aa   :  { %4773 = vrcp.f32 %v8188_v2  ;;  %v3222_v39 = vsel %vm8227_vm12, %v8121_v24, %v3218_v26  ;;  %vm8239_vm13 = vcmp.eq.f32.partialorder %v3253_v52, 8.507059e+37  ;;  %v3268_v23 = vand.u32 2147483647, %v8092_v46 }
 0x7ab   :  { %v8245_v18 = vadd.f32 6.0, %v5732_v21  ;;  %v3197_v61 = vsel %vm8164_vm1, %v3196_v10, %v3192_v47  ;;  %v3248_v24 = vadd.f32 %v8145_v38, %v3247_v48  ;;  %vm3250_vm3 = vweird.f32 %v8145_v38 }
 0x7ac   :  { %4775 = vrcp.f32 %v8208_v15  ;;  %v3212_v26 = vsel %vm8173_vm0, %v3211_v5, %v3207_v20  ;;  %v3237_v1 = vsel %vm8251_vm15, %v8128_v45, %v3233_v4  ;;  %v3263_v10 = vadd.f32 %v8156_v9, %v3262_v33  ;;  %vm8274_vm2 = vmor %vm3249_vm8, %vm3250_vm3 }
 0x7ad   :  { %vm3265_vm1 = vweird.f32 %v8156_v9  ;;  %v3227_v25 = vsel %vm8180_vm4, %v3226_v22, %v3222_v39  ;;  %v3270_v52 = vand.u32 2147483648, %v8092_v46  ;;  %v8269_v51 = vadd.f32 6.0, %v5787_v0 }
 0x7ae   :  { %4777 = vrcp.f32 %v8233_v28  ;;  %v3198_v36 = vmul.f32 12.507343, %v3197_v61  ;;  %v3256_v45 = vor.u32 1.1754944e-38, %v3255_v50  ;;  %vm3264_vm0 = vweird.f32 %v8092_v46 }
 0x7af   :  { %4779 = vrcp.f32 %v8245_v18  ;;  %v3213_v22 = vmul.f32 12.507343, %v3212_v26  ;;  %v3242_v48 = vsel %vm8192_vm9, %v3241_v27, %v3237_v1  ;;  %v3252_v47 = vsel %vm8274_vm2, %v8145_v38, %v3248_v24  ;;  %vm8287_vm6 = vmor %vm3264_vm0, %vm3265_vm1 }
 0x7b0   :  { %v8280_v29 = vpop.eup %4773  ;;  %v8292_v16 = vadd.f32 6.0, %v5764_v42  ;;  %v3228_v46 = vmul.f32 12.507343, %v3227_v25  ;;  %v3267_v4 = vsel %vm8287_vm6, %v8156_v9, %v3263_v10  ;;  %vm3269_vm4 = vcmp.eq.f32.partialorder %v3268_v23, 8.507059e+37 }
 0x7b1   :  { %v3287_v14 = vmul.f32 %v8280_v29, %v8188_v2  ;;  %v3271_v33 = vor.u32 1.1754944e-38, %v3270_v52  ;;  %v8302_v38 = vadd.f32 %v3198_v36, %v8119_v63  ;;  %v8305_v20 = vadd.f32 %v3213_v22, %v8124_v56 }
 0x7b2   :  { %v8299_v27 = vpop.eup %4775  ;;  %4781 = vrcp.f32 %v8269_v51  ;;  %v3243_v13 = vmul.f32 12.507343, %v3242_v48  ;;  %v3257_v50 = vsel %vm8239_vm13, %v3256_v45, %v3252_v47  ;;  %v8311_v9 = vadd.f32 %v3228_v46, %v8133_v37 }
 0x7b3   :  { %v3302_v39 = vmul.f32 %v8299_v27, %v8208_v15  ;;  %v3272_v61 = vsel %vm3269_vm4, %v3271_v33, %v3267_v4  ;;  %v3288_v63 = vsub.f32 1.0, %v3287_v14  ;;  %v3297_v3 = vand.u32 2147483648, %v8188_v2 }
 0x7b4   :  { %v8315_v23 = vpop.eup %4777  ;;  %4783 = vrcp.f32 %v8292_v16  ;;  %v8322_v24 = vadd.f32 %v3243_v13, %v8141_v43  ;;  %vm3291_vm5 = vweird.f32 %v8188_v2  ;;  %v3258_v26 = vmul.f32 12.507343, %v3257_v50 }
 0x7b5   :  { %v8319_v56 = vpop.eup %4779  ;;  %v3303_v37 = vsub.f32 1.0, %v3302_v39  ;;  %v3317_v19 = vmul.f32 %v8315_v23, %v8233_v28  ;;  %v3295_v1 = vand.u32 2147483647, %v8188_v2  ;;  %v3312_v10 = vand.u32 2147483648, %v8208_v15 }
 0x7b6   :  { %v3332_v25 = vmul.f32 %v8319_v56, %v8245_v18  ;;  %v3273_v52 = vmul.f32 12.507343, %v3272_v61  ;;  %vm3306_vm7 = vweird.f32 %v8208_v15  ;;  %v3310_v43 = vand.u32 2147483647, %v8208_v15 }
 0x7b7   :  { %v3318_v36 = vsub.f32 1.0, %v3317_v19  ;;  %v8336_v45 = vadd.f32 %v3258_v26, %v8148_v31  ;;  %v3289_v22 = vmul.f32 %v8280_v29, %v3288_v63  ;;  %v3298_v48 = vor.u32 1.1754944e-38, %v3297_v3 }
 0x7b8   :  { %v8333_v5 = vpop.eup %4781  ;;  %v3304_v47 = vmul.f32 %v8299_v27, %v3303_v37  ;;  %v8341_v60 = vadd.f32 %v3273_v52, %v8162_v49  ;;  %vm3321_vm9 = vweird.f32 %v8233_v28  ;;  %v3325_v46 = vand.u32 2147483647, %v8233_v28 }
 0x7b9   :  { %v3333_v4 = vsub.f32 1.0, %v3332_v25  ;;  %v3347_v14 = vmul.f32 %v8333_v5, %v8269_v51  ;;  %v3313_v31 = vor.u32 1.1754944e-38, %v3312_v10  ;;  %v3327_v13 = vand.u32 2147483648, %v8233_v28 }
 0x7ba   :  { %v8347_v33 = vpop.eup %4783  ;;  %vm3336_vm14 = vweird.f32 %v8245_v18  ;;  %v3342_v50 = vand.u32 2147483648, %v8245_v18  ;;  %vm3292_vm8 = vweird.f32 %v8280_v29  ;;  %vm8353_vm11 = vcmp.eq.f32.partialorder %v3295_v1, 8.507059e+37 }
 0x7bb   :  { %vm8357_vm10 = vcmp.eq.f32.partialorder %v3310_v43, 8.507059e+37  ;;  %v3319_v61 = vmul.f32 %v8315_v23, %v3318_v36  ;;  %v3340_v63 = vand.u32 2147483647, %v8245_v18  ;;  %v3348_v3 = vsub.f32 1.0, %v3347_v14  ;;  %vm8379_vm15 = vmor %vm3291_vm5, %vm3292_vm8 }
 0x7bc   :  { %v3290_v37 = vadd.f32 %v8280_v29, %v3289_v22  ;;  %v3305_v19 = vadd.f32 %v8299_v27, %v3304_v47  ;;  %vm3307_vm12 = vweird.f32 %v8299_v27  ;;  %v3362_v26 = vmul.f32 %v8347_v33, %v8292_v16 }
 0x7bd   :  { %vm8368_vm13 = vcmp.eq.f32.partialorder %v3325_v46, 8.507059e+37  ;;  %v3334_v10 = vmul.f32 %v8319_v56, %v3333_v4  ;;  %v3349_v25 = vmul.f32 %v8333_v5, %v3348_v3  ;;  %v8375_v52 = vadd.f32 7.0, %v5728_v17  ;;  %vm8386_vm3 = vmor %vm3306_vm7, %vm3307_vm12 }
 0x7be   :  { %v3328_v36 = vor.u32 1.1754944e-38, %v3327_v13  ;;  %v3343_v22 = vor.u32 1.1754944e-38, %v3342_v50  ;;  %v3355_v47 = vand.u32 2147483647, %v8269_v51  ;;  %v3363_v46 = vsub.f32 1.0, %v3362_v26 }
 0x7bf   :  { %v3320_v14 = vadd.f32 %v8315_v23, %v3319_v61  ;;  %vm3322_vm1 = vweird.f32 %v8315_v23  ;;  %vm8392_vm2 = vcmp.eq.f32.partialorder %v3340_v63, 8.507059e+37  ;;  %v3357_v13 = vand.u32 2147483648, %v8269_v51 }
 0x7c0   :  { %v8398_v50 = vadd.f32 7.0, %v5712_v53  ;;  %v3294_v15 = vsel %vm8379_vm15, %v8280_v29, %v3290_v37  ;;  %v3309_v3 = vsel %vm8386_vm3, %v8299_v27, %v3305_v19  ;;  %vm3337_vm0 = vweird.f32 %v8319_v56  ;;  %vm8414_vm4 = vmor %vm3321_vm9, %vm3322_vm1 }
 0x7c1   :  { %vm3352_vm6 = vweird.f32 %v8333_v5  ;;  %v3335_v61 = vadd.f32 %v8319_v56, %v3334_v10  ;;  %v3350_v63 = vadd.f32 %v8333_v5, %v3349_v25  ;;  %v3364_v26 = vmul.f32 %v8347_v33, %v3363_v46  ;;  %vm8429_vm8 = vmor %vm3336_vm14, %vm3337_vm0 }
 0x7c2   :  { %4785 = vrcp.f32 %v8375_v52  ;;  %vm3351_vm5 = vweird.f32 %v8269_v51  ;;  %vm3366_vm7 = vweird.f32 %v8292_v16  ;;  %v3370_v27 = vand.u32 2147483647, %v8292_v16 }
 0x7c3   :  { %v8422_v37 = vadd.f32 7.0, %v5715_v57  ;;  %v3324_v19 = vsel %vm8414_vm4, %v8315_v23, %v3320_v14  ;;  %v3372_v10 = vand.u32 2147483648, %v8292_v16  ;;  %v8435_v51 = vadd.f32 7.0, %v5732_v21  ;;  %vm8444_vm9 = vmor %vm3351_vm5, %vm3352_vm6 }
 0x7c4   :  { %4787 = vrcp.f32 %v8398_v50  ;;  %v3299_v25 = vsel %vm8353_vm11, %v3298_v48, %v3294_v15  ;;  %v3314_v43 = vsel %vm8357_vm10, %v3313_v31, %v3309_v3  ;;  %vm8448_vm14 = vcmp.eq.f32.partialorder %v3355_v47, 8.507059e+37 }
 0x7c5   :  { %v3358_v46 = vor.u32 1.1754944e-38, %v3357_v13  ;;  %v3339_v4 = vsel %vm8429_vm8, %v8319_v56, %v3335_v61  ;;  %v3354_v48 = vsel %vm8444_vm9, %v8333_v5, %v3350_v63  ;;  %v3365_v31 = vadd.f32 %v8347_v33, %v3364_v26 }
 0x7c6   :  { %vm3367_vm11 = vweird.f32 %v8347_v33  ;;  %v3329_v49 = vsel %vm8368_vm13, %v3328_v36, %v3324_v19  ;;  %vm8462_vm10 = vcmp.eq.f32.partialorder %v3370_v27, 8.507059e+37  ;;  %v8467_v47 = vadd.f32 7.0, %v5787_v0 }
 0x7c7   :  { %4789 = vrcp.f32 %v8422_v37  ;;  %v3300_v14 = vmul.f32 -0.1385711, %v3299_v25  ;;  %v3315_v5 = vmul.f32 -0.1385711, %v3314_v43  ;;  %v3373_v13 = vor.u32 1.1754944e-38, %v3372_v10  ;;  %vm8479_vm12 = vmor %vm3366_vm7, %vm3367_vm11 }
 0x7c8   :  { %v8470_v56 = vpop.eup %4785  ;;  %4791 = vrcp.f32 %v8435_v51  ;;  %v3344_v1 = vsel %vm8392_vm2, %v3343_v22, %v3339_v4  ;;  %v3359_v36 = vsel %vm8448_vm14, %v3358_v46, %v3354_v48  ;;  %v8484_v3 = vadd.f32 7.0, %v5764_v42 }
 0x7c9   :  { %v3389_v61 = vmul.f32 %v8470_v56, %v8375_v52  ;;  %v3330_v26 = vmul.f32 -0.1385711, %v3329_v49  ;;  %v3369_v22 = vsel %vm8479_vm12, %v8347_v33, %v3365_v31  ;;  %v8494_v2 = vadd.f32 %v3300_v14, %v8302_v38 }
 0x7ca   :  { %v8488_v63 = vpop.eup %4787  ;;  %v8497_v16 = vadd.f32 %v3315_v5, %v8305_v20  ;;  %v3399_v27 = vand.u32 2147483648, %v8375_v52  ;;  %4793 = vrcp.f32 %v8467_v47  ;;  %v3345_v28 = vmul.f32 -0.1385711, %v3344_v1 }
 0x7cb   :  { %v3390_v29 = vsub.f32 1.0, %v3389_v61  ;;  %v3404_v19 = vmul.f32 %v8488_v63, %v8398_v50  ;;  %v3360_v10 = vmul.f32 -0.1385711, %v3359_v36  ;;  %v8504_v25 = vadd.f32 %v3330_v26, %v8311_v9 }
 0x7cc   :  { %v3414_v33 = vand.u32 2147483648, %v8398_v50  ;;  %v3374_v20 = vsel %vm8462_vm10, %v3373_v13, %v3369_v22  ;;  %v3397_v43 = vand.u32 2147483647, %v8375_v52  ;;  %4795 = vrcp.f32 %v8484_v3 }
 0x7cd   :  { %v8507_v38 = vpop.eup %4789  ;;  %v3405_v18 = vsub.f32 1.0, %v3404_v19  ;;  %v8516_v46 = vadd.f32 %v3345_v28, %v8322_v24  ;;  %vm3393_vm13 = vweird.f32 %v8375_v52  ;;  %v3412_v9 = vand.u32 2147483647, %v8398_v50 }
 0x7ce   :  { %v8513_v23 = vpop.eup %4791  ;;  %v3419_v4 = vmul.f32 %v8507_v38, %v8422_v37  ;;  %v8523_v48 = vadd.f32 %v3360_v10, %v8336_v45  ;;  %v3391_v31 = vmul.f32 %v8470_v56, %v3390_v29  ;;  %v3400_v49 = vor.u32 1.1754944e-38, %v3399_v27 }
 0x7cf   :  { %vm3408_vm15 = vweird.f32 %v8398_v50  ;;  %v3434_v39 = vmul.f32 %v8513_v23, %v8435_v51  ;;  %v3375_v24 = vmul.f32 -0.1385711, %v3374_v20  ;;  %v3415_v14 = vor.u32 1.1754944e-38, %v3414_v33 }
 0x7d0   :  { %v3420_v5 = vsub.f32 1.0, %v3419_v4  ;;  %v3427_v13 = vand.u32 2147483647, %v8422_v37  ;;  %v8530_v1 = vpop.eup %4793  ;;  %vm8532_vm3 = vcmp.eq.f32.partialorder %v3397_v43, 8.507059e+37  ;;  %v3406_v45 = vmul.f32 %v8488_v63, %v3405_v18 }
 0x7d1   :  { %v3429_v15 = vand.u32 2147483648, %v8422_v37  ;;  %v3435_v61 = vsub.f32 1.0, %v3434_v39  ;;  %v3442_v26 = vand.u32 2147483647, %v8435_v51  ;;  %v8540_v22 = vadd.f32 %v3375_v24, %v8341_v60 }
 0x7d2   :  { %v3421_v29 = vmul.f32 %v8507_v38, %v3420_v5  ;;  %vm3423_vm1 = vweird.f32 %v8422_v37  ;;  %v3449_v27 = vmul.f32 %v8530_v1, %v8467_v47  ;;  %v8546_v19 = vpop.eup %4795  ;;  %v3392_v28 = vadd.f32 %v8470_v56, %v3391_v31 }
 0x7d3   :  { %vm3394_vm2 = vweird.f32 %v8470_v56  ;;  %vm8550_vm0 = vcmp.eq.f32.partialorder %v3412_v9, 8.507059e+37  ;;  %v3436_v60 = vmul.f32 %v8513_v23, %v3435_v61  ;;  %vm3438_vm6 = vweird.f32 %v8435_v51 }
 0x7d4   :  { %vm8556_vm4 = vcmp.eq.f32.partialorder %v3427_v13, 8.507059e+37  ;;  %v3444_v20 = vand.u32 2147483648, %v8435_v51  ;;  %v3450_v43 = vsub.f32 1.0, %v3449_v27  ;;  %v3464_v18 = vmul.f32 %v8546_v19, %v8484_v3  ;;  %vm8571_vm8 = vmor %vm3393_vm13, %vm3394_vm2 }
 0x7d5   :  { %v3407_v4 = vadd.f32 %v8488_v63, %v3406_v45  ;;  %vm3409_vm5 = vweird.f32 %v8488_v63  ;;  %v3430_v9 = vor.u32 1.1754944e-38, %v3429_v15  ;;  %vm8565_vm7 = vcmp.eq.f32.partialorder %v3442_v26, 8.507059e+37 }
 0x7d6   :  { %v3422_v24 = vadd.f32 %v8507_v38, %v3421_v29  ;;  %vm3424_vm9 = vweird.f32 %v8507_v38  ;;  %v3451_v5 = vmul.f32 %v8530_v1, %v3450_v43  ;;  %v3465_v13 = vsub.f32 1.0, %v3464_v18  ;;  %vm8588_vm11 = vmor %vm3408_vm15, %vm3409_vm5 }
 0x7d7   :  { %v3396_v45 = vsel %vm8571_vm8, %v8470_v56, %v3392_v28  ;;  %v3437_v15 = vadd.f32 %v8513_v23, %v3436_v60  ;;  %vm3439_vm14 = vweird.f32 %v8513_v23  ;;  %v8584_v52 = vadd.f32 8.0, %v5728_v17  ;;  %vm8600_vm12 = vmor %vm3423_vm1, %vm3424_vm9 }
 0x7d8   :  { %v3445_v26 = vor.u32 1.1754944e-38, %v3444_v20  ;;  %vm3453_vm10 = vweird.f32 %v8467_v47  ;;  %v3457_v29 = vand.u32 2147483647, %v8467_v47  ;;  %v3466_v56 = vmul.f32 %v8546_v19, %v3465_v13  ;;  %vm8616_vm15 = vmor %vm3438_vm6, %vm3439_vm14 }
 0x7d9   :  { %v3411_v27 = vsel %vm8588_vm11, %v8488_v63, %v3407_v4  ;;  %v3452_v50 = vadd.f32 %v8530_v1, %v3451_v5  ;;  %vm3454_vm13 = vweird.f32 %v8530_v1  ;;  %v8607_v60 = vadd.f32 8.0, %v5712_v53 }
 0x7da   :  { %v3401_v20 = vsel %vm8532_vm3, %v3400_v49, %v3396_v45  ;;  %v3426_v63 = vsel %vm8600_vm12, %v8507_v38, %v3422_v24  ;;  %v3459_v43 = vand.u32 2147483648, %v8467_v47  ;;  %vm3469_vm1 = vweird.f32 %v8546_v19  ;;  %vm8634_vm3 = vmor %vm3453_vm10, %vm3454_vm13 }
 0x7db   :  { %v3441_v18 = vsel %vm8616_vm15, %v8513_v23, %v3437_v15  ;;  %v3467_v49 = vadd.f32 %v8546_v19, %v3466_v56  ;;  %v8627_v36 = vadd.f32 8.0, %v5715_v57  ;;  %4797 = vrcp.f32 %v8584_v52 }
 0x7dc   :  { %v3416_v51 = vsel %vm8550_vm0, %v3415_v14, %v3411_v27  ;;  %vm3468_vm2 = vweird.f32 %v8484_v3  ;;  %v3474_v23 = vand.u32 2147483648, %v8484_v3  ;;  %v8641_v4 = vadd.f32 8.0, %v5732_v21 }
 0x7dd   :  { %v3431_v39 = vsel %vm8556_vm4, %v3430_v9, %v3426_v63  ;;  %v3456_v14 = vsel %vm8634_vm3, %v8530_v1, %v3452_v50  ;;  %v3472_v47 = vand.u32 2147483647, %v8484_v3  ;;  %4799 = vrcp.f32 %v8607_v60  ;;  %vm3470_vm6 = vmor %vm3468_vm2, %vm3469_vm1 }
 0x7de   :  { %v3402_v10 = vmul.f32 9.984369e-06, %v3401_v20  ;;  %v3446_v24 = vsel %vm8565_vm7, %v3445_v26, %v3441_v18  ;;  %vm3458_vm0 = vcmp.eq.f32.partialorder %v3457_v29, 8.507059e+37  ;;  %v3460_v5 = vor.u32 1.1754944e-38, %v3459_v43 }
 0x7df   :  { %v3417_v13 = vmul.f32 9.984369e-06, %v3416_v51  ;;  %v3471_v33 = vsel %vm3470_vm6, %v8546_v19, %v3467_v49  ;;  %v8656_v9 = vadd.f32 8.0, %v5787_v0  ;;  %4801 = vrcp.f32 %v8627_v36 }
 0x7e0   :  { %v3432_v3 = vmul.f32 9.984369e-06, %v3431_v39  ;;  %v3461_v1 = vsel %vm3458_vm0, %v3460_v5, %v3456_v14  ;;  %v3475_v45 = vor.u32 1.1754944e-38, %v3474_v23  ;;  %4803 = vrcp.f32 %v8641_v4 }
 0x7e1   :  { %v8660_v31 = vpop.eup %4797  ;;  %v3447_v15 = vmul.f32 9.984369e-06, %v3446_v24  ;;  %vm3473_vm4 = vcmp.eq.f32.partialorder %v3472_v47, 8.507059e+37  ;;  %v8663_v61 = vadd.f32 %v3402_v10, %v8494_v2  ;;  %v8666_v26 = vadd.f32 8.0, %v5764_v42 }
 0x7e2   :  { %v3476_v19 = vsel %vm3473_vm4, %v3475_v45, %v3471_v33  ;;  %v8669_v29 = vadd.f32 %v3417_v13, %v8497_v16  ;;  %v8672_v56 = vadd.f32 %v3432_v3, %v8504_v25  ;;  %v3491_v27 = vmul.f32 %v8660_v31, %v8584_v52 }
 0x7e3   :  { %v8676_v28 = vpop.eup %4799  ;;  %v3462_v50 = vmul.f32 9.984369e-06, %v3461_v1  ;;  %v8679_v20 = vadd.f32 %v3447_v15, %v8516_v46  ;;  %v3501_v2 = vand.u32 2147483648, %v8584_v52  ;;  %4805 = vrcp.f32 %v8656_v9 }
 0x7e4   :  { %v3492_v63 = vsub.f32 1.0, %v3491_v27  ;;  %vm3495_vm5 = vweird.f32 %v8584_v52  ;;  %v3499_v16 = vand.u32 2147483647, %v8584_v52  ;;  %v3506_v25 = vmul.f32 %v8676_v28, %v8607_v60 }
 0x7e5   :  { %v3514_v37 = vand.u32 2147483647, %v8607_v60  ;;  %v8688_v43 = vpop.eup %4801  ;;  %v8690_v18 = vmul.f32 9.984369e-06, %v3476_v19  ;;  %v8693_v46 = vadd.f32 %v3462_v50, %v8523_v48  ;;  %v3516_v49 = vand.u32 2147483648, %v8607_v60 }
 0x7e6   :  { %4807 = vrcp.f32 %v8666_v26  ;;  %v8697_v51 = vpop.eup %4803  ;;  %v3493_v38 = vmul.f32 %v8660_v31, %v3492_v63  ;;  %v3507_v23 = vsub.f32 1.0, %v3506_v25  ;;  %vm3510_vm7 = vweird.f32 %v8607_v60 }
 0x7e7   :  { %v3521_v39 = vmul.f32 %v8688_v43, %v8627_v36  ;;  %v3531_v14 = vand.u32 2147483648, %v8627_v36  ;;  %v3502_v47 = vor.u32 1.1754944e-38, %v3501_v2  ;;  %v3529_v48 = vand.u32 2147483647, %v8627_v36 }
 0x7e8   :  { %v3536_v10 = vmul.f32 %v8697_v51, %v8641_v4  ;;  %v3546_v24 = vand.u32 2147483648, %v8641_v4  ;;  %vm8708_vm8 = vcmp.eq.f32.partialorder %v3499_v16, 8.507059e+37  ;;  %v3508_v13 = vmul.f32 %v8676_v28, %v3507_v23 }
 0x7e9   :  { %v3522_v33 = vsub.f32 1.0, %v3521_v39  ;;  %vm3525_vm9 = vweird.f32 %v8627_v36  ;;  %v3544_v3 = vand.u32 2147483647, %v8641_v4  ;;  %v8715_v1 = vpop.eup %4805  ;;  %vm3496_vm14 = vweird.f32 %v8660_v31 }
 0x7ea   :  { %v3517_v45 = vor.u32 1.1754944e-38, %v3516_v49  ;;  %v3537_v15 = vsub.f32 1.0, %v3536_v10  ;;  %vm3540_vm11 = vweird.f32 %v8641_v4  ;;  %v3494_v19 = vadd.f32 %v8660_v31, %v3493_v38  ;;  %vm8745_vm3 = vmor %vm3495_vm5, %vm3496_vm14 }
 0x7eb   :  { %vm8720_vm10 = vcmp.eq.f32.partialorder %v3514_v37, 8.507059e+37  ;;  %v3523_v50 = vmul.f32 %v8688_v43, %v3522_v33  ;;  %v3532_v2 = vor.u32 1.1754944e-38, %v3531_v14  ;;  %v3551_v63 = vmul.f32 %v8715_v1, %v8656_v9 }
 0x7ec   :  { %v4808_v16 = vpop.eup %4807  ;;  %vm8727_vm12 = vcmp.eq.f32.partialorder %v3529_v48, 8.507059e+37  ;;  %v3538_v49 = vmul.f32 %v8697_v51, %v3537_v15  ;;  %v3547_v23 = vor.u32 1.1754944e-38, %v3546_v24  ;;  %vm3555_vm13 = vweird.f32 %v8656_v9 }
 0x7ed   :  { %v3559_v37 = vand.u32 2147483647, %v8656_v9  ;;  %v3509_v38 = vadd.f32 %v8676_v28, %v3508_v13  ;;  %vm3511_vm15 = vweird.f32 %v8676_v28  ;;  %vm8736_vm1 = vcmp.eq.f32.partialorder %v3544_v3, 8.507059e+37 }
 0x7ee   :  { %v3552_v14 = vsub.f32 1.0, %v3551_v63  ;;  %v3561_v48 = vand.u32 2147483648, %v8656_v9  ;;  %v3524_v24 = vadd.f32 %v8688_v43, %v3523_v50  ;;  %vm3526_vm2 = vweird.f32 %v8688_v43  ;;  %vm8761_vm6 = vmor %vm3510_vm7, %vm3511_vm15 }
 0x7ef   :  { %v3566_v13 = vmul.f32 %v4808_v16, %v8666_v26  ;;  %v3574_v33 = vand.u32 2147483647, %v8666_v26  ;;  %v3498_v3 = vsel %vm8745_vm3, %v8660_v31, %v3494_v19  ;;  %v3539_v15 = vadd.f32 %v8697_v51, %v3538_v49  ;;  %vm8776_vm3 = vmor %vm3525_vm9, %vm3526_vm2 }
 0x7f0   :  { %vm3541_vm0 = vweird.f32 %v8697_v51  ;;  %v3553_v52 = vmul.f32 %v8715_v1, %v3552_v14  ;;  %vm3556_vm4 = vweird.f32 %v8715_v1  ;;  %vm8766_vm5 = vcmp.eq.f32.partialorder %v3559_v37, 8.507059e+37 }
 0x7f1   :  { %v3567_v10 = vsub.f32 1.0, %v3566_v13  ;;  %vm3570_vm14 = vweird.f32 %v8666_v26  ;;  %v3513_v31 = vsel %vm8761_vm6, %v8676_v28, %v3509_v38  ;;  %v3576_v49 = vand.u32 2147483648, %v8666_v26  ;;  %vm8792_vm7 = vmor %vm3540_vm11, %vm3541_vm0 }
 0x7f2   :  { %v3554_v19 = vadd.f32 %v8715_v1, %v3553_v52  ;;  %v8783_v37 = vadd.f32 7.5, %v5728_v17  ;;  %v3503_v14 = vsel %vm8708_vm8, %v3502_v47, %v3498_v3  ;;  %v3528_v28 = vsel %vm8776_vm3, %v8688_v43, %v3524_v24  ;;  %vm8803_vm8 = vmor %vm3555_vm13, %vm3556_vm4 }
 0x7f3   :  { %v3568_v38 = vmul.f32 %v4808_v16, %v3567_v10  ;;  %vm3571_vm9 = vweird.f32 %v4808_v16  ;;  %v3543_v13 = vsel %vm8792_vm7, %v8697_v51, %v3539_v15  ;;  %v3562_v43 = vor.u32 1.1754944e-38, %v3561_v48 }
 0x7f4   :  { %vm8807_vm15 = vcmp.eq.f32.partialorder %v3574_v33, 8.507059e+37  ;;  %v8812_v5 = vadd.f32 7.5, %v5712_v53  ;;  %v3518_v24 = vsel %vm8720_vm10, %v3517_v45, %v3513_v31  ;;  %v3558_v51 = vsel %vm8803_vm8, %v8715_v1, %v3554_v19  ;;  %vm3572_vm11 = vmor %vm3570_vm14, %vm3571_vm9 }
 0x7f5   :  { %v3569_v9 = vadd.f32 %v4808_v16, %v3568_v38  ;;  %v8820_v3 = vadd.f32 7.5, %v5715_v57  ;;  %v3504_v15 = vmul.f32 1.5056327e-07, %v3503_v14  ;;  %v3533_v48 = vsel %vm8727_vm12, %v3532_v2, %v3528_v28 }
 0x7f6   :  { %v3577_v33 = vor.u32 1.1754944e-38, %v3576_v49  ;;  %v8827_v52 = vadd.f32 7.5, %v5732_v21  ;;  %v3548_v45 = vsel %vm8736_vm1, %v3547_v23, %v3543_v13  ;;  %v8832_v1 = vadd.f32 7.5, %v5787_v0 }
 0x7f7   :  { %v3573_v27 = vsel %vm3572_vm11, %v4808_v16, %v3569_v9  ;;  %4809 = vlog2.f32 %v8783_v37  ;;  %v3519_v50 = vmul.f32 1.5056327e-07, %v3518_v24  ;;  %v3563_v2 = vsel %vm8766_vm5, %v3562_v43, %v3558_v51 }
 0x7f8   :  { %v8838_v26 = vadd.f32 7.5, %v5764_v42  ;;  %4811 = vlog2.f32 %v8812_v5  ;;  %v3534_v25 = vmul.f32 1.5056327e-07, %v3533_v48  ;;  %v3578_v39 = vsel %vm8807_vm15, %v3577_v33, %v3573_v27 }
 0x7f9   :  { %v3580_v16 = vadd.f32 %v3504_v15, %v8663_v61  ;;  %4813 = vlog2.f32 %v8820_v3  ;;  %v3483_v23 = vadd.f32 %v8690_v18, %v8540_v22  ;;  %v3549_v10 = vmul.f32 1.5056327e-07, %v3548_v45 }
 0x7fa   :  { %v3581_v63 = vadd.f32 %v3519_v50, %v8669_v29  ;;  %4815 = vlog2.f32 %v8827_v52  ;;  %v3564_v31 = vmul.f32 1.5056327e-07, %v3563_v2  ;;  %v3582_v60 = vadd.f32 %v3534_v25, %v8672_v56 }
 0x7fb   :  { %4817 = vlog2.f32 %v8832_v1  ;;  %v3579_v19 = vmul.f32 1.5056327e-07, %v3578_v39  ;;  %v3583_v49 = vadd.f32 %v3549_v10, %v8679_v20  ;;  %v3592_v29 = vadd.f32 0.5, %v5728_v17 }
 0x7fc   :  { %4819 = vlog2.f32 %v8838_v26  ;;  %v3584_v14 = vadd.f32 %v3564_v31, %v8693_v46  ;;  %v3593_v56 = vadd.f32 0.5, %v5712_v53  ;;  %v3594_v38 = vadd.f32 0.5, %v5715_v57 }
 0x7fd   :  { %v4810_v61 = vpop.eup %4809  ;;  %4821 = vlog2.f32 %v3580_v16  ;;  %v3585_v18 = vadd.f32 %v3579_v19, %v3483_v23  ;;  %v3595_v47 = vadd.f32 0.5, %v5732_v21  ;;  %v3596_v24 = vadd.f32 0.5, %v5787_v0 }
 0x7fe   :  { %v4812_v22 = vpop.eup %4811  ;;  %v3599_v28 = vmul.f32 0.6931472, %v4810_v61  ;;  %4823 = vlog2.f32 %v3581_v63  ;;  %v3597_v33 = vadd.f32 0.5, %v5764_v42  ;;  %v9257_v8 = vsub.f32 %v5779_v58, %v7345_v40 }
 0x7ff   :  { %v4814_v36 = vpop.eup %4813  ;;  %v3601_v13 = vmul.f32 0.6931472, %v4812_v22  ;;  %4825 = vlog2.f32 %v3582_v60 }
 0x800   :  { %v4816_v20 = vpop.eup %4815  ;;  %v3603_v43 = vmul.f32 0.6931472, %v4814_v36  ;;  %v3610_v4 = vmul.f32 %v3599_v28, %v3592_v29  ;;  %4827 = vlog2.f32 %v3583_v49 }
 0x801   :  { %v4818_v46 = vpop.eup %4817  ;;  %v3605_v51 = vmul.f32 0.6931472, %v4816_v20  ;;  %v3611_v17 = vmul.f32 %v3601_v13, %v3593_v56  ;;  %4829 = vlog2.f32 %v3584_v14 }
 0x802   :  { %v4820_v9 = vpop.eup %4819  ;;  %v3607_v15 = vmul.f32 0.6931472, %v4818_v46  ;;  %v3612_v48 = vmul.f32 %v3603_v43, %v3594_v38  ;;  %v3616_v53 = vadd.f32 0.9189385, %v3610_v4  ;;  %4831 = vlog2.f32 %v3585_v18 }
 0x803   :  { %v4822_v57 = vpop.eup %4821  ;;  %v3609_v45 = vmul.f32 0.6931472, %v4820_v9  ;;  %v3613_v27 = vmul.f32 %v3605_v51, %v3595_v47  ;;  %v3617_v21 = vadd.f32 0.9189385, %v3611_v17 }
 0x804   :  { %v4824_v50 = vpop.eup %4823  ;;  %v3614_v2 = vmul.f32 %v3607_v15, %v3596_v24  ;;  %v3618_v25 = vadd.f32 0.9189385, %v3612_v48  ;;  %v3622_v39 = vsub.f32 %v3616_v53, %v8783_v37  ;;  %v3629_v0 = vmul.f32 0.6931472, %v4822_v57 }
 0x805   :  { %v4826_v16 = vpop.eup %4825  ;;  %v3615_v23 = vmul.f32 %v3609_v45, %v3597_v33  ;;  %v3619_v10 = vadd.f32 0.9189385, %v3613_v27  ;;  %v3623_v63 = vsub.f32 %v3617_v21, %v8812_v5  ;;  %v3631_v31 = vmul.f32 0.6931472, %v4824_v50 }
 0x806   :  { %v4828_v60 = vpop.eup %4827  ;;  %v3620_v19 = vadd.f32 0.9189385, %v3614_v2  ;;  %v3624_v49 = vsub.f32 %v3618_v25, %v8820_v3  ;;  %v3633_v42 = vmul.f32 0.6931472, %v4826_v16  ;;  %v3640_v61 = vadd.f32 %v3629_v0, %v3622_v39 }
 0x807   :  { %v4830_v14 = vpop.eup %4829  ;;  %v3621_v22 = vadd.f32 0.9189385, %v3615_v23  ;;  %v3625_v18 = vsub.f32 %v3619_v10, %v8827_v52  ;;  %v3635_v29 = vmul.f32 0.6931472, %v4828_v60  ;;  %v3641_v28 = vadd.f32 %v3631_v31, %v3623_v63 }
 0x808   :  { %v4832_v37 = vpop.eup %4831  ;;  %v3626_v36 = vsub.f32 %v3620_v19, %v8832_v1  ;;  %v3637_v56 = vmul.f32 0.6931472, %v4830_v14  ;;  %v3642_v38 = vadd.f32 %v3633_v42, %v3624_v49  ;;  %v3646_v5 = vsub.f32 %v2764_v7, %v3640_v61 }
 0x809   :  { %v3627_v13 = vsub.f32 %v3621_v22, %v8838_v26  ;;  %v3639_v3 = vmul.f32 0.6931472, %v4832_v37  ;;  %v3643_v20 = vadd.f32 %v3635_v29, %v3625_v18  ;;  %v3647_v47 = vsub.f32 %v2765_v35, %v3641_v28 }
 0x80a   :  { %v3644_v52 = vadd.f32 %v3637_v56, %v3626_v36  ;;  %v3648_v43 = vsub.f32 %v2766_v44, %v3642_v38  ;;  %v3652_v1 = vadd.f32 359.13422, %v3646_v5 }
 0x80b   :  { %v3645_v4 = vadd.f32 %v3639_v3, %v3627_v13  ;;  %v3649_v32 = vsub.f32 %v2767_v11, %v3643_v20  ;;  %v3653_v30 = vadd.f32 359.13422, %v3647_v47 }
 0x80c   :  { %v3650_v7 = vsub.f32 %v2768_v54, %v3644_v52  ;;  %v3654_v35 = vadd.f32 359.13422, %v3648_v43 }
 0x80d   :  { %v3651_v41 = vsub.f32 %v9257_v8, %v3645_v4  ;;  %v3658_v26 = vadd.f32 %v3653_v30, %v3652_v1  ;;  %v3655_v46 = vadd.f32 359.13422, %v3649_v32 }
 0x80e   :  { %v3656_v12 = vadd.f32 359.13422, %v3650_v7 }
 0x80f   :  { %v3659_v62 = vadd.f32 %v3658_v26, %v3654_v35  ;;  %v3657_v24 = vadd.f32 359.13422, %v3651_v41 }
 0x811   :  { %v3660_v44 = vadd.f32 %v3659_v62, %v3655_v46 }
 0x813   :  { %v3661_v51 = vadd.f32 %v3660_v44, %v3656_v12 }
 0x815   :  { %v3662_v17 = vadd.f32 %v3661_v51, %v3657_v24 }
 0x817   :  { %3663 = vadd.xlane.f32.xlu1 %v3662_v17 }
 0x88a   :  { %v3664_v34 = vpop.xlane.xlu1 %3663 }
 0x88b   :  { %3667 = vst [vmem:[%s8891_s9 + $0x10] sm:$0xff] %v3664_v34 }

</bundles_post_ra>
